<compile_context>
chip_gen: v7x
topology: tpu7x:2x2x1
jax: 0.10.0
libtpu: 0.0.40
codegen_flags: <defaults>
</compile_context>

<pallas_src>
import functools
import math

import jax
import jax.numpy as jnp
from jax.experimental import pallas as pl
from jax.experimental.pallas import tpu as pltpu

D_MODEL = 512
D_K = 64
D_V = 64
N_HEADS = 8
QKV_DIM = (D_K + D_K + D_V) * N_HEADS          # 1536
_LN_EPS = 1e-5
_TIME_TILE = 512                               # rows per projection / LN tile


# --------------------------------------------------------------------------
# Generation-aware helpers (VMEM budgeting, compiler params)
# --------------------------------------------------------------------------
def _phys_vmem_bytes():
    try:
        info = pltpu.get_tpu_info()
        for name in ("vmem_capacity_bytes", "vmem_size_bytes", "vmem_bytes"):
            v = getattr(info, name, None)
            if v:
                return int(v)
    except Exception:
        pass
    return 64 * 1024 * 1024                    # conservative (v7x per-core)


def _device_kind():
    try:
        return jax.devices()[0].device_kind.lower()
    except Exception:
        return ""


def _mosaic_params(dimension_semantics, est_bytes):
    phys = _phys_vmem_bytes()
    limit = int(min(phys * 3 // 4, max(32 * 1024 * 1024, 2 * est_bytes)))
    limit = max(limit, 16 * 1024 * 1024)
    return pltpu.CompilerParams(dimension_semantics=dimension_semantics,
                                vmem_limit_bytes=limit)


def _time_tile(T):
    # Full-extent block if it fits, otherwise an 8-aligned 512-row tile
    # (partial last blocks are masked by Pallas; rows are independent).
    return T if T <= _TIME_TILE else _TIME_TILE


# --------------------------------------------------------------------------
# Kernel 1: fused QKV projection, lane-dense bf16 Q/K/V slabs.
# --------------------------------------------------------------------------
def _qkv_kernel(x_ref, w_ref, b_ref, q_ref, k_ref, v_ref):
    # (tt,512)bf16 @ (512,1536)bf16 -> f32 accum, + bias, one cast to bf16.
    y = jnp.dot(x_ref[0], w_ref[...], preferred_element_type=jnp.float32)
    y = (y + b_ref[...]).astype(jnp.bfloat16)                 # (tt, 1536)
    # Lane-dense 512-wide stores (no per-head 64-wide masked stores).
    q_ref[0] = y[:, :D_MODEL]
    k_ref[0] = y[:, D_MODEL:2 * D_MODEL]
    v_ref[0] = y[:, 2 * D_MODEL:]


def qkv_projection(x16, w_qkv, b_qkv):
    B, T, _ = x16.shape
    tt = _time_tile(T)
    grid = (B, pl.cdiv(T, tt))
    est = (tt * (2 * D_MODEL * 2 + QKV_DIM * 4 + QKV_DIM * 2
                 + 3 * 2 * D_MODEL * 2)
           + D_MODEL * QKV_DIM * 2)
    out_spec = pl.BlockSpec((1, tt, D_MODEL), lambda b, t: (b, t, 0))
    return pl.pallas_call(
        _qkv_kernel,
        grid=grid,
        in_specs=[
            pl.BlockSpec((1, tt, D_MODEL), lambda b, t: (b, t, 0)),
            # TODO(synk): pipeline_mode=pl.Buffered(1) on the constant weight /
            # bias blocks would free ~1.5 MiB of VMEM headroom on v7x.
            pl.BlockSpec((D_MODEL, QKV_DIM), lambda b, t: (0, 0)),
            pl.BlockSpec((1, QKV_DIM), lambda b, t: (0, 0)),
        ],
        out_specs=(out_spec, out_spec, out_spec),
        out_shape=(
            jax.ShapeDtypeStruct((B, T, D_MODEL), jnp.bfloat16),
            jax.ShapeDtypeStruct((B, T, D_MODEL), jnp.bfloat16),
            jax.ShapeDtypeStruct((B, T, D_MODEL), jnp.bfloat16),
        ),
        compiler_params=_mosaic_params(("parallel", "parallel"), est),
    )(x16, w_qkv, b_qkv)


# --------------------------------------------------------------------------
# Kernel 2: scaled-dot-product attention (no mask), hb heads per grid step.
# --------------------------------------------------------------------------
def _attn_kernel(q_ref, k_ref, v_ref, ctx_ref, attn_ref, *, hb, bf16_exp):
    T = q_ref.shape[1]
    # One in-VMEM relayout per operand: (T, hb*64) -> (hb, T, 64).
    q = jnp.transpose(q_ref[0].reshape(T, hb, D_K), (1, 0, 2))
    k = jnp.transpose(k_ref[0].reshape(T, hb, D_K), (1, 0, 2))
    v = jnp.transpose(v_ref[0].reshape(T, hb, D_V), (1, 0, 2))
    # 1/sqrt(d_k) is folded into W_Q in the wrapper -> no per-element scale.
    s = jnp.einsum("htd,hsd->hts", q, k,
                   preferred_element_type=jnp.float32)        # (hb, T, T) f32
    m = jnp.max(s, axis=-1, keepdims=True)
    if bf16_exp:
        # v6e/v7x only: bf16 EUP ~2x exp throughput; denominator stays f32.
        e = jnp.exp((s - m).astype(jnp.bfloat16))
        denom = jnp.sum(e.astype(jnp.float32), axis=-1, keepdims=True)
        inv = pl.reciprocal(denom, approx=True)
        p = e * inv.astype(jnp.bfloat16)                      # bf16 probs
    else:
        e = jnp.exp(s - m)                                    # f32 (v5e path)
        denom = jnp.sum(e, axis=-1, keepdims=True)
        inv = pl.reciprocal(denom, approx=True)
        p = (e * inv).astype(jnp.bfloat16)
    attn_ref[0] = p                                           # bf16 (hb,T,T)
    ctx = jnp.einsum("hts,hsd->htd", p, v,
                     preferred_element_type=jnp.float32)      # (hb, T, dv)
    # Lane-dense (T, hb*64) ctx store; head order matches PyTorch's merge.
    ctx_ref[0] = jnp.transpose(ctx, (1, 0, 2)).reshape(T, hb * D_V) \
                    .astype(ctx_ref.dtype)


def _attn_budget_bytes():
    phys = _phys_vmem_bytes()
    if "v5" in _device_kind():
        # v5e: 16 MiB default scoped VMEM, lowest HBM BW -> keep blocks small.
        return 12 * 1024 * 1024
    # v6e (128 MiB phys) -> 48 MiB, v7x (64 MiB phys) -> 32 MiB.
    return min(phys // 2, 48 * 1024 * 1024)


def _pick_heads_per_block(H, T, B):
    # Per-head per-step bytes: double-buffered bf16 attn block (4*T*T) +
    # f32/bf16 s/e/p temporaries (~12*T*T) + double-buffered q/k/v/ctx slabs.
    per_head = 16 * T * T + 2048 * T
    hb = max(2, min(H, _attn_budget_bytes() // max(per_head, 1)))
    while hb > 2 and (H % hb or hb % 2):   # hb*64 lanes must be 128-multiple
        hb -= 1
    hb = max(hb, 2)
    if B == 1 and hb == H and H >= 4:
        hb = H // 2                        # >=2 grid steps -> both v7x TCs busy
        while hb > 2 and (H % hb or hb % 2):
            hb -= 1
        hb = max(hb, 2)
    return hb
    # TODO(synk): for very large T a flash-style KV-tiled softmax would be
    # needed, but the module's interface requires the full (B,H,T,T) attn.


def attention(q, k, v):
    B, T, _ = q.shape
    H = N_HEADS
    hb = _pick_heads_per_block(H, T, B)
    grid = (B, H // hb)
    kind = _device_kind()
    bf16_exp = ("v6" in kind) or ("v7" in kind) or ("7x" in kind)
    kernel = functools.partial(_attn_kernel, hb=hb, bf16_exp=bf16_exp)
    slab_blk = pl.BlockSpec((1, T, hb * D_K), lambda b, h: (b, 0, h))
    attn_blk = pl.BlockSpec((1, hb, T, T), lambda b, h: (b, h, 0, 0))
    est = hb * (16 * T * T + 2048 * T)
    return pl.pallas_call(
        kernel,
        grid=grid,
        in_specs=[slab_blk, slab_blk, slab_blk],
        out_specs=(slab_blk, attn_blk),
        out_shape=(
            jax.ShapeDtypeStruct((B, T, H * D_V), jnp.bfloat16),
            jax.ShapeDtypeStruct((B, H, T, T), jnp.bfloat16),
        ),
        compiler_params=_mosaic_params(("parallel", "parallel"), est),
    )(q, k, v)


# --------------------------------------------------------------------------
# Kernel 3: fused fc (single 512-deep contraction) + residual + LayerNorm.
# --------------------------------------------------------------------------
def _fc_ln_kernel(ctx_ref, w_ref, b_ref, res_ref, g_ref, be_ref, o_ref):
    y = jnp.dot(ctx_ref[0], w_ref[...],
                preferred_element_type=jnp.float32)           # (tt,512)@(512,512)
    y = y + b_ref[...] + res_ref[0]
    mean = jnp.mean(y, axis=-1, keepdims=True)
    var = jnp.mean((y - mean) ** 2, axis=-1, keepdims=True)
    o_ref[0] = ((y - mean) * jax.lax.rsqrt(var + _LN_EPS)
                * g_ref[...] + be_ref[...]).astype(o_ref.dtype)


def fc_residual_layernorm(ctx, w_fc, b_fc, residual, gamma, beta):
    B, T, _ = ctx.shape
    tt = _time_tile(T)
    grid = (B, pl.cdiv(T, tt))
    est = tt * D_MODEL * (2 * 2 + 2 * 4 + 4 + 2 * 4) + D_MODEL * D_MODEL * 2
    return pl.pallas_call(
        _fc_ln_kernel,
        grid=grid,
        in_specs=[
            pl.BlockSpec((1, tt, D_MODEL), lambda b, t: (b, t, 0)),
            pl.BlockSpec((D_MODEL, D_MODEL), lambda b, t: (0, 0)),
            pl.BlockSpec((1, D_MODEL), lambda b, t: (0, 0)),
            pl.BlockSpec((1, tt, D_MODEL), lambda b, t: (b, t, 0)),
            pl.BlockSpec((1, D_MODEL), lambda b, t: (0, 0)),
            pl.BlockSpec((1, D_MODEL), lambda b, t: (0, 0)),
        ],
        out_specs=pl.BlockSpec((1, tt, D_MODEL), lambda b, t: (b, t, 0)),
        out_shape=jax.ShapeDtypeStruct((B, T, D_MODEL), jnp.float32),
        compiler_params=_mosaic_params(("parallel", "parallel"), est),
    )(ctx, w_fc, b_fc, residual, gamma, beta)


# --------------------------------------------------------------------------
# Parameter init (PyTorch nn.Linear-style uniform bounds, deterministic)
# --------------------------------------------------------------------------
def _init_linear(key, fan_in, fan_out):
    kw, kb = jax.random.split(key)
    bound = 1.0 / math.sqrt(fan_in)
    w = jax.random.uniform(kw, (fan_in, fan_out), jnp.float32, -bound, bound)
    b = jax.random.uniform(kb, (fan_out,), jnp.float32, -bound, bound)
    return w, b


def init_params(key):
    ks = jax.random.split(key, 4)
    return {
        "W_Q": _init_linear(ks[0], D_MODEL, D_K * N_HEADS),
        "W_K": _init_linear(ks[1], D_MODEL, D_K * N_HEADS),
        "W_V": _init_linear(ks[2], D_MODEL, D_V * N_HEADS),
        "fc": _init_linear(ks[3], N_HEADS * D_V, D_MODEL),
        "ln_gamma": jnp.ones((D_MODEL,), jnp.float32),
        "ln_beta": jnp.zeros((D_MODEL,), jnp.float32),
    }


# --------------------------------------------------------------------------
# Forward pass (mirrors EncoderLayer.forward: self-attn -> fc -> +res -> LN)
# --------------------------------------------------------------------------
def encoder_layer_forward(params, enc_inputs):
    x = enc_inputs.astype(jnp.float32)            # residual path stays f32
    x16 = x.astype(jnp.bfloat16)                  # single cast feeding kernel 1

    scale = 1.0 / math.sqrt(D_K)                  # folded into W_Q / b_Q
    wq, bq = params["W_Q"]
    wk, bk = params["W_K"]
    wv, bv = params["W_V"]
    w_qkv = jnp.concatenate([wq * scale, wk, wv], axis=1).astype(jnp.bfloat16)
    b_qkv = jnp.concatenate([bq * scale, bk, bv]).reshape(1, QKV_DIM) \
               .astype(jnp.float32)

    # TODO(synk): optional deeper fusion — fold the QKV projection into the
    # attention kernel per batch element to drop the Q/K/V HBM round trip.
    q, k, v = qkv_projection(x16, w_qkv, b_qkv)   # (B, T, 512) bf16 each
    ctx, attn = attention(q, k, v)                # ctx (B,T,512) bf16, attn bf16

    w_fc, b_fc = params["fc"]
    out = fc_residual_layernorm(
        ctx, w_fc.astype(jnp.bfloat16), b_fc.reshape(1, D_MODEL), x,
        params["ln_gamma"].reshape(1, D_MODEL),
        params["ln_beta"].reshape(1, D_MODEL))
    return out, attn


encoder_layer = jax.jit(encoder_layer_forward)


# --------------------------------------------------------------------------
# Pure-JAX f32 reference (mirrors the PyTorch module exactly)
# --------------------------------------------------------------------------
def _reference(params, x):
    B, T, _ = x.shape
    wq, bq = params["W_Q"]
    wk, bk = params["W_K"]
    wv, bv = params["W_V"]

    def split(y, d):
        return jnp.transpose(y.reshape(B, T, N_HEADS, d), (0, 2, 1, 3))

    q = split(x @ wq + bq, D_K)
    k = split(x @ wk + bk, D_K)
    v = split(x @ wv + bv, D_V)
    s = jnp.einsum("bhtd,bhsd->bhts", q, k) / math.sqrt(D_K)
    attn = jax.nn.softmax(s, axis=-1)
    ctx = jnp.einsum("bhts,bhsd->bhtd", attn, v)
    ctx = jnp.transpose(ctx, (0, 2, 1, 3)).reshape(B, T, N_HEADS * D_V)
    w_fc, b_fc = params["fc"]
    y = ctx @ w_fc + b_fc + x
    mean = y.mean(-1, keepdims=True)
    var = ((y - mean) ** 2).mean(-1, keepdims=True)
    out = (y - mean) * jax.lax.rsqrt(var + _LN_EPS) * params["ln_gamma"] \
          + params["ln_beta"]
    return out, attn


# --------------------------------------------------------------------------
if __name__ == "__main__":
    key = jax.random.PRNGKey(0)
    B, T = 2, 8

    key, kx = jax.random.split(key)
    enc_inputs = jax.random.normal(kx, (B, T, D_MODEL), dtype=jnp.float32)
    params = init_params(key)

    out, attn = encoder_layer(params, enc_inputs)
    jax.block_until_ready(out)
    jax.block_until_ready(attn)

    assert out.shape == (B, T, D_MODEL)
    assert attn.shape == (B, N_HEADS, T, T)
    assert bool(jnp.isfinite(out).all())
    assert bool(jnp.isfinite(attn.astype(jnp.float32)).all())

    # bf16 weights/activations + approximate reciprocal -> loose tolerances
    # vs. the f32 PyTorch-equivalent reference.
    ref_out, ref_attn = _reference(params, enc_inputs.astype(jnp.float32))
    assert float(jnp.max(jnp.abs(out - ref_out))) < 1e-1
    assert float(jnp.max(jnp.abs(attn.astype(jnp.float32) - ref_attn))) < 3e-2

    print("KERNEL_OK")
</pallas_src>

<mosaic_0001>
module attributes {stable_mosaic.version = 11 : i64} {
  func.func @_fc_ln_kernel(%arg0: i32, %arg1: i32, %arg2: memref<1x8x512xbf16, #tpu.memory_space<vmem>>, %arg3: memref<512x512xbf16, #tpu.memory_space<vmem>>, %arg4: memref<1x512xf32, #tpu.memory_space<vmem>>, %arg5: memref<1x8x512xf32, #tpu.memory_space<vmem>>, %arg6: memref<1x512xf32, #tpu.memory_space<vmem>>, %arg7: memref<1x512xf32, #tpu.memory_space<vmem>>, %arg8: memref<1x8x512xf32, #tpu.memory_space<vmem>>) attributes {dimension_semantics = [#tpu.dimension_semantics<parallel>, #tpu.dimension_semantics<parallel>], iteration_bounds = array<i64: 2, 1>, scalar_prefetch = 0 : i64, scratch_operands = 0 : i64, tpu.core_type = #tpu.core_type<tc>, window_params = [{transform_indices = @transform_0, window_bounds = array<i64: 1, 8, 512>}, {pipeline_mode = #tpu.pipeline_mode<synchronous>, transform_indices = @transform_1, window_bounds = array<i64: 512, 512>}, {pipeline_mode = #tpu.pipeline_mode<synchronous>, transform_indices = @transform_2, window_bounds = array<i64: 1, 512>}, {transform_indices = @transform_3, window_bounds = array<i64: 1, 8, 512>}, {pipeline_mode = #tpu.pipeline_mode<synchronous>, transform_indices = @transform_4, window_bounds = array<i64: 1, 512>}, {pipeline_mode = #tpu.pipeline_mode<synchronous>, transform_indices = @transform_5, window_bounds = array<i64: 1, 512>}, {transform_indices = @transform_6, window_bounds = array<i64: 1, 8, 512>}]} {
    %c0 = arith.constant 0 : index
    %c0_0 = arith.constant 0 : index
    %c0_1 = arith.constant 0 : index
    %0 = vector.load %arg2[%c0, %c0_0, %c0_1] : memref<1x8x512xbf16, #tpu.memory_space<vmem>>, vector<1x8x512xbf16>
    %1 = vector.shape_cast %0 : vector<1x8x512xbf16> to vector<8x512xbf16>
    %c0_2 = arith.constant 0 : index
    %c0_3 = arith.constant 0 : index
    %2 = vector.load %arg3[%c0_2, %c0_3] : memref<512x512xbf16, #tpu.memory_space<vmem>>, vector<512x512xbf16>
    %cst = arith.constant dense<0.000000e+00> : vector<8x512xf32>
    %3 = tpu.matmul %1, %2, %cst {dimension_numbers = #tpu.dot_dimension_numbers<[1], [0], [0], [1], [0, 0, 1, 1], [], []>} : vector<8x512xbf16>, vector<512x512xbf16>, vector<8x512xf32> -> vector<8x512xf32>
    %c0_4 = arith.constant 0 : index
    %c0_5 = arith.constant 0 : index
    %4 = vector.load %arg4[%c0_4, %c0_5] : memref<1x512xf32, #tpu.memory_space<vmem>>, vector<1x512xf32>
    %5 = vector.broadcast %4 : vector<1x512xf32> to vector<8x512xf32>
    %6 = arith.addf %3, %5 : vector<8x512xf32>
    %c0_6 = arith.constant 0 : index
    %c0_7 = arith.constant 0 : index
    %c0_8 = arith.constant 0 : index
    %7 = vector.load %arg5[%c0_6, %c0_7, %c0_8] : memref<1x8x512xf32, #tpu.memory_space<vmem>>, vector<1x8x512xf32>
    %8 = vector.shape_cast %7 : vector<1x8x512xf32> to vector<8x512xf32>
    %9 = arith.addf %6, %8 : vector<8x512xf32>
    %cst_9 = arith.constant dense<0.000000e+00> : vector<8xf32>
    %10 = vector.multi_reduction <add>, %9, %cst_9 [1] : vector<8x512xf32> to vector<8xf32>
    %11 = vector.shape_cast %10 : vector<8xf32> to vector<8x1xf32>
    %cst_10 = arith.constant 5.120000e+02 : f32
    %12 = vector.broadcast %cst_10 : f32 to vector<8x1xf32>
    %13 = arith.divf %11, %12 : vector<8x1xf32>
    %14 = vector.broadcast %13 : vector<8x1xf32> to vector<8x512xf32>
    %15 = arith.subf %9, %14 : vector<8x512xf32>
    %16 = arith.mulf %15, %15 : vector<8x512xf32>
    %cst_11 = arith.constant dense<0.000000e+00> : vector<8xf32>
    %17 = vector.multi_reduction <add>, %16, %cst_11 [1] : vector<8x512xf32> to vector<8xf32>
    %18 = vector.shape_cast %17 : vector<8xf32> to vector<8x1xf32>
    %cst_12 = arith.constant 5.120000e+02 : f32
    %19 = vector.broadcast %cst_12 : f32 to vector<8x1xf32>
    %20 = arith.divf %18, %19 : vector<8x1xf32>
    %21 = vector.broadcast %13 : vector<8x1xf32> to vector<8x512xf32>
    %22 = arith.subf %9, %21 : vector<8x512xf32>
    %cst_13 = arith.constant 9.99999974E-6 : f32
    %23 = vector.broadcast %cst_13 : f32 to vector<8x1xf32>
    %24 = arith.addf %20, %23 : vector<8x1xf32>
    %25 = math.rsqrt %24 : vector<8x1xf32>
    %26 = vector.broadcast %25 : vector<8x1xf32> to vector<8x512xf32>
    %27 = arith.mulf %22, %26 : vector<8x512xf32>
    %c0_14 = arith.constant 0 : index
    %c0_15 = arith.constant 0 : index
    %28 = vector.load %arg6[%c0_14, %c0_15] : memref<1x512xf32, #tpu.memory_space<vmem>>, vector<1x512xf32>
    %29 = vector.broadcast %28 : vector<1x512xf32> to vector<8x512xf32>
    %30 = arith.mulf %27, %29 : vector<8x512xf32>
    %c0_16 = arith.constant 0 : index
    %c0_17 = arith.constant 0 : index
    %31 = vector.load %arg7[%c0_16, %c0_17] : memref<1x512xf32, #tpu.memory_space<vmem>>, vector<1x512xf32>
    %32 = vector.broadcast %31 : vector<1x512xf32> to vector<8x512xf32>
    %33 = arith.addf %30, %32 : vector<8x512xf32>
    %c0_18 = arith.constant 0 : index
    %c0_19 = arith.constant 0 : index
    %c0_20 = arith.constant 0 : index
    %34 = vector.load %arg8[%c0_18, %c0_19, %c0_20] : memref<1x8x512xf32, #tpu.memory_space<vmem>>, vector<1x8x512xf32>
    %35 = vector.shape_cast %34 : vector<1x8x512xf32> to vector<8x512xf32>
    %36 = vector.shape_cast %33 : vector<8x512xf32> to vector<1x8x512xf32>
    tpu.vector_store %arg8[%c0_18, %c0_19, %c0_20], %36 {strides = array<i32>} : memref<1x8x512xf32, #tpu.memory_space<vmem>>, vector<1x8x512xf32>,
    return
  }
  func.func @transform_0(%arg0: i32, %arg1: i32) -> (i32, i32, i32) {
    %c0_i32 = arith.constant 0 : i32
    %c0_i32_0 = arith.constant 0 : i32
    return %arg0, %arg1, %c0_i32 : i32, i32, i32
  }
  func.func @transform_1(%arg0: i32, %arg1: i32) -> (i32, i32) {
    %c0_i32 = arith.constant 0 : i32
    %c0_i32_0 = arith.constant 0 : i32
    %c0_i32_1 = arith.constant 0 : i32
    return %c0_i32, %c0_i32_0 : i32, i32
  }
  func.func @transform_2(%arg0: i32, %arg1: i32) -> (i32, i32) {
    %c0_i32 = arith.constant 0 : i32
    %c0_i32_0 = arith.constant 0 : i32
    %c0_i32_1 = arith.constant 0 : i32
    return %c0_i32, %c0_i32_0 : i32, i32
  }
  func.func @transform_3(%arg0: i32, %arg1: i32) -> (i32, i32, i32) {
    %c0_i32 = arith.constant 0 : i32
    %c0_i32_0 = arith.constant 0 : i32
    return %arg0, %arg1, %c0_i32 : i32, i32, i32
  }
  func.func @transform_4(%arg0: i32, %arg1: i32) -> (i32, i32) {
    %c0_i32 = arith.constant 0 : i32
    %c0_i32_0 = arith.constant 0 : i32
    %c0_i32_1 = arith.constant 0 : i32
    return %c0_i32, %c0_i32_0 : i32, i32
  }
  func.func @transform_5(%arg0: i32, %arg1: i32) -> (i32, i32) {
    %c0_i32 = arith.constant 0 : i32
    %c0_i32_0 = arith.constant 0 : i32
    %c0_i32_1 = arith.constant 0 : i32
    return %c0_i32, %c0_i32_0 : i32, i32
  }
  func.func @transform_6(%arg0: i32, %arg1: i32) -> (i32, i32, i32) {
    %c0_i32 = arith.constant 0 : i32
    %c0_i32_0 = arith.constant 0 : i32
    return %arg0, %arg1, %c0_i32 : i32, i32, i32
  }
}

module attributes {stable_mosaic.version = 11 : i64} {
  func.func @_attn_kernel(%arg0: i32, %arg1: i32, %arg2: memref<1x8x512xbf16, #tpu.memory_space<vmem>>, %arg3: memref<1x8x512xbf16, #tpu.memory_space<vmem>>, %arg4: memref<1x8x512xbf16, #tpu.memory_space<vmem>>, %arg5: memref<1x8x512xbf16, #tpu.memory_space<vmem>>, %arg6: memref<1x8x8x8xbf16, #tpu.memory_space<vmem>>) attributes {dimension_semantics = [#tpu.dimension_semantics<parallel>, #tpu.dimension_semantics<parallel>], iteration_bounds = array<i64: 2, 1>, scalar_prefetch = 0 : i64, scratch_operands = 0 : i64, tpu.core_type = #tpu.core_type<tc>, window_params = [{transform_indices = @transform_0, window_bounds = array<i64: 1, 8, 512>}, {transform_indices = @transform_1, window_bounds = array<i64: 1, 8, 512>}, {transform_indices = @transform_2, window_bounds = array<i64: 1, 8, 512>}, {transform_indices = @transform_3, window_bounds = array<i64: 1, 8, 512>}, {transform_indices = @transform_4, window_bounds = array<i64: 1, 8, 8, 8>}]} {
    %c0 = arith.constant 0 : index
    %c0_0 = arith.constant 0 : index
    %c0_1 = arith.constant 0 : index
    %0 = vector.load %arg2[%c0, %c0_0, %c0_1] : memref<1x8x512xbf16, #tpu.memory_space<vmem>>, vector<1x8x512xbf16>
    %1 = vector.shape_cast %0 : vector<1x8x512xbf16> to vector<8x512xbf16>
    %2 = vector.shape_cast %1 : vector<8x512xbf16> to vector<8x8x64xbf16>
    %3 = tpu.transpose %2, [1, 0, 2] : vector<8x8x64xbf16> -> vector<8x8x64xbf16>
    %c0_2 = arith.constant 0 : index
    %c0_3 = arith.constant 0 : index
    %c0_4 = arith.constant 0 : index
    %4 = vector.load %arg3[%c0_2, %c0_3, %c0_4] : memref<1x8x512xbf16, #tpu.memory_space<vmem>>, vector<1x8x512xbf16>
    %5 = vector.shape_cast %4 : vector<1x8x512xbf16> to vector<8x512xbf16>
    %6 = vector.shape_cast %5 : vector<8x512xbf16> to vector<8x8x64xbf16>
    %7 = tpu.transpose %6, [1, 0, 2] : vector<8x8x64xbf16> -> vector<8x8x64xbf16>
    %c0_5 = arith.constant 0 : index
    %c0_6 = arith.constant 0 : index
    %c0_7 = arith.constant 0 : index
    %8 = vector.load %arg4[%c0_5, %c0_6, %c0_7] : memref<1x8x512xbf16, #tpu.memory_space<vmem>>, vector<1x8x512xbf16>
    %9 = vector.shape_cast %8 : vector<1x8x512xbf16> to vector<8x512xbf16>
    %10 = vector.shape_cast %9 : vector<8x512xbf16> to vector<8x8x64xbf16>
    %11 = tpu.transpose %10, [1, 0, 2] : vector<8x8x64xbf16> -> vector<8x8x64xbf16>
    "tpu.trace_start"() <{level = 10 : i32, message = "htd,hsd->hts"}> : () -> ()
    %cst = arith.constant dense<0.000000e+00> : vector<8x8x8xf32>
    %12 = tpu.matmul %3, %7, %cst {dimension_numbers = #tpu.dot_dimension_numbers<[2], [2], [1], [1], [0, 0, 0, 1, 1, 1], [0], [0]>} : vector<8x8x64xbf16>, vector<8x8x64xbf16>, vector<8x8x8xf32> -> vector<8x8x8xf32>
    "tpu.trace_stop"() : () -> ()
    %cst_8 = arith.constant dense<0xFF800000> : vector<8x8xf32>
    %13 = vector.multi_reduction <maximumf>, %12, %cst_8 [2] : vector<8x8x8xf32> to vector<8x8xf32>
    %14 = vector.shape_cast %13 : vector<8x8xf32> to vector<8x8x1xf32>
    %15 = vector.broadcast %14 : vector<8x8x1xf32> to vector<8x8x8xf32>
    %16 = arith.subf %12, %15 : vector<8x8x8xf32>
    %17 = math.exp %16 : vector<8x8x8xf32>
    %cst_9 = arith.constant dense<0.000000e+00> : vector<8x8xf32>
    %18 = vector.multi_reduction <add>, %17, %cst_9 [2] : vector<8x8x8xf32> to vector<8x8xf32>
    %19 = vector.shape_cast %18 : vector<8x8xf32> to vector<8x8x1xf32>
    %20 = tpu.reciprocal %19 {approx = true} : vector<8x8x1xf32> -> vector<8x8x1xf32>
    %21 = vector.broadcast %20 : vector<8x8x1xf32> to vector<8x8x8xf32>
    %22 = arith.mulf %17, %21 : vector<8x8x8xf32>
    %23 = arith.truncf %22 : vector<8x8x8xf32> to vector<8x8x8xbf16>
    %c0_10 = arith.constant 0 : index
    %c0_11 = arith.constant 0 : index
    %c0_12 = arith.constant 0 : index
    %c0_13 = arith.constant 0 : index
    %24 = vector.load %arg6[%c0_10, %c0_11, %c0_12, %c0_13] : memref<1x8x8x8xbf16, #tpu.memory_space<vmem>>, vector<1x8x8x8xbf16>
    %25 = vector.shape_cast %24 : vector<1x8x8x8xbf16> to vector<8x8x8xbf16>
    %26 = vector.shape_cast %23 : vector<8x8x8xbf16> to vector<1x8x8x8xbf16>
    tpu.vector_store %arg6[%c0_10, %c0_11, %c0_12, %c0_13], %26 {strides = array<i32>} : memref<1x8x8x8xbf16, #tpu.memory_space<vmem>>, vector<1x8x8x8xbf16>,
    "tpu.trace_start"() <{level = 10 : i32, message = "hts,hsd->htd"}> : () -> ()
    %cst_14 = arith.constant dense<0.000000e+00> : vector<8x8x64xf32>
    %27 = tpu.matmul %23, %11, %cst_14 {dimension_numbers = #tpu.dot_dimension_numbers<[2], [1], [1], [2], [0, 0, 0, 1, 1, 2], [0], [0]>} : vector<8x8x8xbf16>, vector<8x8x64xbf16>, vector<8x8x64xf32> -> vector<8x8x64xf32>
    "tpu.trace_stop"() : () -> ()
    %28 = tpu.transpose %27, [1, 0, 2] : vector<8x8x64xf32> -> vector<8x8x64xf32>
    %29 = vector.shape_cast %28 : vector<8x8x64xf32> to vector<8x512xf32>
    %30 = arith.truncf %29 : vector<8x512xf32> to vector<8x512xbf16>
    %c0_15 = arith.constant 0 : index
    %c0_16 = arith.constant 0 : index
    %c0_17 = arith.constant 0 : index
    %31 = vector.load %arg5[%c0_15, %c0_16, %c0_17] : memref<1x8x512xbf16, #tpu.memory_space<vmem>>, vector<1x8x512xbf16>
    %32 = vector.shape_cast %31 : vector<1x8x512xbf16> to vector<8x512xbf16>
    %33 = vector.shape_cast %30 : vector<8x512xbf16> to vector<1x8x512xbf16>
    tpu.vector_store %arg5[%c0_15, %c0_16, %c0_17], %33 {strides = array<i32>} : memref<1x8x512xbf16, #tpu.memory_space<vmem>>, vector<1x8x512xbf16>,
    return
  }
  func.func @transform_0(%arg0: i32, %arg1: i32) -> (i32, i32, i32) {
    %c0_i32 = arith.constant 0 : i32
    %c0_i32_0 = arith.constant 0 : i32
    return %arg0, %c0_i32, %arg1 : i32, i32, i32
  }
  func.func @transform_1(%arg0: i32, %arg1: i32) -> (i32, i32, i32) {
    %c0_i32 = arith.constant 0 : i32
    %c0_i32_0 = arith.constant 0 : i32
    return %arg0, %c0_i32, %arg1 : i32, i32, i32
  }
  func.func @transform_2(%arg0: i32, %arg1: i32) -> (i32, i32, i32) {
    %c0_i32 = arith.constant 0 : i32
    %c0_i32_0 = arith.constant 0 : i32
    return %arg0, %c0_i32, %arg1 : i32, i32, i32
  }
  func.func @transform_3(%arg0: i32, %arg1: i32) -> (i32, i32, i32) {
    %c0_i32 = arith.constant 0 : i32
    %c0_i32_0 = arith.constant 0 : i32
    return %arg0, %c0_i32, %arg1 : i32, i32, i32
  }
  func.func @transform_4(%arg0: i32, %arg1: i32) -> (i32, i32, i32, i32) {
    %c0_i32 = arith.constant 0 : i32
    %c0_i32_0 = arith.constant 0 : i32
    %c0_i32_1 = arith.constant 0 : i32
    return %arg0, %arg1, %c0_i32, %c0_i32_0 : i32, i32, i32, i32
  }
}

module attributes {stable_mosaic.version = 11 : i64} {
  func.func @_qkv_kernel(%arg0: i32, %arg1: i32, %arg2: memref<1x8x512xbf16, #tpu.memory_space<vmem>>, %arg3: memref<512x1536xbf16, #tpu.memory_space<vmem>>, %arg4: memref<1x1536xf32, #tpu.memory_space<vmem>>, %arg5: memref<1x8x512xbf16, #tpu.memory_space<vmem>>, %arg6: memref<1x8x512xbf16, #tpu.memory_space<vmem>>, %arg7: memref<1x8x512xbf16, #tpu.memory_space<vmem>>) attributes {dimension_semantics = [#tpu.dimension_semantics<parallel>, #tpu.dimension_semantics<parallel>], iteration_bounds = array<i64: 2, 1>, scalar_prefetch = 0 : i64, scratch_operands = 0 : i64, tpu.core_type = #tpu.core_type<tc>, window_params = [{transform_indices = @transform_0, window_bounds = array<i64: 1, 8, 512>}, {pipeline_mode = #tpu.pipeline_mode<synchronous>, transform_indices = @transform_1, window_bounds = array<i64: 512, 1536>}, {pipeline_mode = #tpu.pipeline_mode<synchronous>, transform_indices = @transform_2, window_bounds = array<i64: 1, 1536>}, {transform_indices = @transform_3, window_bounds = array<i64: 1, 8, 512>}, {transform_indices = @transform_4, window_bounds = array<i64: 1, 8, 512>}, {transform_indices = @transform_5, window_bounds = array<i64: 1, 8, 512>}]} {
    %c0 = arith.constant 0 : index
    %c0_0 = arith.constant 0 : index
    %c0_1 = arith.constant 0 : index
    %0 = vector.load %arg2[%c0, %c0_0, %c0_1] : memref<1x8x512xbf16, #tpu.memory_space<vmem>>, vector<1x8x512xbf16>
    %1 = vector.shape_cast %0 : vector<1x8x512xbf16> to vector<8x512xbf16>
    %c0_2 = arith.constant 0 : index
    %c0_3 = arith.constant 0 : index
    %2 = vector.load %arg3[%c0_2, %c0_3] : memref<512x1536xbf16, #tpu.memory_space<vmem>>, vector<512x1536xbf16>
    %cst = arith.constant dense<0.000000e+00> : vector<8x1536xf32>
    %3 = tpu.matmul %1, %2, %cst {dimension_numbers = #tpu.dot_dimension_numbers<[1], [0], [0], [1], [0, 0, 1, 1], [], []>} : vector<8x512xbf16>, vector<512x1536xbf16>, vector<8x1536xf32> -> vector<8x1536xf32>
    %c0_4 = arith.constant 0 : index
    %c0_5 = arith.constant 0 : index
    %4 = vector.load %arg4[%c0_4, %c0_5] : memref<1x1536xf32, #tpu.memory_space<vmem>>, vector<1x1536xf32>
    %5 = vector.broadcast %4 : vector<1x1536xf32> to vector<8x1536xf32>
    %6 = arith.addf %3, %5 : vector<8x1536xf32>
    %7 = arith.truncf %6 : vector<8x1536xf32> to vector<8x1536xbf16>
    %8 = vector.extract_strided_slice %7 {offsets = [0, 0], sizes = [8, 512], strides = [1, 1]} : vector<8x1536xbf16> to vector<8x512xbf16>
    %c0_6 = arith.constant 0 : index
    %c0_7 = arith.constant 0 : index
    %c0_8 = arith.constant 0 : index
    %9 = vector.load %arg5[%c0_6, %c0_7, %c0_8] : memref<1x8x512xbf16, #tpu.memory_space<vmem>>, vector<1x8x512xbf16>
    %10 = vector.shape_cast %9 : vector<1x8x512xbf16> to vector<8x512xbf16>
    %11 = vector.shape_cast %8 : vector<8x512xbf16> to vector<1x8x512xbf16>
    tpu.vector_store %arg5[%c0_6, %c0_7, %c0_8], %11 {strides = array<i32>} : memref<1x8x512xbf16, #tpu.memory_space<vmem>>, vector<1x8x512xbf16>,
    %12 = vector.extract_strided_slice %7 {offsets = [0, 512], sizes = [8, 512], strides = [1, 1]} : vector<8x1536xbf16> to vector<8x512xbf16>
    %c0_9 = arith.constant 0 : index
    %c0_10 = arith.constant 0 : index
    %c0_11 = arith.constant 0 : index
    %13 = vector.load %arg6[%c0_9, %c0_10, %c0_11] : memref<1x8x512xbf16, #tpu.memory_space<vmem>>, vector<1x8x512xbf16>
    %14 = vector.shape_cast %13 : vector<1x8x512xbf16> to vector<8x512xbf16>
    %15 = vector.shape_cast %12 : vector<8x512xbf16> to vector<1x8x512xbf16>
    tpu.vector_store %arg6[%c0_9, %c0_10, %c0_11], %15 {strides = array<i32>} : memref<1x8x512xbf16, #tpu.memory_space<vmem>>, vector<1x8x512xbf16>,
    %16 = vector.extract_strided_slice %7 {offsets = [0, 1024], sizes = [8, 512], strides = [1, 1]} : vector<8x1536xbf16> to vector<8x512xbf16>
    %c0_12 = arith.constant 0 : index
    %c0_13 = arith.constant 0 : index
    %c0_14 = arith.constant 0 : index
    %17 = vector.load %arg7[%c0_12, %c0_13, %c0_14] : memref<1x8x512xbf16, #tpu.memory_space<vmem>>, vector<1x8x512xbf16>
    %18 = vector.shape_cast %17 : vector<1x8x512xbf16> to vector<8x512xbf16>
    %19 = vector.shape_cast %16 : vector<8x512xbf16> to vector<1x8x512xbf16>
    tpu.vector_store %arg7[%c0_12, %c0_13, %c0_14], %19 {strides = array<i32>} : memref<1x8x512xbf16, #tpu.memory_space<vmem>>, vector<1x8x512xbf16>,
    return
  }
  func.func @transform_0(%arg0: i32, %arg1: i32) -> (i32, i32, i32) {
    %c0_i32 = arith.constant 0 : i32
    %c0_i32_0 = arith.constant 0 : i32
    return %arg0, %arg1, %c0_i32 : i32, i32, i32
  }
  func.func @transform_1(%arg0: i32, %arg1: i32) -> (i32, i32) {
    %c0_i32 = arith.constant 0 : i32
    %c0_i32_0 = arith.constant 0 : i32
    %c0_i32_1 = arith.constant 0 : i32
    return %c0_i32, %c0_i32_0 : i32, i32
  }
  func.func @transform_2(%arg0: i32, %arg1: i32) -> (i32, i32) {
    %c0_i32 = arith.constant 0 : i32
    %c0_i32_0 = arith.constant 0 : i32
    %c0_i32_1 = arith.constant 0 : i32
    return %c0_i32, %c0_i32_0 : i32, i32
  }
  func.func @transform_3(%arg0: i32, %arg1: i32) -> (i32, i32, i32) {
    %c0_i32 = arith.constant 0 : i32
    %c0_i32_0 = arith.constant 0 : i32
    return %arg0, %arg1, %c0_i32 : i32, i32, i32
  }
  func.func @transform_4(%arg0: i32, %arg1: i32) -> (i32, i32, i32) {
    %c0_i32 = arith.constant 0 : i32
    %c0_i32_0 = arith.constant 0 : i32
    return %arg0, %arg1, %c0_i32 : i32, i32, i32
  }
  func.func @transform_5(%arg0: i32, %arg1: i32) -> (i32, i32, i32) {
    %c0_i32 = arith.constant 0 : i32
    %c0_i32_0 = arith.constant 0 : i32
    return %arg0, %arg1, %c0_i32 : i32, i32, i32
  }
}

</mosaic_0001>

<bundles_post_ra>
// kernel: encoder_layer_forward.5
= control target key start
LH: loop header
LB: loop body
LE: loop exit
PB: predicated region body
PF: predicated region fallthrough
CT: control target
= control target key end

     0   :  { %11 = vsyncpa [#allocation3], 0  ;;  %s2557_s0 = inlined_call_operand.vmem [shape: bf16[2,8,512], index: 0, kind: input, shape index: {}]   ;;  %s2558_s1 = inlined_call_operand.vmem [shape: bf16[512,512], index: 1, kind: input, shape index: {}]   ;;  %s2559_s2 = inlined_call_operand.vmem [shape: f32[1,512], index: 2, kind: input, shape index: {}]   ;;  %s2560_s3 = inlined_call_operand.vmem [shape: f32[2,8,512], index: 3, kind: input, shape index: {}]   ;;  %s2561_s4 = inlined_call_operand.vmem [shape: f32[1,512], index: 4, kind: input, shape index: {}]   ;;  %s2562_s5 = inlined_call_operand.vmem [shape: f32[1,512], index: 5, kind: input, shape index: {}]   ;;  %s2563_s6 = inlined_call_operand.hbm [shape: f32[2,8,512], index: 6, kind: output, shape index: {}]  }
   0x1   :  { %13 = vsyncpa [#allocation3 + $0x1], 0  ;;  %s2009_s21 = smov 0   ;;  %s2011_s22 = smov 0  }
   0x2   :  { %s2013_s23 = smov 0   ;;  %s2015_s24 = smov 0  }
   0x3   :  { %s2017_s25 = smov 0   ;;  %s2019_s26 = smov 0  }
   0x4 LB: > { %s1490_s27 = sadd.s32 4294967295, %s1971_s26   ;;  %s1491_s28 = sadd.s32 4294967294, %s1971_s26   ;;  %s1971_s26 = sphi %s2019_s26, %s19_s26   ;;  %s1967_s25 = sphi %s2017_s25, %s2570_s25   ;;  %s1963_s24 = sphi %s2015_s24, %s2569_s24   ;;  %s1959_s23 = sphi %s2013_s23, %s2568_s23   ;;  %s1955_s22 = sphi %s2011_s22, %s2567_s22   ;;  %s1951_s21 = sphi %s2009_s21, %s2566_s21  }
   0x5   : > { %s31_s29 = sadd.s32 1, %s1967_s25  ;;  %s180_s30 = sadd.s32 1, %s1959_s23 }
   0x6   : > { %p33_p0 = scmp.ge.s32.totalorder %s31_s29, 2  ;;  %p190_p1 = scmp.ne.s32.totalorder %s1959_s23, %s1955_s22 }
   0x7   : > { %p191_p2 = scmp.eq.s32.totalorder %s1490_s27, 1  ;;  %p196_p3 = scmp.ne.s32.totalorder %s1955_s22, %s1951_s21 }
   0x8   : > { %s2572_s29 = smov (%p33_p0, %s31_s29), 0  ;;  %p197_p5 = scmp.eq.s32.totalorder %s1491_s28, 1 }
   0x9   : > { %p2049_p4 = por %p191_p2, %p190_p1  ;;  %s175_s8 = ssub.s32 %s1967_s25, %s2572_s29 }
   0xa   : > { %p1494_p6 = scmp.ge.s32.totalorder %s1971_s26, 1  ;;  %p178_p7 = scmp.eq.s32.totalorder %s175_s8, 0 }
   0xb   : > { %p2056_p8 = por %p197_p5, %p196_p3  ;;  %p251_p9 = scmp.lt.s32.totalorder %s1971_s26, 3 }
   0xc   : > { %s2062_s10 = scalar_select %p178_p7, %s1959_s23, %s180_s30  }
   0xd   : > { %p252_p10 = pnand %p1494_p6, %p251_p9 }
   0xe   : > { %v1695_v0 = vld [vmem:[%s2558_s1 + $0x4] ss:$16 sps:$4 sm:$0xff] (!%p252_p10)   ;;  %v1699_v2 = vld [vmem:[%s2558_s1] ss:$16 sps:$4 sm:$0xff] (!%p252_p10)   ;;  %p294_p11 = scmp.lt.s32.totalorder (!%p252_p10), %s1963_s24, 1  ;;  %s1639_s18 = sshll.u32 (!%p252_p10), %s1963_s24, 9 }
   0xf   : > { %255 = sbr.rel (%p252_p10) target bundleno = 697 (0x2b9), region = 44  ;;  %v1697_v1 = vld [vmem:[%s2558_s1 + $0x204] ss:$16 sps:$4 sm:$0xff] (!%p252_p10)   ;;  %1118 = vmatprep.subr.bf16.mxu0 (!%p252_p10), %v1695_v0  ;;  %v1700_v3 = vld [vmem:[%s2558_s1 + $0x200] ss:$16 sps:$4 sm:$0xff] (!%p252_p10)   ;;  %s2508_s30 = scalar_lea.hbm (!%p252_p10), %s2563_s6, %s1639_s18 }
  0x10   : > { %1159 = vmatprep.subr.bf16.mxu1 (!%p252_p10), %v1697_v1  ;;  %v1701_v4 = vld [vmem:[%s2558_s1 + $0x24] ss:$16 sps:$4 sm:$0xff] (!%p252_p10)   ;;  %1119 = vmatpush1.bf16.msra.mxu0 (!%p252_p10), %v1699_v2  ;;  %v1705_v6 = vld [vmem:[%s2558_s1 + $0x20] ss:$16 sps:$4 sm:$0xff] (!%p252_p10)  }
  0x11   : > { %1160 = vmatpush1.bf16.msra.mxu1 (!%p252_p10), %v1700_v3  ;;  %v1703_v5 = vld [vmem:[%s2558_s1 + $0x224] ss:$16 sps:$4 sm:$0xff] (!%p252_p10)   ;;  %1120 = vmatprep.subr.bf16.mxu0 (!%p252_p10), %v1701_v4  ;;  %v1706_v7 = vld [vmem:[%s2558_s1 + $0x220] ss:$16 sps:$4 sm:$0xff] (!%p252_p10)   ;;  %v1797_v4 = vld [vmem:[%s2558_s1 + $0xc] ss:$16 sps:$4 sm:$0xff] (!%p252_p10)  }
  0x12   : > { %1161 = vmatprep.subr.bf16.mxu1 (!%p252_p10), %v1703_v5  ;;  %v1707_v8 = vld [vmem:[%s2558_s1 + $0x44] ss:$16 sps:$4 sm:$0xff] (!%p252_p10)   ;;  %v1711_v10 = vld [vmem:[%s2558_s1 + $0x40] ss:$16 sps:$4 sm:$0xff] (!%p252_p10)   ;;  %v1800_v5 = vld [vmem:[%s2558_s1 + $0x20c] ss:$16 sps:$4 sm:$0xff] (!%p252_p10)  }
  0x13   : > { %v1709_v9 = vld [vmem:[%s2558_s1 + $0x244] ss:$16 sps:$4 sm:$0xff] (!%p252_p10)   ;;  %v1712_v11 = vld [vmem:[%s2558_s1 + $0x240] ss:$16 sps:$4 sm:$0xff] (!%p252_p10)  }
  0x14   : > { %1121 = vmatpush1.bf16.msra.mxu0 (!%p252_p10), %v1705_v6  ;;  %v1713_v12 = vld [vmem:[%s2558_s1 + $0x64] ss:$16 sps:$4 sm:$0xff] (!%p252_p10)   ;;  %v1717_v14 = vld [vmem:[%s2558_s1 + $0x60] ss:$16 sps:$4 sm:$0xff] (!%p252_p10)  }
  0x15   : > { %1162 = vmatpush1.bf16.msra.mxu1 (!%p252_p10), %v1706_v7  ;;  %1122 = vmatprep.subr.bf16.mxu0 (!%p252_p10), %v1707_v8  ;;  %v1715_v13 = vld [vmem:[%s2558_s1 + $0x264] ss:$16 sps:$4 sm:$0xff] (!%p252_p10)   ;;  %v1718_v15 = vld [vmem:[%s2558_s1 + $0x260] ss:$16 sps:$4 sm:$0xff] (!%p252_p10)   ;;  %v1795_v8 = vld [vmem:[%s2558_s1 + $0x8] ss:$16 sps:$4 sm:$0xff] (!%p252_p10)  }
  0x16   : > { %1163 = vmatprep.subr.bf16.mxu1 %v1709_v9  ;;  %v1719_v16 = vld [vmem:[%s2558_s1 + $0x84] ss:$16 sps:$4 sm:$0xff]   ;;  %v1723_v18 = vld [vmem:[%s2558_s1 + $0x80] ss:$16 sps:$4 sm:$0xff]   ;;  %s2177_s15 = scalar_select %p294_p11, %s1963_s24, 1 }
  0x17   : > { %v1721_v17 = vld [vmem:[%s2558_s1 + $0x284] ss:$16 sps:$4 sm:$0xff]   ;;  %v1724_v19 = vld [vmem:[%s2558_s1 + $0x280] ss:$16 sps:$4 sm:$0xff]   ;;  %v1798_v9 = vld [vmem:[%s2558_s1 + $0x208] ss:$16 sps:$4 sm:$0xff]  }
  0x18   : > { %1123 = vmatpush1.bf16.msra.mxu0 %v1711_v10  ;;  %v1725_v20 = vld [vmem:[%s2558_s1 + $0xa4] ss:$16 sps:$4 sm:$0xff]   ;;  %v1729_v22 = vld [vmem:[%s2558_s1 + $0xa0] ss:$16 sps:$4 sm:$0xff]   ;;  %s1637_s8 = sshll.u32 %s2177_s15, 4  ;;  %s1638_s28 = sshll.u32 %s2177_s15, 5 }
  0x19   : > { %1164 = vmatpush1.bf16.msra.mxu1 %v1712_v11  ;;  %1124 = vmatprep.subr.bf16.mxu0 %v1713_v12  ;;  %v1727_v21 = vld [vmem:[%s2558_s1 + $0x2a4] ss:$16 sps:$4 sm:$0xff]   ;;  %v1730_v23 = vld [vmem:[%s2558_s1 + $0x2a0] ss:$16 sps:$4 sm:$0xff]   ;;  %s302_s20 = scalar_lea.vmem %s2557_s0, %s1637_s8  ;;  %v1803_v10 = vld [vmem:[%s2558_s1 + $0x2c] ss:$16 sps:$4 sm:$0xff]   ;;  %s311_s12 = scalar_lea.vmem %s2560_s3, %s1638_s28 }
  0x1a   : > { %1165 = vmatprep.subr.bf16.mxu1 %v1715_v13  ;;  %v1731_v24 = vld [vmem:[%s2558_s1 + $0xc4] ss:$16 sps:$4 sm:$0xff]   ;;  %v1735_v26 = vld [vmem:[%s2558_s1 + $0xc0] ss:$16 sps:$4 sm:$0xff]   ;;  %v313_v48 = vld [vmem:[%s302_s20 + $0x8] sm:$0xff]  ;;  %s291_s15 = sand.u32 1, %s1955_s22  }
  0x1b   : > { %v1733_v25 = vld [vmem:[%s2558_s1 + $0x2c4] ss:$16 sps:$4 sm:$0xff]   ;;  %v1736_v27 = vld [vmem:[%s2558_s1 + $0x2c0] ss:$16 sps:$4 sm:$0xff]   ;;  %v1503_v51 = vcombine.high %v313_v48, %v313_v48  ;;  %v2275_v7 = vcombine.low %v313_v48, %v313_v48  ;;  %v1806_v11 = vld [vmem:[%s2558_s1 + $0x22c] ss:$16 sps:$4 sm:$0xff]  }
  0x1c   : > { %1125 = vmatpush1.bf16.msra.mxu0 %v1717_v14  ;;  %v1737_v28 = vld [vmem:[%s2558_s1 + $0xe4] ss:$16 sps:$4 sm:$0xff]   ;;  %v1741_v30 = vld [vmem:[%s2558_s1 + $0xe0] ss:$16 sps:$4 sm:$0xff]   ;;  %v1801_v12 = vld [vmem:[%s2558_s1 + $0x28] ss:$16 sps:$4 sm:$0xff]  }
  0x1d   : > { %1166 = vmatpush1.bf16.msra.mxu1 %v1718_v15  ;;  %1126 = vmatprep.subr.bf16.mxu0 %v1719_v16  ;;  %v1739_v29 = vld [vmem:[%s2558_s1 + $0x2e4] ss:$16 sps:$4 sm:$0xff]   ;;  %v1742_v31 = vld [vmem:[%s2558_s1 + $0x2e0] ss:$16 sps:$4 sm:$0xff]   ;;  %v1804_v13 = vld [vmem:[%s2558_s1 + $0x228] ss:$16 sps:$4 sm:$0xff]  }
  0x1e   : > { %1167 = vmatprep.subr.bf16.mxu1 %v1721_v17  ;;  %v1743_v32 = vld [vmem:[%s2558_s1 + $0x104] ss:$16 sps:$4 sm:$0xff]   ;;  %v1747_v34 = vld [vmem:[%s2558_s1 + $0x100] ss:$16 sps:$4 sm:$0xff]   ;;  %1191 = vmatprep.mubr.bf16.mxu1 %v1503_v51  ;;  %v1809_v14 = vld [vmem:[%s2558_s1 + $0x4c] ss:$16 sps:$4 sm:$0xff]  }
  0x1f   : > { %v1745_v33 = vld [vmem:[%s2558_s1 + $0x304] ss:$16 sps:$4 sm:$0xff]   ;;  %v1748_v35 = vld [vmem:[%s2558_s1 + $0x300] ss:$16 sps:$4 sm:$0xff]   ;;  %v1812_v15 = vld [vmem:[%s2558_s1 + $0x24c] ss:$16 sps:$4 sm:$0xff]  }
  0x20   : > { %1127 = vmatpush1.bf16.msra.mxu0 %v1723_v18  ;;  %v1749_v36 = vld [vmem:[%s2558_s1 + $0x124] ss:$16 sps:$4 sm:$0xff]   ;;  %v1753_v38 = vld [vmem:[%s2558_s1 + $0x120] ss:$16 sps:$4 sm:$0xff]   ;;  %v1807_v16 = vld [vmem:[%s2558_s1 + $0x48] ss:$16 sps:$4 sm:$0xff]  }
  0x21   : > { %1168 = vmatpush1.bf16.msra.mxu1 %v1724_v19  ;;  %1128 = vmatprep.subr.bf16.mxu0 %v1725_v20  ;;  %v1751_v37 = vld [vmem:[%s2558_s1 + $0x324] ss:$16 sps:$4 sm:$0xff]   ;;  %v1754_v39 = vld [vmem:[%s2558_s1 + $0x320] ss:$16 sps:$4 sm:$0xff]   ;;  %v1810_v17 = vld [vmem:[%s2558_s1 + $0x248] ss:$16 sps:$4 sm:$0xff]  }
  0x22   : > { %1169 = vmatprep.subr.bf16.mxu1 %v1727_v21  ;;  %v1755_v40 = vld [vmem:[%s2558_s1 + $0x144] ss:$16 sps:$4 sm:$0xff]   ;;  %v1759_v42 = vld [vmem:[%s2558_s1 + $0x140] ss:$16 sps:$4 sm:$0xff]   ;;  %v1815_v18 = vld [vmem:[%s2558_s1 + $0x6c] ss:$16 sps:$4 sm:$0xff]  }
  0x23   : > { %v1757_v41 = vld [vmem:[%s2558_s1 + $0x344] ss:$16 sps:$4 sm:$0xff]   ;;  %v1760_v43 = vld [vmem:[%s2558_s1 + $0x340] ss:$16 sps:$4 sm:$0xff]   ;;  %v1818_v19 = vld [vmem:[%s2558_s1 + $0x26c] ss:$16 sps:$4 sm:$0xff]  }
  0x24   : > { %1129 = vmatpush1.bf16.msra.mxu0 %v1729_v22  ;;  %v1761_v44 = vld [vmem:[%s2558_s1 + $0x164] ss:$16 sps:$4 sm:$0xff]   ;;  %v1765_v49 = vld [vmem:[%s2558_s1 + $0x160] ss:$16 sps:$4 sm:$0xff]   ;;  %v1813_v20 = vld [vmem:[%s2558_s1 + $0x68] ss:$16 sps:$4 sm:$0xff]  }
  0x25   : > { %1170 = vmatpush1.bf16.msra.mxu1 %v1730_v23  ;;  %1130 = vmatprep.subr.bf16.mxu0 %v1731_v24  ;;  %v1763_v45 = vld [vmem:[%s2558_s1 + $0x364] ss:$16 sps:$4 sm:$0xff]   ;;  %v1766_v50 = vld [vmem:[%s2558_s1 + $0x360] ss:$16 sps:$4 sm:$0xff]   ;;  %v1816_v21 = vld [vmem:[%s2558_s1 + $0x268] ss:$16 sps:$4 sm:$0xff]  }
  0x26   : > { %1171 = vmatprep.subr.bf16.mxu1 %v1733_v25  ;;  %v312_v46 = vld [vmem:[%s302_s20] sm:$0xff]  ;;  %v1821_v22 = vld [vmem:[%s2558_s1 + $0x8c] ss:$16 sps:$4 sm:$0xff]   ;;  %v1819_v24 = vld [vmem:[%s2558_s1 + $0x88] ss:$16 sps:$4 sm:$0xff]   ;;  %s1495_s14 = sshll.u32 %s291_s15, 5 }
  0x27   : > { %v2210_v47 = vcombine.high %v312_v46, %v312_v46  ;;  %v1767_v52 = vld [vmem:[%s2558_s1 + $0x184] ss:$16 sps:$4 sm:$0xff]   ;;  %v1771_v54 = vld [vmem:[%s2558_s1 + $0x180] ss:$16 sps:$4 sm:$0xff]   ;;  %v2273_v6 = vcombine.low %v312_v46, %v312_v46  ;;  %v1824_v23 = vld [vmem:[%s2558_s1 + $0x28c] ss:$16 sps:$4 sm:$0xff]  }
  0x28   : > { %1131 = vmatpush1.bf16.msra.mxu0 %v1735_v26  ;;  %v1769_v53 = vld [vmem:[%s2558_s1 + $0x384] ss:$16 sps:$4 sm:$0xff]   ;;  %v1772_v55 = vld [vmem:[%s2558_s1 + $0x380] ss:$16 sps:$4 sm:$0xff]   ;;  %v1822_v25 = vld [vmem:[%s2558_s1 + $0x288] ss:$16 sps:$4 sm:$0xff]  }
  0x29   : > { %1172 = vmatpush1.bf16.msra.mxu1 %v1736_v27  ;;  %1132 = vmatprep.subr.bf16.mxu0 %v1737_v28  ;;  %v1773_v56 = vld [vmem:[%s2558_s1 + $0x1a4] ss:$16 sps:$4 sm:$0xff]   ;;  %v1777_v58 = vld [vmem:[%s2558_s1 + $0x1a0] ss:$16 sps:$4 sm:$0xff]   ;;  %v1827_v26 = vld [vmem:[%s2558_s1 + $0xac] ss:$16 sps:$4 sm:$0xff]  }
  0x2a   : > { %1173 = vmatprep.subr.bf16.mxu1 %v1739_v29  ;;  %1150 = vmatprep.mubr.bf16.mxu0 %v2210_v47  ;;  %v1775_v57 = vld [vmem:[%s2558_s1 + $0x3a4] ss:$16 sps:$4 sm:$0xff]   ;;  %v1778_v59 = vld [vmem:[%s2558_s1 + $0x3a0] ss:$16 sps:$4 sm:$0xff]   ;;  %v1830_v27 = vld [vmem:[%s2558_s1 + $0x2ac] ss:$16 sps:$4 sm:$0xff]  }
  0x2b   : > { %v1779_v60 = vld [vmem:[%s2558_s1 + $0x1c4] ss:$16 sps:$4 sm:$0xff]   ;;  %v1783_v62 = vld [vmem:[%s2558_s1 + $0x1c0] ss:$16 sps:$4 sm:$0xff]   ;;  %v1825_v28 = vld [vmem:[%s2558_s1 + $0xa8] ss:$16 sps:$4 sm:$0xff]  }
  0x2c   : > { %1133 = vmatpush1.bf16.msra.mxu0 %v1741_v30  ;;  %v1781_v61 = vld [vmem:[%s2558_s1 + $0x3c4] ss:$16 sps:$4 sm:$0xff]   ;;  %v1784_v63 = vld [vmem:[%s2558_s1 + $0x3c0] ss:$16 sps:$4 sm:$0xff]   ;;  %v1828_v29 = vld [vmem:[%s2558_s1 + $0x2a8] ss:$16 sps:$4 sm:$0xff]  }
  0x2d   : > { %1174 = vmatpush1.bf16.msra.mxu1 %v1742_v31  ;;  %1134 = vmatprep.subr.bf16.mxu0 %v1743_v32  ;;  %v1785_v0 = vld [vmem:[%s2558_s1 + $0x1e4] ss:$16 sps:$4 sm:$0xff]   ;;  %v1789_v2 = vld [vmem:[%s2558_s1 + $0x1e0] ss:$16 sps:$4 sm:$0xff]   ;;  %v1833_v30 = vld [vmem:[%s2558_s1 + $0xcc] ss:$16 sps:$4 sm:$0xff]  }
  0x2e   : > { %1175 = vmatprep.subr.bf16.mxu1 %v1745_v33  ;;  %v1787_v1 = vld [vmem:[%s2558_s1 + $0x3e4] ss:$16 sps:$4 sm:$0xff]   ;;  %v1790_v3 = vld [vmem:[%s2558_s1 + $0x3e0] ss:$16 sps:$4 sm:$0xff]   ;;  %v1836_v31 = vld [vmem:[%s2558_s1 + $0x2cc] ss:$16 sps:$4 sm:$0xff]  }
  0x2f   : > { %v1831_v32 = vld [vmem:[%s2558_s1 + $0xc8] ss:$16 sps:$4 sm:$0xff]   ;;  %v1857_v46 = vld [vmem:[%s2558_s1 + $0x14c] ss:$16 sps:$4 sm:$0xff]   ;;  %s293_s19 = scalar_lea.vmem [#allocation2], %s1495_s14  ;;  %s1374_s24 = scalar_lea.sflag [#allocation3], %s291_s15 }
  0x30   : > { %1135 = vmatpush1.bf16.msra.mxu0 %v1747_v34  ;;  %v1834_v33 = vld [vmem:[%s2558_s1 + $0x2c8] ss:$16 sps:$4 sm:$0xff]   ;;  %v1839_v34 = vld [vmem:[%s2558_s1 + $0xec] ss:$16 sps:$4 sm:$0xff]   ;;  %s1390_s20 = sshll.u32 %s293_s19, 4  ;;  %s2510_s20 = int_to_ptr.vmem [resolvable:$true] %s1390_s20 }
  0x31   : > { %1176 = vmatpush1.bf16.msra.mxu1 %v1748_v35  ;;  %1136 = vmatprep.subr.bf16.mxu0 %v1749_v36  ;;  %v1842_v35 = vld [vmem:[%s2558_s1 + $0x2ec] ss:$16 sps:$4 sm:$0xff]   ;;  %v1837_v36 = vld [vmem:[%s2558_s1 + $0xe8] ss:$16 sps:$4 sm:$0xff]   ;;  %s1893_s11 = scalar_lea.vmem %s2510_s20, 512 }
  0x32   : > { %1177 = vmatprep.subr.bf16.mxu1 %v1751_v37  ;;  %v1840_v37 = vld [vmem:[%s2558_s1 + $0x2e8] ss:$16 sps:$4 sm:$0xff]   ;;  %p1894_p12 = scmp.ne.s32.totalorder %s2510_s20, %s1893_s11 }
  0x33   : > { %v1855_v48 = vld [vmem:[%s2558_s1 + $0x148] ss:$16 sps:$4 sm:$0xff]  }
  0x34   : > { %1137 = vmatpush1.bf16.msra.mxu0 %v1753_v38  ;;  %v1845_v38 = vld [vmem:[%s2558_s1 + $0x10c] ss:$16 sps:$4 sm:$0xff]   ;;  %p1895_p13 = pnand %p1894_p12, %p2049_p4 }
  0x35   : > { %1178 = vmatpush1.bf16.msra.mxu1 %v1754_v39  ;;  %1138 = vmatprep.subr.bf16.mxu0 %v1755_v40  ;;  %v1848_v39 = vld [vmem:[%s2558_s1 + $0x30c] ss:$16 sps:$4 sm:$0xff]   ;;  %v1843_v40 = vld [vmem:[%s2558_s1 + $0x108] ss:$16 sps:$4 sm:$0xff]  }
  0x36   : > { %1179 = vmatprep.subr.bf16.mxu1 %v1757_v41  ;;  %v1846_v41 = vld [vmem:[%s2558_s1 + $0x308] ss:$16 sps:$4 sm:$0xff]   ;;  %p1896_p0 = pneg %p1895_p13 }
  0x38   : > { %1139 = vmatpush1.bf16.msra.mxu0 %v1759_v42  ;;  %v1851_v42 = vld [vmem:[%s2558_s1 + $0x12c] ss:$16 sps:$4 sm:$0xff]  }
  0x39   : > { %1180 = vmatpush1.bf16.msra.mxu1 %v1760_v43  ;;  %1140 = vmatprep.subr.bf16.mxu0 %v1761_v44  ;;  %v1854_v43 = vld [vmem:[%s2558_s1 + $0x32c] ss:$16 sps:$4 sm:$0xff]   ;;  %v1849_v44 = vld [vmem:[%s2558_s1 + $0x128] ss:$16 sps:$4 sm:$0xff]  }
  0x3a   : > { %1181 = vmatprep.subr.bf16.mxu1 %v1763_v45  ;;  %v1852_v45 = vld [vmem:[%s2558_s1 + $0x328] ss:$16 sps:$4 sm:$0xff]  }
  0x3c   : > { %1141 = vmatpush1.bf16.msra.mxu0 %v1765_v49  ;;  %v1858_v49 = vld [vmem:[%s2558_s1 + $0x348] ss:$16 sps:$4 sm:$0xff]  }
  0x3d   : > { %1182 = vmatpush1.bf16.msra.mxu1 %v1766_v50  ;;  %1142 = vmatprep.subr.bf16.mxu0 %v1767_v52  ;;  %v1863_v50 = vld [vmem:[%s2558_s1 + $0x16c] ss:$16 sps:$4 sm:$0xff]   ;;  %v1861_v52 = vld [vmem:[%s2558_s1 + $0x168] ss:$16 sps:$4 sm:$0xff]  }
  0x3e   : > { %1183 = vmatprep.subr.bf16.mxu1 %v1769_v53  ;;  %v1864_v53 = vld [vmem:[%s2558_s1 + $0x368] ss:$16 sps:$4 sm:$0xff]  }
  0x40   : > { %1143 = vmatpush1.bf16.msra.mxu0 %v1771_v54  ;;  %v1869_v54 = vld [vmem:[%s2558_s1 + $0x18c] ss:$16 sps:$4 sm:$0xff]  }
  0x41   : > { %1184 = vmatpush1.bf16.msra.mxu1 %v1772_v55  ;;  %1144 = vmatprep.subr.bf16.mxu0 %v1773_v56  ;;  %v1872_v55 = vld [vmem:[%s2558_s1 + $0x38c] ss:$16 sps:$4 sm:$0xff]   ;;  %v1867_v56 = vld [vmem:[%s2558_s1 + $0x188] ss:$16 sps:$4 sm:$0xff]  }
  0x42   : > { %1185 = vmatprep.subr.bf16.mxu1 %v1775_v57  ;;  %v1870_v57 = vld [vmem:[%s2558_s1 + $0x388] ss:$16 sps:$4 sm:$0xff]  }
  0x44   : > { %1145 = vmatpush1.bf16.msra.mxu0 %v1777_v58  ;;  %v1875_v58 = vld [vmem:[%s2558_s1 + $0x1ac] ss:$16 sps:$4 sm:$0xff]  }
  0x45   : > { %1186 = vmatpush1.bf16.msra.mxu1 %v1778_v59  ;;  %1146 = vmatprep.subr.bf16.mxu0 %v1779_v60  ;;  %v1878_v59 = vld [vmem:[%s2558_s1 + $0x3ac] ss:$16 sps:$4 sm:$0xff]   ;;  %v1873_v60 = vld [vmem:[%s2558_s1 + $0x1a8] ss:$16 sps:$4 sm:$0xff]  }
  0x46   : > { %1187 = vmatprep.subr.bf16.mxu1 %v1781_v61  ;;  %v1876_v61 = vld [vmem:[%s2558_s1 + $0x3a8] ss:$16 sps:$4 sm:$0xff]  }
  0x48   : > { %1147 = vmatpush1.bf16.msra.mxu0 %v1783_v62  ;;  %v1881_v62 = vld [vmem:[%s2558_s1 + $0x1cc] ss:$16 sps:$4 sm:$0xff]  }
  0x49   : > { %1188 = vmatpush1.bf16.msra.mxu1 %v1784_v63  ;;  %1148 = vmatprep.subr.bf16.mxu0 %v1785_v0  ;;  %v1884_v63 = vld [vmem:[%s2558_s1 + $0x3cc] ss:$16 sps:$4 sm:$0xff]   ;;  %v1879_v0 = vld [vmem:[%s2558_s1 + $0x1c8] ss:$16 sps:$4 sm:$0xff]  }
  0x4a   : > { %1189 = vmatprep.subr.bf16.mxu1 %v1787_v1  ;;  %v1882_v1 = vld [vmem:[%s2558_s1 + $0x3c8] ss:$16 sps:$4 sm:$0xff]  }
  0x4c   : > { %1149 = vmatpush1.bf16.msra.mxu0 %v1789_v2  ;;  %v1887_v2 = vld [vmem:[%s2558_s1 + $0x1ec] ss:$16 sps:$4 sm:$0xff]  }
  0x4d   : > { %1190 = vmatpush1.bf16.msra.mxu1 %v1790_v3  ;;  %1200 = vmatprep.subr.bf16.mxu0 %v1797_v4  ;;  %v1890_v3 = vld [vmem:[%s2558_s1 + $0x3ec] ss:$16 sps:$4 sm:$0xff]   ;;  %v1885_v4 = vld [vmem:[%s2558_s1 + $0x1e8] ss:$16 sps:$4 sm:$0xff]  }
  0x4e   : > { %1241 = vmatprep.subr.bf16.mxu1 %v1800_v5  ;;  %v1888_v5 = vld [vmem:[%s2558_s1 + $0x3e8] ss:$16 sps:$4 sm:$0xff]  }
  0x4f   : > { %1151 = vmatmul.mubr.bf16.vlgmr.msra.gmra.mrb[0].mxu0 %v2273_v6 }
  0x50   : > { %1192 = vmatmul.mubr.bf16.vlgmr.msra.gmra.mrb[0].mxu1 %v2275_v7  ;;  %1201 = vmatpush1.bf16.msra.mxu0 %v1795_v8  ;;  %v444_v8 = vlaneseq }
  0x51   : > { %1242 = vmatpush1.bf16.msra.mxu1 %v1798_v9  ;;  %1202 = vmatprep.subr.bf16.mxu0 %v1803_v10 }
  0x52   : > { %1243 = vmatprep.subr.bf16.mxu1 %v1806_v11  ;;  %1232 = vmatprep.mubr.bf16.mxu0 %v2210_v47  ;;  %v1860_v47 = vld [vmem:[%s2558_s1 + $0x34c] ss:$16 sps:$4 sm:$0xff]   ;;  %v445_v9 = vshrl.u32 %v444_v8, 7  ;;  %v442_v11 = vld [vmem:[%s2559_s2] sm:$0xf] }
  0x53   : > { %1273 = vmatprep.mubr.bf16.mxu1 %v1503_v51  ;;  %v1866_v51 = vld [vmem:[%s2558_s1 + $0x36c] ss:$16 sps:$4 sm:$0xff]  }
  0x54   : > { %1203 = vmatpush1.bf16.msra.mxu0 %v1801_v12  ;;  %v2468_v10 = vsub.s32 0, %v445_v9  ;;  %v2473_v12 = vsub.s32 1, %v445_v9 }
  0x55   : > { %1244 = vmatpush1.bf16.msra.mxu1 %v1804_v13  ;;  %1204 = vmatprep.subr.bf16.mxu0 %v1809_v14 }
  0x56   : > { %1245 = vmatprep.subr.bf16.mxu1 %v1812_v15  ;;  %v447_v13 = vrot.slane %v442_v11, %v2468_v10  ;;  %v451_v14 = vrot.slane %v442_v11, %v2473_v12 }
  0x58   : > { %1205 = vmatpush1.bf16.msra.mxu0 %v1807_v16 }
  0x59   : > { %1246 = vmatpush1.bf16.msra.mxu1 %v1810_v17  ;;  %1206 = vmatprep.subr.bf16.mxu0 %v1815_v18 }
  0x5a   : > { %1247 = vmatprep.subr.bf16.mxu1 %v1818_v19 }
  0x5c   : > { %1207 = vmatpush1.bf16.msra.mxu0 %v1813_v20 }
  0x5d   : > { %1248 = vmatpush1.bf16.msra.mxu1 %v1816_v21  ;;  %1208 = vmatprep.subr.bf16.mxu0 %v1821_v22 }
  0x5e   : > { %1249 = vmatprep.subr.bf16.mxu1 %v1824_v23 }
  0x60   : > { %1209 = vmatpush1.bf16.msra.mxu0 %v1819_v24 }
  0x61   : > { %1250 = vmatpush1.bf16.msra.mxu1 %v1822_v25  ;;  %1210 = vmatprep.subr.bf16.mxu0 %v1827_v26  ;;  %v2478_v25 = vsub.s32 2, %v445_v9  ;;  %v2480_v26 = vsub.s32 3, %v445_v9 }
  0x62   : > { %1251 = vmatprep.subr.bf16.mxu1 %v1830_v27 }
  0x63   : > { %v455_v27 = vrot.slane %v442_v11, %v2478_v25 }
  0x64   : > { %1211 = vmatpush1.bf16.msra.mxu0 %v1825_v28  ;;  %v1282_v28 = vld [vmem:[%s311_s12] sm:$0xff] }
  0x65   : > { %1252 = vmatpush1.bf16.msra.mxu1 %v1828_v29  ;;  %1212 = vmatprep.subr.bf16.mxu0 %v1833_v30  ;;  %v1283_v29 = vld [vmem:[%s311_s12 + $0x8] sm:$0xff]  ;;  %v459_v30 = vrot.slane %v442_v11, %v2480_v26 }
  0x66   : > { %1253 = vmatprep.subr.bf16.mxu1 %v1836_v31 }
  0x68   : > { %1213 = vmatpush1.bf16.msra.mxu0 %v1831_v32 }
  0x69   : > { %1254 = vmatpush1.bf16.msra.mxu1 %v1834_v33  ;;  %1214 = vmatprep.subr.bf16.mxu0 %v1839_v34 }
  0x6a   : > { %1255 = vmatprep.subr.bf16.mxu1 %v1842_v35 }
  0x6c   : > { %1215 = vmatpush1.bf16.msra.mxu0 %v1837_v36 }
  0x6d   : > { %1256 = vmatpush1.bf16.msra.mxu1 %v1840_v37  ;;  %1216 = vmatprep.subr.bf16.mxu0 %v1845_v38  ;;  %v1284_v38 = vld [vmem:[%s311_s12 + $0x10] sm:$0xff] }
  0x6e   : > { %1257 = vmatprep.subr.bf16.mxu1 %v1848_v39 }
  0x70   : > { %1217 = vmatpush1.bf16.msra.mxu0 %v1843_v40 }
  0x71   : > { %1258 = vmatpush1.bf16.msra.mxu1 %v1846_v41  ;;  %1218 = vmatprep.subr.bf16.mxu0 %v1851_v42 }
  0x72   : > { %1259 = vmatprep.subr.bf16.mxu1 %v1854_v43 }
  0x74   : > { %1219 = vmatpush1.bf16.msra.mxu0 %v1849_v44 }
  0x75   : > { %1260 = vmatpush1.bf16.msra.mxu1 %v1852_v45  ;;  %1220 = vmatprep.subr.bf16.mxu0 %v1857_v46  ;;  %v1285_v45 = vld [vmem:[%s311_s12 + $0x18] sm:$0xff]  ;;  %s1973_s12 = smov [#allocation2]  }
  0x76   : > { %1261 = vmatprep.subr.bf16.mxu1 %v1860_v47  ;;  %s1897_s8 = sshll.u32 %s1973_s12, 4  ;;  %s1898_s8 = int_to_ptr.vmem [resolvable:$false] %s1897_s8 }
  0x77   : > { %s1899_s13 = scalar_lea.vmem %s1898_s8, 1024  ;;  %p1900_p1 = scmp.lt.s32.totalorder %s2510_s20, %s1898_s8 }
  0x78   : > { %1221 = vmatpush1.bf16.msra.mxu0 %v1855_v48  ;;  %p1901_p2 = scmp.lt.s32.totalorder %s1899_s13, %s1893_s11 }
  0x79   : > { %1262 = vmatpush1.bf16.msra.mxu1 %v1858_v49  ;;  %1222 = vmatprep.subr.bf16.mxu0 %v1863_v50 }
  0x7a   : > { %1263 = vmatprep.subr.bf16.mxu1 %v1866_v51  ;;  %p1902_p3 = por %p1901_p2, %p1900_p1 }
  0x7c   : > { %1223 = vmatpush1.bf16.msra.mxu0 %v1861_v52  ;;  %p1903_p5 = pnand %p1902_p3, %p1896_p0 }
  0x7d   : > { %1264 = vmatpush1.bf16.msra.mxu1 %v1864_v53  ;;  %1224 = vmatprep.subr.bf16.mxu0 %v1869_v54 }
  0x7e   : > { %1265 = vmatprep.subr.bf16.mxu1 %v1872_v55 }
  0x80   : > { %1225 = vmatpush1.bf16.msra.mxu0 %v1867_v56 }
  0x81   : > { %1266 = vmatpush1.bf16.msra.mxu1 %v1870_v57  ;;  %1226 = vmatprep.subr.bf16.mxu0 %v1875_v58 }
  0x82   : > { %1267 = vmatprep.subr.bf16.mxu1 %v1878_v59 }
  0x84   : > { %1227 = vmatpush1.bf16.msra.mxu0 %v1873_v60 }
  0x85   : > { %1268 = vmatpush1.bf16.msra.mxu1 %v1876_v61  ;;  %1228 = vmatprep.subr.bf16.mxu0 %v1881_v62 }
  0x86   : > { %1269 = vmatprep.subr.bf16.mxu1 %v1884_v63 }
  0x88   : > { %1229 = vmatpush1.bf16.msra.mxu0 %v1879_v0 }
  0x89   : > { %1270 = vmatpush1.bf16.msra.mxu1 %v1882_v1  ;;  %1230 = vmatprep.subr.bf16.mxu0 %v1887_v2 }
  0x8a   : > { %1271 = vmatprep.subr.bf16.mxu1 %v1890_v3 }
  0x8c   : > { %1231 = vmatpush1.bf16.msra.mxu0 %v1885_v4  ;;  %v1317_v4 = vld [vmem:[%s2561_s4] sm:$0xf] }
  0x8d   : > { %1272 = vmatpush1.bf16.msra.mxu1 %v1888_v5  ;;  %v1343_v5 = vld [vmem:[%s2562_s5] sm:$0xf]  ;;  %v1322_v8 = vrot.slane %v1317_v4, %v2468_v10  ;;  %v1326_v9 = vrot.slane %v1317_v4, %v2473_v12  ;;  %v1330_v11 = vrot.slane %v1317_v4, %v2478_v25 }
  0x8f   : > { %1233 = vmatmul.mubr.bf16.vlgmr.msra.gmra.mrb[4].mxu0 %v2273_v6 }
  0x90   : > { %1274 = vmatmul.mubr.bf16.vlgmr.msra.gmra.mrb[4].mxu1 %v2275_v7 }
 0x122   : > { %v1152_v15 = vpop.f32.mrb[0].mxu0 }
 0x123   : > { %v1193_v16 = vpop.f32.mrb[0].mxu1  ;;  %v1153_v6 = vadd.f32 %v1152_v15, %v447_v13  ;;  %v1154_v17 = vpop.f32.mrb[1].mxu0  ;;  %v1334_v13 = vrot.slane %v1317_v4, %v2480_v26  ;;  %v1348_v15 = vrot.slane %v1343_v5, %v2468_v10 }
 0x124   : > { %v1195_v7 = vpop.f32.mrb[1].mxu1  ;;  %v1155_v18 = vadd.f32 %v1154_v17, %v451_v14  ;;  %v1156_v19 = vpop.f32.mrb[2].mxu0  ;;  %v1360_v17 = vrot.slane %v1343_v5, %v2480_v26 }
 0x125   : > { %v1197_v20 = vpop.f32.mrb[2].mxu1  ;;  %v1194_v21 = vadd.f32 %v1193_v16, %v1153_v6  ;;  %v1157_v22 = vpop.f32.mrb[3].mxu0  ;;  %v1352_v16 = vrot.slane %v1343_v5, %v2473_v12  ;;  %v1356_v6 = vrot.slane %v1343_v5, %v2478_v25 }
 0x126   : > { %v1198_v23 = vpop.f32.mrb[3].mxu1  ;;  %v1196_v24 = vadd.f32 %v1195_v7, %v1155_v18 }
 0x127   : > { %v1286_v33 = vadd.f32 %v1282_v28, %v1194_v21 }
 0x128   : > { %v1287_v34 = vadd.f32 %v1283_v29, %v1196_v24 }
 0x12a   : > { %v1290_v48 = vadd.f32 %v1287_v34, %v1286_v33 }
 0x162   : > { %v1234_v31 = vpop.f32.mrb[4].mxu0 }
 0x163   : > { %v1275_v32 = vpop.f32.mrb[4].mxu1  ;;  %v1235_v35 = vadd.f32 %v1234_v31, %v455_v27  ;;  %v1236_v36 = vpop.f32.mrb[5].mxu0 }
 0x164   : > { %v1277_v37 = vpop.f32.mrb[5].mxu1  ;;  %v1237_v39 = vadd.f32 %v1236_v36, %v459_v30  ;;  %v1238_v40 = vpop.f32.mrb[6].mxu0 }
 0x165   : > { %v1279_v41 = vpop.f32.mrb[6].mxu1  ;;  %v1276_v42 = vadd.f32 %v1275_v32, %v1235_v35  ;;  %v1239_v43 = vpop.f32.mrb[7].mxu0 }
 0x166   : > { %v1280_v44 = vpop.f32.mrb[7].mxu1  ;;  %v1278_v46 = vadd.f32 %v1277_v37, %v1237_v39 }
 0x167   : > { %v1288_v47 = vadd.f32 %v1284_v38, %v1276_v42 }
 0x168   : > { %v1289_v49 = vadd.f32 %v1285_v45, %v1278_v46 }
 0x169   : > { %v1291_v50 = vadd.f32 %v1290_v48, %v1288_v47 }
 0x16b   : > { %v1292_v51 = vadd.f32 %v1291_v50, %v1289_v49 }
 0x16d   : > { %1293 = vadd.xlane.f32.xlu0 %v1292_v51 }
 0x1fa   : > { %v1294_v52 = vpop.xlane.xlu0 %1293 }
 0x1fb   : > { %v1296_v53 = vmul.f32 0.001953125, %v1294_v52 }
 0x1fd   : > { %v1297_v54 = vsub.f32 %v1286_v33, %v1296_v53  ;;  %v1298_v55 = vsub.f32 %v1287_v34, %v1296_v53  ;;  %v1299_v56 = vsub.f32 %v1288_v47, %v1296_v53  ;;  %v1300_v57 = vsub.f32 %v1289_v49, %v1296_v53 }
 0x1ff   : > { %v1301_v58 = vmul.f32 %v1297_v54, %v1297_v54  ;;  %v1302_v59 = vmul.f32 %v1298_v55, %v1298_v55  ;;  %v1303_v60 = vmul.f32 %v1299_v56, %v1299_v56  ;;  %v1304_v62 = vmul.f32 %v1300_v57, %v1300_v57 }
 0x201   : > { %v1305_v61 = vadd.f32 %v1302_v59, %v1301_v58 }
 0x203   : > { %v1306_v63 = vadd.f32 %v1305_v61, %v1303_v60 }
 0x205   : > { %v1307_v0 = vadd.f32 %v1306_v63, %v1304_v62 }
 0x207   : > { %1308 = vadd.xlane.f32.xlu0 %v1307_v0 }
 0x294   : > { %v1309_v1 = vpop.xlane.xlu0 %1308 }
 0x295   : > { %v1310_v2 = vmul.f32 0.001953125, %v1309_v1 }
 0x297   : > { %v1311_v3 = vadd.f32 1e-05, %v1310_v2 }
 0x299   : > { %1891 = vrsqrt.f32 %v1311_v3 }
 0x2a3   : > { %v1892_v14 = vpop.eup %1891 }
 0x2a4   : > { %v1313_v7 = vmul.f32 %v1892_v14, %v1297_v54  ;;  %v1314_v18 = vmul.f32 %v1892_v14, %v1298_v55  ;;  %v1315_v19 = vmul.f32 %v1892_v14, %v1299_v56  ;;  %v1316_v20 = vmul.f32 %v1892_v14, %v1300_v57 }
 0x2a6   : > { %v1339_v21 = vmul.f32 %v1322_v8, %v1313_v7  ;;  %v1340_v22 = vmul.f32 %v1326_v9, %v1314_v18  ;;  %v1341_v23 = vmul.f32 %v1330_v11, %v1315_v19  ;;  %v1342_v24 = vmul.f32 %v1334_v13, %v1316_v20 }
 0x2a8   : > { %v1365_v10 = vadd.f32 %v1348_v15, %v1339_v21  ;;  %v1366_v27 = vadd.f32 %v1352_v16, %v1340_v22  ;;  %v1367_v12 = vadd.f32 %v1356_v6, %v1341_v23  ;;  %v1368_v28 = vadd.f32 %v1360_v17, %v1342_v24 }
 0x2aa   : > { %1369 = vst [vmem:[%s293_s19] sm:$0xff] %v1365_v10  ;;  %1370 = vst [vmem:[%s293_s19 + $0x8] sm:$0xff] %v1366_v27 }
 0x2ab   : > { %1371 = vst [vmem:[%s293_s19 + $0x10] sm:$0xff] %v1367_v12  ;;  %1372 = vst [vmem:[%s293_s19 + $0x18] sm:$0xff] %v1368_v28 }
 0x2ac   : > { %1906 = shalt.err (!%p1903_p5)
}
 0x2ad   : > { %s1907_s15 = scalar_lea.hbm %s2508_s30, 512  ;;  %s1911_s17 = scalar_lea.hbm %s2563_s6, 1024 }
 0x2ae   : > { %p1908_p6 = scmp.ne.s32.totalorder %s2508_s30, %s1907_s15  ;;  %p1912_p10 = scmp.lt.u32.totalorder %s2508_s30, %s2563_s6 }
 0x2af   : > { %p1913_p11 = scmp.lt.u32.totalorder %s1911_s17, %s1907_s15  ;;  %p1915_p13 = scmp.lt.u32.totalorder %s1907_s15, %s2508_s30 }
 0x2b0   : > { %p1909_p7 = pnand %p1908_p6, %p2049_p4 }
 0x2b1   : > { %p1914_p12 = por %p1913_p11, %p1912_p10 }
 0x2b2   : > { %p1910_p9 = pneg %p1909_p7 }
 0x2b3   : > { %p1916_p0 = por %p1915_p13, %p1914_p12 }
 0x2b5   : > { %p1917_p1 = pnand %p1916_p0, %p1910_p9 }
 0x2b7   : > { %1920 = shalt.err (!%p1917_p1)
}
 0x2b8   : > { %1640 = dma.vmem_to_hbm [thread:$0]  (%p2049_p4), %s2510_s20, 512, %s2508_s30, %s1374_s24  }
 0x2b9 PF: > { %p1646_p2 = scmp.ge.s32.totalorder %s1971_s26, 2  ;;  %s1402_s27 = sand.u32 1, %s1951_s21  }
 0x2ba   : > { %s1403_s28 = scalar_lea.sflag [#allocation3], %s1402_s27 }
 0x2bb   : > { %p1643_p3 = pnand %p1646_p2, %p2056_p8 }
 0x2bd   : > { %1946 = dma.done.wait (!%p1643_p3), %s1403_s28, 512  }
 0x2be   : > { %1948 = vsyncadd (!%p1643_p3), %s1403_s28, 4294966784  ;;  %s19_s26 = sadd.s32 1, %s1971_s26   ;;  %s2566_s21 = smov %s1955_s22 }
 0x2bf   : > { %p16_p5 = scmp.ge.s32.totalorder %s19_s26, 4   ;;  %s2567_s22 = smov %s1959_s23 }
 0x2c0   : > { %s2568_s23 = smov %s2062_s10  ;;  %s2569_s24 = smov %s1967_s25 }
 0x2c1   : > { %s2570_s25 = smov %s2572_s29  ;;  %18 = sbr.rel (!%p16_p5) target bundleno = 4 (0x4), region = 82 }
 0x2c8   :  { %1408 = vsyncpa [#allocation3], 1 }
 0x2c9   :  { %1410 = vsyncpa [#allocation3 + $0x1], 1 }

// kernel: encoder_layer_forward.4
= control target key start
LH: loop header
LB: loop body
LE: loop exit
PB: predicated region body
PF: predicated region fallthrough
CT: control target
= control target key end

     0   :  { %10 = vsyncpa [#allocation3], 0  ;;  %s3129_s0 = inlined_call_operand.vmem [shape: bf16[2,8,512], index: 0, kind: input, shape index: {}]   ;;  %s3130_s1 = inlined_call_operand.vmem [shape: bf16[2,8,512], index: 1, kind: input, shape index: {}]   ;;  %s3131_s2 = inlined_call_operand.vmem [shape: bf16[2,8,512], index: 2, kind: input, shape index: {}]   ;;  %s3132_s3 = inlined_call_operand.vmem [shape: bf16[2,8,512], index: 3, kind: output, shape index: {0}]   ;;  %s3133_s4 = inlined_call_operand.hbm [shape: bf16[2,8,8,8], index: 4, kind: output, shape index: {1}]  }
   0x1   :  { %12 = vsyncpa [#allocation3 + $0x1], 0  ;;  %s2689_s15 = smov 0   ;;  %s2691_s16 = smov 0  }
   0x2   :  { %s2693_s17 = smov 0   ;;  %s2695_s18 = smov 0  }
   0x3   :  { %s2697_s19 = smov 0   ;;  %s2699_s20 = smov 0  }
   0x4 LB: > { %s2289_s21 = sadd.s32 4294967295, %s2654_s20   ;;  %s2290_s22 = sadd.s32 4294967294, %s2654_s20   ;;  %s2654_s20 = sphi %s2699_s20, %s18_s20   ;;  %s2650_s19 = sphi %s2697_s19, %s3140_s19   ;;  %s2646_s18 = sphi %s2695_s18, %s3139_s18   ;;  %s2642_s17 = sphi %s2693_s17, %s3138_s17   ;;  %s2638_s16 = sphi %s2691_s16, %s3137_s16   ;;  %s2634_s15 = sphi %s2689_s15, %s3136_s15  }
   0x5   : > { %s30_s23 = sadd.s32 1, %s2650_s19  ;;  %s151_s24 = sadd.s32 1, %s2642_s17 }
   0x6   : > { %p32_p0 = scmp.ge.s32.totalorder %s30_s23, 2  ;;  %p161_p1 = scmp.ne.s32.totalorder %s2642_s17, %s2638_s16 }
   0x7   : > { %p162_p2 = scmp.eq.s32.totalorder %s2289_s21, 1  ;;  %p167_p3 = scmp.ne.s32.totalorder %s2638_s16, %s2634_s15 }
   0x8   : > { %s3142_s23 = smov (%p32_p0, %s30_s23), 0  ;;  %p168_p5 = scmp.eq.s32.totalorder %s2290_s22, 1 }
   0x9   : > { %p2729_p4 = por %p162_p2, %p161_p1  ;;  %s146_s26 = ssub.s32 %s2650_s19, %s3142_s23 }
   0xa   : > { %p2293_p6 = scmp.ge.s32.totalorder %s2654_s20, 1  ;;  %p149_p7 = scmp.eq.s32.totalorder %s146_s26, 0 }
   0xb   : > { %p2736_p8 = por %p168_p5, %p167_p3  ;;  %p225_p9 = scmp.lt.s32.totalorder %s2654_s20, 3 }
   0xc   : > { %s2742_s28 = scalar_select %p149_p7, %s2642_s17, %s151_s24  }
   0xd   : > { %p226_p10 = pnand %p2293_p6, %p225_p9 }
   0xe   : > { %p283_p11 = scmp.lt.s32.totalorder (!%p226_p10), %s2646_s18, 1  ;;  %v346_v0 = vlaneseq (!%p226_p10)  ;;  %v2656_v1 = vmov (!%p226_p10), 1983009808   ;;  %s2657_s11 = smov (!%p226_p10), 64   ;;  %v2658_v26 = vmov (!%p226_p10), 0.0   ;;  %vm2659_vm0 = vmmov (!%p226_p10), 0  }
   0xf   : > { %229 = sbr.rel (%p226_p10) target bundleno = 1102 (0x44e), region = 32  ;;  %v344_v2 = vunpack.c.l.s4 (!%p226_p10), %v2656_v1  ;;  %2373 = vmatprep.subr.bf16.mxu0 (!%p226_p10), %v2658_v26  ;;  %2379 = vmatprep.subr.bf16.mxu1 (!%p226_p10), %v2658_v26  ;;  %v2660_v27 = vmov (!%p226_p10), 1934713408   ;;  %v2661_v51 = vmov (!%p226_p10), 0   ;;  %vm954_vm1 = vcmask (!%p226_p10), 523264   ;;  %s279_s21 = sand.u32 (!%p226_p10), 1, %s2638_s16  }
  0x10   : > { %v347_v3 = vshrl.u32 (!%p226_p10), %v346_v0, 7  ;;  %2375 = vmatprep.mubr.msk.bf16.mxu0 (!%p226_p10), %vm2659_vm0, %v2658_v26  ;;  %2381 = vmatprep.mubr.msk.bf16.mxu1 (!%p226_p10), %vm2659_vm0, %v2658_v26  ;;  %v361_v28 = vunpack.c.l.s4 (!%p226_p10), %v2660_v27  ;;  %vm1323_vm2 = vcmask (!%p226_p10), 64512   ;;  %vm1432_vm3 = vcmask (!%p226_p10), 1043456   ;;  %s2294_s22 = sshll.u32 (!%p226_p10), %s279_s21, 5  ;;  %s2340_s26 = sshll.u32 (!%p226_p10), %s2646_s18, 9 }
  0x11   : > { %v345_v4 = vunpack.c.0.s8 (!%p226_p10), %v344_v2  ;;  %vm1420_vm4 = vcmask (!%p226_p10), 60416   ;;  %s2956_s24 = scalar_lea.vmem (!%p226_p10), [#allocation2], %s2294_s22  ;;  %s2662_s9 = smov (!%p226_p10), [#allocation2]  }
  0x12   : > { %v362_v29 = vunpack.c.0.s8 (!%p226_p10), %v361_v28 }
  0x13   : > { %v2756_v7 = vsub.s32 (!%p226_p10), %v345_v4, %v347_v3 }
  0x14   : > { %v2772_v32 = vsub.s32 (!%p226_p10), %v362_v29, %v347_v3 }
  0x16   : > { %s284_s29 = scalar_select %p283_p11, %s2646_s18, 1 }
  0x17   : > { %s3066_s18 = scalar_lea.sflag [#allocation3], %s279_s21 }
  0x18   : > { %s2746_s30 = sshll.u32 %s284_s29, 4  ;;  %s2137_s29 = sshll.u32 %s2956_s24, 4  ;;  %s3058_s29 = int_to_ptr.vmem [resolvable:$true] %s2137_s29 }
  0x19   : > { %s300_s7 = scalar_lea.vmem %s3130_s1, %s2746_s30  ;;  %s290_s10 = scalar_lea.vmem %s3129_s0, %s2746_s30 }
  0x1a   : > { %v534_v5 = vld [vmem:[%s300_s7] sm:$0xff]  ;;  %v535_v8 = vld [vmem:[%s300_s7 + $0x8] sm:$0xff]  ;;  %s310_s14 = scalar_lea.vmem %s3131_s2, %s2746_s30  ;;  %s3056_s7 = scalar_lea.hbm %s3133_s4, %s2340_s26 }
  0x1b   : > { %v324_v6 = vld [vmem:[%s290_s10] sm:$0xff]  ;;  %539 = vrot.lane.b32.xlu0 %v534_v5, %s2657_s11  ;;  %v537_v9 = vrot.slane %v534_v5, 4  ;;  %v544_v11 = vrot.slane %v535_v8, 4  ;;  %v552_v12 = vcombine.low %v534_v5, %v535_v8  ;;  %v325_v13 = vld [vmem:[%s290_s10 + $0x8] sm:$0xff]  ;;  %s2576_s8 = scalar_lea.vmem %s3058_s29, 512  ;;  %s2580_s10 = sshll.u32 %s2662_s9, 4  ;;  %s2581_s10 = int_to_ptr.vmem [resolvable:$false] %s2580_s10 }
  0x1c   : > { %329 = vrot.lane.b32.xlu1 %v324_v6, %s2657_s11  ;;  %v327_v10 = vrot.slane %v324_v6, 4  ;;  %v334_v14 = vrot.slane %v325_v13, 4  ;;  %v342_v15 = vcombine.low %v324_v6, %v325_v13  ;;  %p2577_p12 = scmp.ne.s32.totalorder %s3058_s29, %s2576_s8  ;;  %s2582_s12 = scalar_lea.vmem %s2581_s10, 1024 }
  0x1d   : > { %v559_v16 = vrot.slane %v552_v12, %v2756_v7  ;;  %v560_v17 = vcombine.low %v537_v9, %v544_v11  ;;  %p2583_p1 = scmp.lt.s32.totalorder %s3058_s29, %s2581_s10  ;;  %p2584_p2 = scmp.lt.s32.totalorder %s2582_s12, %s2576_s8 }
  0x1e   : > { %v349_v18 = vrot.slane %v342_v15, %v2756_v7  ;;  %v350_v19 = vcombine.low %v327_v10, %v334_v14  ;;  %p2578_p13 = pnand %p2577_p12, %p2729_p4 }
  0x1f   : > { %546 = vrot.lane.b32.xlu0 %v535_v8, %s2657_s11  ;;  %v567_v20 = vrot.slane %v560_v17, %v2756_v7  ;;  %p2585_p3 = por %p2584_p2, %p2583_p1 }
  0x20   : > { %336 = vrot.lane.b32.xlu1 %v325_v13, %s2657_s11  ;;  %v357_v21 = vrot.slane %v350_v19, %v2756_v7  ;;  %p2579_p0 = pneg %p2578_p13 }
  0x21   : > { %v568_v22 = vcombine.low %v559_v16, %v567_v20  ;;  %v569_v23 = vcombine.high %v559_v16, %v567_v20 }
  0x22   : > { %v358_v24 = vcombine.low %v349_v18, %v357_v21  ;;  %v359_v25 = vcombine.high %v349_v18, %v357_v21  ;;  %p2586_p5 = pnand %p2585_p3, %p2579_p0 }
  0x23   : > { %v576_v41 = vrot.slane %v568_v22, %v2772_v32  ;;  %v583_v42 = vrot.slane %v569_v23, %v2772_v32 }
  0x24   : > { %v366_v43 = vrot.slane %v358_v24, %v2772_v32  ;;  %v373_v44 = vrot.slane %v359_v25, %v2772_v32 }
  0x25   : > { %v584_v52 = vcombine.high %v576_v41, %v2661_v51  ;;  %v585_v53 = vcombine.high %v583_v42, %v2661_v51  ;;  %v624_v60 = vshrl.u32 %v576_v41, 16  ;;  %v640_v61 = vshrl.u32 %v583_v42, 16 }
  0x26   : > { %v374_v54 = vcombine.high %v366_v43, %v2661_v51  ;;  %v375_v55 = vcombine.high %v373_v44, %v2661_v51  ;;  %v414_v62 = vshrl.u32 %v366_v43, 16  ;;  %v430_v63 = vshrl.u32 %v373_v44, 16 }
  0x27   : > { %v632_v4 = vshrl.u32 %v584_v52, 16  ;;  %v648_v5 = vshrl.u32 %v585_v53, 16 }
  0x28   : > { %v422_v6 = vshrl.u32 %v374_v54, 16  ;;  %v438_v8 = vshrl.u32 %v375_v55, 16 }
  0x8d   : > { %v540_v30 = vpop.permute.xlu0 %539 }
  0x8e   : > { %v330_v31 = vpop.permute.xlu1 %329  ;;  %v541_v34 = vrot.slane %v540_v30, 4 }
  0x8f   : > { %v331_v33 = vrot.slane %v330_v31, 4 }
  0x91   : > { %v547_v35 = vpop.permute.xlu0 %546 }
  0x92   : > { %v337_v36 = vpop.permute.xlu1 %336  ;;  %v548_v37 = vrot.slane %v547_v35, 4  ;;  %v586_v38 = vcombine.low %v540_v30, %v547_v35 }
  0x93   : > { %v338_v39 = vrot.slane %v337_v36, 4  ;;  %v376_v40 = vcombine.low %v330_v31, %v337_v36 }
  0x94   : > { %v594_v45 = vcombine.low %v541_v34, %v548_v37  ;;  %v593_v48 = vrot.slane %v586_v38, %v2756_v7 }
  0x95   : > { %v383_v46 = vrot.slane %v376_v40, %v2756_v7  ;;  %v384_v47 = vcombine.low %v331_v33, %v338_v39 }
  0x96   : > { %v601_v49 = vrot.slane %v594_v45, %v2756_v7 }
  0x97   : > { %v391_v50 = vrot.slane %v384_v47, %v2756_v7 }
  0x98   : > { %v602_v56 = vcombine.low %v593_v48, %v601_v49  ;;  %v603_v57 = vcombine.high %v593_v48, %v601_v49 }
  0x99   : > { %v392_v58 = vcombine.low %v383_v46, %v391_v50  ;;  %v393_v59 = vcombine.high %v383_v46, %v391_v50 }
  0x9a   : > { %v610_v0 = vrot.slane %v602_v56, %v2772_v32  ;;  %v617_v1 = vrot.slane %v603_v57, %v2772_v32 }
  0x9b   : > { %v400_v2 = vrot.slane %v392_v58, %v2772_v32  ;;  %v407_v3 = vrot.slane %v393_v59, %v2772_v32 }
  0x9c   : > { %v618_v9 = vcombine.high %v610_v0, %v2661_v51  ;;  %v619_v10 = vcombine.high %v617_v1, %v2661_v51  ;;  %v622_v11 = vpack.i.b16 %v610_v0, %v576_v41  ;;  %v625_v12 = vshrl.u32 %v610_v0, 16 }
  0x9d   : > { %v638_v13 = vpack.i.b16 %v617_v1, %v583_v42  ;;  %v641_v14 = vshrl.u32 %v617_v1, 16  ;;  %v408_v15 = vcombine.high %v400_v2, %v2661_v51  ;;  %v409_v16 = vcombine.high %v407_v3, %v2661_v51 }
  0x9e   : > { %v626_v17 = vpack.i.b16 %v625_v12, %v624_v60  ;;  %v630_v18 = vpack.i.b16 %v618_v9, %v584_v52  ;;  %v633_v19 = vshrl.u32 %v618_v9, 16  ;;  %v646_v20 = vpack.i.b16 %v619_v10, %v585_v53 }
  0x9f   : > { %v642_v21 = vpack.i.b16 %v641_v14, %v640_v61  ;;  %v649_v22 = vshrl.u32 %v619_v10, 16  ;;  %v412_v23 = vpack.i.b16 %v400_v2, %v366_v43  ;;  %v415_v24 = vshrl.u32 %v400_v2, 16 }
  0xa0   : > { %v420_v25 = vpack.i.b16 %v408_v15, %v374_v54  ;;  %v423_v27 = vshrl.u32 %v408_v15, 16  ;;  %v428_v28 = vpack.i.b16 %v407_v3, %v373_v44  ;;  %v431_v29 = vshrl.u32 %v407_v3, 16 }
  0xa1   : > { %v416_v30 = vpack.i.b16 %v415_v24, %v414_v62  ;;  %v436_v31 = vpack.i.b16 %v409_v16, %v375_v55  ;;  %v439_v33 = vshrl.u32 %v409_v16, 16  ;;  %v634_v34 = vpack.i.b16 %v633_v19, %v632_v4 }
  0xa2   : > { %v424_v35 = vpack.i.b16 %v423_v27, %v422_v6  ;;  %v432_v36 = vpack.i.b16 %v431_v29, %v430_v63  ;;  %v442_v37 = vcombine.low %v412_v23, %v428_v28  ;;  %v650_v38 = vpack.i.b16 %v649_v22, %v648_v5 }
  0xa3   : > { %v440_v39 = vpack.i.b16 %v439_v33, %v438_v8  ;;  %v450_v40 = vcombine.low %v420_v25, %v436_v31  ;;  %v652_v41 = vcombine.low %v622_v11, %v638_v13  ;;  %v660_v42 = vcombine.low %v630_v18, %v646_v20 }
  0xa4   : > { %v476_v45 = vcombine.low %v416_v30, %v432_v36  ;;  %v686_v46 = vcombine.low %v626_v17, %v642_v21  ;;  %v694_v43 = vcombine.low %v634_v34, %v650_v38  ;;  %v449_v47 = vrot.slane %v442_v37, %v2756_v7 }
  0xa5   : > { %v659_v44 = vrot.slane %v652_v41, %v2756_v7  ;;  %v667_v48 = vrot.slane %v660_v42, %v2756_v7  ;;  %v457_v49 = vrot.slane %v450_v40, %v2756_v7  ;;  %v484_v50 = vcombine.low %v424_v35, %v440_v39 }
  0xa6   : > { %v693_v52 = vrot.slane %v686_v46, %v2756_v7  ;;  %v701_v53 = vrot.slane %v694_v43, %v2756_v7  ;;  %v483_v54 = vrot.slane %v476_v45, %v2756_v7 }
  0xa7   : > { %v668_v55 = vcombine.low %v659_v44, %v667_v48  ;;  %v458_v56 = vcombine.low %v449_v47, %v457_v49  ;;  %v459_v57 = vcombine.high %v449_v47, %v457_v49  ;;  %v491_v58 = vrot.slane %v484_v50, %v2756_v7 }
  0xa8   : > { %v702_v59 = vcombine.low %v693_v52, %v701_v53  ;;  %v669_v60 = vcombine.high %v659_v44, %v667_v48  ;;  %v703_v61 = vcombine.high %v693_v52, %v701_v53 }
  0xa9   : > { %v676_v62 = vrot.slane %v668_v55, %v2772_v32  ;;  %v466_v63 = vrot.slane %v458_v56, %v2772_v32  ;;  %v492_v0 = vcombine.low %v483_v54, %v491_v58  ;;  %v493_v1 = vcombine.high %v483_v54, %v491_v58 }
  0xaa   : > { %v710_v2 = vrot.slane %v702_v59, %v2772_v32  ;;  %v2806_v3 = vrot.slane %v669_v60, %v2772_v32  ;;  %v717_v4 = vrot.slane %v703_v61, %v2772_v32  ;;  %v473_v25 = vrot.slane %v459_v57, %v2772_v32 }
  0xab   : > { %v723_v5 = vshrl.u32 %v676_v62, 16  ;;  %v500_v6 = vrot.slane %v492_v0, %v2772_v32  ;;  %v684_v8 = vcombine.high %v676_v62, %v2661_v51  ;;  %v513_v9 = vshrl.u32 %v466_v63, 16 }
  0xac   : > { %v722_v10 = vpack.i.b16 %v710_v2, %v676_v62  ;;  %v724_v11 = vshrl.u32 %v710_v2, 16  ;;  %v718_v12 = vcombine.high %v710_v2, %v2661_v51  ;;  %v474_v13 = vcombine.high %v466_v63, %v2661_v51 }
  0xad   : > { %v512_v14 = vpack.i.b16 %v500_v6, %v466_v63  ;;  %v514_v15 = vshrl.u32 %v500_v6, 16  ;;  %v729_v16 = vshrl.u32 %v684_v8, 16  ;;  %v508_v17 = vcombine.high %v500_v6, %v2661_v51 }
  0xae   : > { %v959_v18 = vsel %vm954_vm1, %v722_v10, 0  ;;  %v725_v19 = vpack.i.b16 %v724_v11, %v723_v5  ;;  %v728_v20 = vpack.i.b16 %v718_v12, %v684_v8  ;;  %v730_v21 = vshrl.u32 %v718_v12, 16 }
  0xaf   : > { %2374 = vmatpush3.bf16.xpose.msra.mxu0 %v959_v18  ;;  %v515_v22 = vpack.i.b16 %v514_v15, %v513_v9  ;;  %v518_v23 = vpack.i.b16 %v508_v17, %v474_v13  ;;  %v734_v24 = vpack.i.b16 %v717_v4, %v2806_v3  ;;  %v519_v29 = vshrl.u32 %v474_v13, 16 }
  0xb0   : > { %v1005_v27 = vsel %vm954_vm1, %v725_v19, 0  ;;  %2385 = vmatprep.subr.bf16.mxu0 %v2658_v26  ;;  %v731_v28 = vpack.i.b16 %v730_v21, %v729_v16  ;;  %v520_v30 = vshrl.u32 %v508_v17, 16  ;;  %v735_v31 = vshrl.u32 %v2806_v3, 16 }
  0xb1   : > { %2380 = vmatpush3.bf16.xpose.msra.mxu1 %v1005_v27  ;;  %v736_v33 = vshrl.u32 %v717_v4, 16  ;;  %v507_v34 = vrot.slane %v493_v1, %v2772_v32  ;;  %v685_v36 = vcombine.high %v2806_v3, %v2661_v51  ;;  %v719_v37 = vcombine.high %v717_v4, %v2661_v51 }
  0xb2   : > { %2391 = vmatprep.subr.bf16.mxu1 %v2658_v26  ;;  %v521_v35 = vpack.i.b16 %v520_v30, %v519_v29  ;;  %v525_v40 = vshrl.u32 %v473_v25, 16  ;;  %v475_v43 = vcombine.high %v473_v25, %v2661_v51  ;;  %v1051_v48 = vsel %vm954_vm1, %v728_v20, 0 }
  0xb3   : > { %v737_v38 = vpack.i.b16 %v736_v33, %v735_v31  ;;  %v524_v39 = vpack.i.b16 %v507_v34, %v473_v25  ;;  %v526_v41 = vshrl.u32 %v507_v34, 16  ;;  %v740_v42 = vpack.i.b16 %v719_v37, %v685_v36 }
  0xb4   : > { %v741_v45 = vshrl.u32 %v685_v36, 16  ;;  %v742_v46 = vshrl.u32 %v719_v37, 16  ;;  %v509_v44 = vcombine.high %v507_v34, %v2661_v51  ;;  %v531_v52 = vshrl.u32 %v475_v43, 16 }
  0xb5   : > { %v527_v47 = vpack.i.b16 %v526_v41, %v525_v40  ;;  %v1097_v54 = vsel %vm954_vm1, %v731_v28, 0  ;;  %v1143_v56 = vsel %vm954_vm1, %v734_v24, 0  ;;  %v1189_v57 = vsel %vm954_vm1, %v737_v38, 0  ;;  %v745_v40 = vld [vmem:[%s310_s14 + $0x8] sm:$0xff] }
  0xb6   : > { %2376 = vmatmul.mubr.msk.bf16.vlgmr.msra.gmra.mrb[0].mxu0 %vm954_vm1, %v512_v14  ;;  %v743_v49 = vpack.i.b16 %v742_v46, %v741_v45  ;;  %v530_v50 = vpack.i.b16 %v509_v44, %v475_v43  ;;  %v532_v53 = vshrl.u32 %v509_v44, 16  ;;  %v1235_v58 = vsel %vm954_vm1, %v740_v42, 0 }
  0xb7   : > { %2386 = vmatpush3.bf16.xpose.msra.mxu0 %v1051_v48  ;;  %2387 = vmatprep.mubr.msk.bf16.mxu0 %vm2659_vm0, %v2658_v26 }
  0xb8   : > { %2382 = vmatmul.mubr.msk.bf16.vlgmr.msra.gmra.mrb[0].mxu1 %vm954_vm1, %v515_v22  ;;  %2397 = vmatprep.subr.bf16.mxu0 %v2658_v26  ;;  %v533_v55 = vpack.i.b16 %v532_v53, %v531_v52  ;;  %v1281_v59 = vsel %vm954_vm1, %v743_v49, 0 }
  0xb9   : > { %2392 = vmatpush3.bf16.xpose.msra.mxu1 %v1097_v54  ;;  %2393 = vmatprep.mubr.msk.bf16.mxu1 %vm2659_vm0, %v2658_v26 }
  0xba   : > { %2403 = vmatprep.subr.bf16.mxu1 %v2658_v26 }
  0xbe   : > { %2388 = vmatmul.mubr.msk.bf16.vlgmr.msra.gmra.mrb[4].mxu0 %vm954_vm1, %v518_v23 }
  0xbf   : > { %2398 = vmatpush3.bf16.xpose.msra.mxu0 %v1143_v56  ;;  %2399 = vmatprep.mubr.msk.bf16.mxu0 %vm2659_vm0, %v2658_v26 }
  0xc0   : > { %2394 = vmatmul.mubr.msk.bf16.vlgmr.msra.gmra.mrb[4].mxu1 %vm954_vm1, %v521_v35  ;;  %2409 = vmatprep.subr.bf16.mxu0 %v2658_v26 }
  0xc1   : > { %2404 = vmatpush3.bf16.xpose.msra.mxu1 %v1189_v57  ;;  %2405 = vmatprep.mubr.msk.bf16.mxu1 %vm2659_vm0, %v2658_v26 }
  0xc2   : > { %2415 = vmatprep.subr.bf16.mxu1 %v2658_v26 }
  0xc6   : > { %2400 = vmatmul.mubr.msk.bf16.vlgmr.msra.gmra.mrb[8].mxu0 %vm954_vm1, %v524_v39  ;;  %v744_v39 = vld [vmem:[%s310_s14] sm:$0xff] }
  0xc7   : > { %2410 = vmatpush3.bf16.xpose.msra.mxu0 %v1235_v58  ;;  %2411 = vmatprep.mubr.msk.bf16.mxu0 %vm2659_vm0, %v2658_v26  ;;  %v747_v56 = vrot.slane %v744_v39, 4 }
  0xc8   : > { %2406 = vmatmul.mubr.msk.bf16.vlgmr.msra.gmra.mrb[8].mxu1 %vm954_vm1, %v527_v47  ;;  %2421 = vmatprep.subr.bf16.mxu0 %v2658_v26 }
  0xc9   : > { %2416 = vmatpush3.bf16.xpose.msra.mxu1 %v1281_v59  ;;  %2417 = vmatprep.mubr.msk.bf16.mxu1 %vm2659_vm0, %v2658_v26 }
  0xca   : > { %2427 = vmatprep.subr.bf16.mxu1 %v2658_v26 }
  0xce   : > { %2412 = vmatmul.mubr.msk.bf16.vlgmr.msra.gmra.mrb[12].mxu0 %vm954_vm1, %v530_v50 }
  0xcf   : > { %2423 = vmatprep.mubr.msk.bf16.mxu0 %vm2659_vm0, %v2658_v26 }
  0xd0   : > { %2418 = vmatmul.mubr.msk.bf16.vlgmr.msra.gmra.mrb[12].mxu1 %vm954_vm1, %v533_v55  ;;  %v754_v55 = vrot.slane %v745_v40, 4 }
  0xd1   : > { %2429 = vmatprep.mubr.msk.bf16.mxu1 %vm2659_vm0, %v2658_v26 }
 0x189   : > { %v995_v60 = vpop.f32.mrb[0].mxu0 }
 0x18a   : > { %v2377_v61 = vpop.f32.mrb[1].mxu0  ;;  %v1324_v62 = vsel %vm1323_vm2, %v995_v60, -inf }
 0x18b   : > { %v1041_v63 = vpop.f32.mrb[0].mxu1  ;;  %1325 = vmax.xlane.f32.xlu0 %v1324_v62  ;;  %v998_v0 = vpop.f32.mrb[2].mxu0 }
 0x18c   : > { %v2378_v1 = vpop.f32.mrb[3].mxu0  ;;  %v2383_v2 = vpop.f32.mrb[1].mxu1  ;;  %v1327_v3 = vsel %vm1323_vm2, %v1041_v63, -inf }
 0x18d   : > { %1328 = vmax.xlane.f32.xlu1 %v1327_v3  ;;  %v1044_v4 = vpop.f32.mrb[2].mxu1  ;;  %v762_v1 = vcombine.low %v744_v39, %v745_v40  ;;  %v770_v2 = vcombine.low %v747_v56, %v754_v55 }
 0x18e   : > { %v2384_v5 = vpop.f32.mrb[3].mxu1 }
 0x18f   : > { %v769_v5 = vrot.slane %v762_v1, %v2756_v7 }
 0x191   : > { %v1087_v6 = vpop.f32.mrb[4].mxu0 }
 0x192   : > { %v2389_v8 = vpop.f32.mrb[5].mxu0  ;;  %v1330_v9 = vsel %vm1323_vm2, %v1087_v6, -inf }
 0x193   : > { %v1133_v10 = vpop.f32.mrb[4].mxu1  ;;  %1331 = vmax.xlane.f32.xlu0 %v1330_v9  ;;  %v1090_v11 = vpop.f32.mrb[6].mxu0 }
 0x194   : > { %v2390_v12 = vpop.f32.mrb[7].mxu0  ;;  %v2395_v13 = vpop.f32.mrb[5].mxu1  ;;  %v1333_v16 = vsel %vm1323_vm2, %v1133_v10, -inf }
 0x195   : > { %v1136_v14 = vpop.f32.mrb[6].mxu1 }
 0x196   : > { %v2396_v15 = vpop.f32.mrb[7].mxu1 }
 0x197   : > { %1334 = vmax.xlane.f32.xlu0 %v1333_v16 }
 0x199   : > { %v1179_v17 = vpop.f32.mrb[8].mxu0 }
 0x19a   : > { %v2401_v18 = vpop.f32.mrb[9].mxu0  ;;  %v1336_v19 = vsel %vm1323_vm2, %v1179_v17, -inf }
 0x19b   : > { %v1225_v20 = vpop.f32.mrb[8].mxu1  ;;  %1337 = vmax.xlane.f32.xlu1 %v1336_v19  ;;  %v1182_v21 = vpop.f32.mrb[10].mxu0 }
 0x19c   : > { %v2402_v22 = vpop.f32.mrb[11].mxu0  ;;  %v2407_v23 = vpop.f32.mrb[9].mxu1  ;;  %v1339_v24 = vsel %vm1323_vm2, %v1225_v20, -inf }
 0x19d   : > { %v1228_v25 = vpop.f32.mrb[10].mxu1  ;;  %1340 = vmax.xlane.f32.xlu0 %v1339_v24 }
 0x19e   : > { %v2408_v27 = vpop.f32.mrb[11].mxu1 }
 0x1a1   : > { %v1271_v28 = vpop.f32.mrb[12].mxu0 }
 0x1a2   : > { %v2413_v29 = vpop.f32.mrb[13].mxu0  ;;  %v1342_v30 = vsel %vm1323_vm2, %v1271_v28, -inf }
 0x1a3   : > { %v2870_v31 = vpop.f32.mrb[12].mxu1  ;;  %1343 = vmax.xlane.f32.xlu1 %v1342_v30  ;;  %v1274_v33 = vpop.f32.mrb[14].mxu0 }
 0x1a4   : > { %v2414_v34 = vpop.f32.mrb[15].mxu0  ;;  %v2419_v35 = vpop.f32.mrb[13].mxu1  ;;  %v1345_v36 = vsel %vm1323_vm2, %v2870_v31, -inf }
 0x1a5   : > { %v1320_v37 = vpop.f32.mrb[14].mxu1  ;;  %1346 = vmax.xlane.f32.xlu0 %v1345_v36 }
 0x1a6   : > { %v2420_v38 = vpop.f32.mrb[15].mxu1 }
 0x1b4   : > { %749 = vrot.lane.b32.xlu1 %v744_v39, %s2657_s11 }
 0x1bb   : > { %756 = vrot.lane.b32.xlu0 %v745_v40, %s2657_s11 }
 0x218   : > { %v1326_v41 = vpop.xlane.xlu0 %1325 }
 0x219   : > { %v1348_v42 = vsub.f32 %v995_v60, %v1326_v41 }
 0x21a   : > { %v1329_v45 = vpop.xlane.xlu1 %1328 }
 0x21b   : > { %v1356_v46 = vmul.f32 1.442695, %v1348_v42  ;;  %v1349_v43 = vsub.f32 %v1041_v63, %v1329_v45 }
 0x21d   : > { %2544 = vpow2.f32 %v1356_v46  ;;  %v1358_v47 = vmul.f32 1.442695, %v1349_v43 }
 0x21f   : > { %2546 = vpow2.f32 %v1358_v47 }
 0x220   : > { %v1332_v44 = vpop.xlane.xlu0 %1331 }
 0x221   : > { %v1350_v48 = vsub.f32 %v1087_v6, %v1332_v44  ;;  %v777_v6 = vrot.slane %v770_v2, %v2756_v7 }
 0x223   : > { %v1360_v49 = vmul.f32 1.442695, %v1350_v48  ;;  %v778_v15 = vcombine.low %v769_v5, %v777_v6 }
 0x224   : > { %v1335_v50 = vpop.xlane.xlu0 %1334 }
 0x225   : > { %2548 = vpow2.f32 %v1360_v49  ;;  %v1351_v52 = vsub.f32 %v1133_v10, %v1335_v50  ;;  %v786_v25 = vrot.slane %v778_v15, %v2772_v32 }
 0x227   : > { %v2880_v53 = vpop.eup %2544  ;;  %v1362_v54 = vmul.f32 1.442695, %v1351_v52  ;;  %v794_v35 = vcombine.high %v786_v25, %v2661_v51  ;;  %v834_v40 = vshrl.u32 %v786_v25, 16 }
 0x228   : > { %v1338_v57 = vpop.xlane.xlu1 %1337  ;;  %v1372_v58 = vsel %vm1323_vm2, %v2880_v53, 0.0 }
 0x229   : > { %v2884_v59 = vpop.eup %2546  ;;  %2550 = vpow2.f32 %v1362_v54  ;;  %v1352_v60 = vsub.f32 %v1179_v17, %v1338_v57  ;;  %1373 = vadd.xlane.f32.xlu1 %v1372_v58  ;;  %v842_v45 = vshrl.u32 %v794_v35, 16 }
 0x22a   : > { %v1341_v61 = vpop.xlane.xlu0 %1340  ;;  %v1375_v62 = vsel %vm1323_vm2, %v2884_v59, 0.0 }
 0x22b   : > { %v1364_v63 = vmul.f32 1.442695, %v1352_v60  ;;  %v1353_v0 = vsub.f32 %v1225_v20, %v1341_v61  ;;  %1376 = vadd.xlane.f32.xlu0 %v1375_v62  ;;  %v779_v20 = vcombine.high %v769_v5, %v777_v6 }
 0x22d   : > { %2552 = vpow2.f32 %v1364_v63  ;;  %v1366_v3 = vmul.f32 1.442695, %v1353_v0 }
 0x22f   : > { %v2888_v4 = vpop.eup %2548  ;;  %2554 = vpow2.f32 %v1366_v3 }
 0x230   : > { %v1344_v8 = vpop.xlane.xlu1 %1343  ;;  %v1378_v9 = vsel %vm1323_vm2, %v2888_v4, 0.0 }
 0x231   : > { %v1354_v10 = vsub.f32 %v1271_v28, %v1344_v8  ;;  %1379 = vadd.xlane.f32.xlu1 %v1378_v9 }
 0x232   : > { %v1347_v11 = vpop.xlane.xlu0 %1346 }
 0x233   : > { %v2894_v12 = vpop.eup %2550  ;;  %v1368_v13 = vmul.f32 1.442695, %v1354_v10  ;;  %v1355_v14 = vsub.f32 %v2870_v31, %v1347_v11  ;;  %v793_v31 = vrot.slane %v779_v20, %v2772_v32 }
 0x234   : > { %v1381_v16 = vsel %vm1323_vm2, %v2894_v12, 0.0  ;;  %v750_v17 = vpop.permute.xlu1 %749 }
 0x235   : > { %2556 = vpow2.f32 %v1368_v13  ;;  %v1370_v18 = vmul.f32 1.442695, %v1355_v14  ;;  %1382 = vadd.xlane.f32.xlu0 %v1381_v16  ;;  %v751_v19 = vrot.slane %v750_v17, 4  ;;  %v795_v38 = vcombine.high %v793_v31, %v2661_v51 }
 0x236   : > { %v757_v21 = vpop.permute.xlu0 %756  ;;  %v850_v46 = vshrl.u32 %v793_v31, 16 }
 0x237   : > { %v2899_v22 = vpop.eup %2552  ;;  %2558 = vpow2.f32 %v1370_v18  ;;  %v758_v23 = vrot.slane %v757_v21, 4  ;;  %v796_v24 = vcombine.low %v750_v17, %v757_v21  ;;  %v858_v52 = vshrl.u32 %v795_v38, 16 }
 0x238   : > { %v1384_v27 = vsel %vm1323_vm2, %v2899_v22, 0.0 }
 0x239   : > { %v2904_v28 = vpop.eup %2554  ;;  %1385 = vadd.xlane.f32.xlu1 %v1384_v27  ;;  %v803_v29 = vrot.slane %v796_v24, %v2756_v7  ;;  %v804_v30 = vcombine.low %v751_v19, %v758_v23 }
 0x23a   : > { %v1387_v33 = vsel %vm1323_vm2, %v2904_v28, 0.0 }
 0x23b   : > { %1388 = vadd.xlane.f32.xlu0 %v1387_v33  ;;  %v811_v34 = vrot.slane %v804_v30, %v2756_v7 }
 0x23d   : > { %v812_v36 = vcombine.low %v803_v29, %v811_v34  ;;  %v813_v37 = vcombine.high %v803_v29, %v811_v34 }
 0x23f   : > { %v2913_v39 = vpop.eup %2556  ;;  %v820_v41 = vrot.slane %v812_v36, %v2772_v32  ;;  %v827_v42 = vrot.slane %v813_v37, %v2772_v32 }
 0x240   : > { %v1390_v43 = vsel %vm1323_vm2, %v2913_v39, 0.0 }
 0x241   : > { %v2919_v47 = vpop.eup %2558  ;;  %1391 = vadd.xlane.f32.xlu1 %v1390_v43  ;;  %v828_v44 = vcombine.high %v820_v41, %v2661_v51  ;;  %v829_v48 = vcombine.high %v827_v42, %v2661_v51  ;;  %v832_v49 = vpack.i.b16 %v820_v41, %v786_v25  ;;  %v835_v50 = vshrl.u32 %v820_v41, 16 }
 0x242   : > { %v1393_v54 = vsel %vm1323_vm2, %v2919_v47, 0.0  ;;  %v848_v55 = vpack.i.b16 %v827_v42, %v793_v31  ;;  %v851_v56 = vshrl.u32 %v827_v42, 16 }
 0x243   : > { %1394 = vadd.xlane.f32.xlu0 %v1393_v54  ;;  %v836_v57 = vpack.i.b16 %v835_v50, %v834_v40  ;;  %v840_v58 = vpack.i.b16 %v828_v44, %v794_v35  ;;  %v843_v60 = vshrl.u32 %v828_v44, 16  ;;  %v856_v61 = vpack.i.b16 %v829_v48, %v795_v38 }
 0x244   : > { %v852_v62 = vpack.i.b16 %v851_v56, %v850_v46  ;;  %v859_v63 = vshrl.u32 %v829_v48, 16  ;;  %v862_v0 = vcombine.low %v832_v49, %v848_v55 }
 0x245   : > { %v844_v1 = vpack.i.b16 %v843_v60, %v842_v45  ;;  %v870_v2 = vcombine.low %v840_v58, %v856_v61 }
 0x246   : > { %v860_v3 = vpack.i.b16 %v859_v63, %v858_v52  ;;  %v869_v5 = vrot.slane %v862_v0, %v2756_v7  ;;  %v896_v6 = vcombine.low %v836_v57, %v852_v62 }
 0x247   : > { %v877_v8 = vrot.slane %v870_v2, %v2756_v7 }
 0x248   : > { %v903_v9 = vrot.slane %v896_v6, %v2756_v7  ;;  %v904_v10 = vcombine.low %v844_v1, %v860_v3 }
 0x249   : > { %v878_v11 = vcombine.low %v869_v5, %v877_v8  ;;  %v879_v13 = vcombine.high %v869_v5, %v877_v8 }
 0x24a   : > { %v911_v14 = vrot.slane %v904_v10, %v2756_v7 }
 0x24b   : > { %v886_v15 = vrot.slane %v878_v11, %v2772_v32  ;;  %v893_v16 = vrot.slane %v879_v13, %v2772_v32 }
 0x24c   : > { %v912_v17 = vcombine.low %v903_v9, %v911_v14  ;;  %v913_v18 = vcombine.high %v903_v9, %v911_v14 }
 0x24d   : > { %v894_v19 = vcombine.high %v886_v15, %v2661_v51  ;;  %v895_v20 = vcombine.high %v893_v16, %v2661_v51  ;;  %v933_v23 = vshrl.u32 %v886_v15, 16  ;;  %v945_v27 = vshrl.u32 %v893_v16, 16 }
 0x24e   : > { %v920_v21 = vrot.slane %v912_v17, %v2772_v32  ;;  %v927_v24 = vrot.slane %v913_v18, %v2772_v32 }
 0x24f   : > { %v939_v25 = vshrl.u32 %v894_v19, 16  ;;  %v951_v36 = vshrl.u32 %v895_v20, 16 }
 0x250   : > { %v932_v29 = vpack.i.b16 %v920_v21, %v886_v15  ;;  %v934_v30 = vshrl.u32 %v920_v21, 16  ;;  %v928_v31 = vcombine.high %v920_v21, %v2661_v51  ;;  %v944_v33 = vpack.i.b16 %v927_v24, %v893_v16 }
 0x251   : > { %v946_v34 = vshrl.u32 %v927_v24, 16  ;;  %v929_v35 = vcombine.high %v927_v24, %v2661_v51 }
 0x252   : > { %v1434_v37 = vsel %vm1432_vm3, %v932_v29, 0  ;;  %v935_v38 = vpack.i.b16 %v934_v30, %v933_v23  ;;  %v938_v40 = vpack.i.b16 %v928_v31, %v894_v19  ;;  %v940_v41 = vshrl.u32 %v928_v31, 16 }
 0x253   : > { %2422 = vmatpush3.bf16.msra.mxu0 %v1434_v37  ;;  %v1618_v42 = vsel %vm1432_vm3, %v944_v33, 0  ;;  %v947_v45 = vpack.i.b16 %v946_v34, %v945_v27  ;;  %v950_v46 = vpack.i.b16 %v929_v35, %v895_v20  ;;  %v952_v43 = vshrl.u32 %v929_v35, 16 }
 0x254   : > { %v1480_v44 = vsel %vm1432_vm3, %v935_v38, 0  ;;  %2433 = vmatprep.subr.bf16.mxu0 %v2658_v26  ;;  %v1526_v48 = vsel %vm1432_vm3, %v938_v40, 0  ;;  %v941_v51 = vpack.i.b16 %v940_v41, %v939_v25 }
 0x255   : > { %2428 = vmatpush3.bf16.msra.mxu1 %v1480_v44  ;;  %v1664_v49 = vsel %vm1432_vm3, %v947_v45, 0  ;;  %v2944_v50 = vsel %vm1432_vm3, %v950_v46, 0  ;;  %v953_v52 = vpack.i.b16 %v952_v43, %v951_v36 }
 0x256   : > { %2439 = vmatprep.subr.bf16.mxu1 %v2658_v26  ;;  %v1572_v54 = vsel %vm1432_vm3, %v941_v51, 0 }
 0x257   : > { %v2949_v55 = vsel %vm1432_vm3, %v953_v52, 0 }
 0x2b6   : > { %v1374_v56 = vpop.xlane.xlu1 %1373 }
 0x2b7   : > { %2560 = vrcp.f32 %v1374_v56 }
 0x2b8   : > { %v1377_v57 = vpop.xlane.xlu0 %1376 }
 0x2b9   : > { %2562 = vrcp.f32 %v1377_v57 }
 0x2be   : > { %v1380_v58 = vpop.xlane.xlu1 %1379 }
 0x2bf   : > { %2564 = vrcp.f32 %v1380_v58 }
 0x2c1   : > { %v2561_v60 = vpop.eup %2560 }
 0x2c2   : > { %v1404_v61 = vmul.f32 %v2561_v60, %v2880_v53  ;;  %v1383_v62 = vpop.xlane.xlu0 %1382 }
 0x2c3   : > { %v2563_v63 = vpop.eup %2562  ;;  %2566 = vrcp.f32 %v1383_v62 }
 0x2c4   : > { %v1405_v0 = vmul.f32 %v2563_v63, %v2884_v59  ;;  %v1412_v1 = vpack.c.bf16 %v1404_v61, %v1404_v61 }
 0x2c6   : > { %1421 = vst.msk [vmem:[%s2956_s24] sm:$0xf] %vm1420_vm4, %v1412_v1  ;;  %2424 = vmatmul.mubr.msk.bf16.vlgmr.msra.gmra.mrb[16].mxu0 %vm1323_vm2, %v1412_v1  ;;  %v1386_v2 = vpop.xlane.xlu1 %1385  ;;  %v1413_v3 = vpack.c.bf16 %v1405_v0, %v1405_v0 }
 0x2c7   : > { %2434 = vmatpush3.bf16.msra.mxu0 %v1526_v48  ;;  %2568 = vrcp.f32 %v1386_v2  ;;  %2435 = vmatprep.mubr.msk.bf16.mxu0 %vm2659_vm0, %v2658_v26 }
 0x2c8   : > { %v1389_v53 = vpop.xlane.xlu0 %1388  ;;  %1422 = vst.msk [vmem:[%s2956_s24 + $0x4] sm:$0xf] %vm1420_vm4, %v1413_v3  ;;  %2430 = vmatmul.mubr.msk.bf16.vlgmr.msra.gmra.mrb[16].mxu1 %vm1323_vm2, %v1413_v3  ;;  %2445 = vmatprep.subr.bf16.mxu0 %v2658_v26 }
 0x2c9   : > { %v2565_v59 = vpop.eup %2564  ;;  %2570 = vrcp.f32 %v1389_v53  ;;  %2440 = vmatpush3.bf16.msra.mxu1 %v1572_v54  ;;  %2441 = vmatprep.mubr.msk.bf16.mxu1 %vm2659_vm0, %v2658_v26 }
 0x2ca   : > { %v1406_v5 = vmul.f32 %v2565_v59, %v2888_v4  ;;  %2451 = vmatprep.subr.bf16.mxu1 %v2658_v26 }
 0x2cc   : > { %v1414_v6 = vpack.c.bf16 %v1406_v5, %v1406_v5 }
 0x2cd   : > { %v2567_v8 = vpop.eup %2566 }
 0x2ce   : > { %v1407_v9 = vmul.f32 %v2567_v8, %v2894_v12  ;;  %1423 = vst.msk [vmem:[%s2956_s24 + $0x8] sm:$0xf] %vm1420_vm4, %v1414_v6  ;;  %2436 = vmatmul.mubr.msk.bf16.vlgmr.msra.gmra.mrb[20].mxu0 %vm1323_vm2, %v1414_v6  ;;  %v1392_v10 = vpop.xlane.xlu1 %1391 }
 0x2cf   : > { %2446 = vmatpush3.bf16.msra.mxu0 %v1618_v42  ;;  %2572 = vrcp.f32 %v1392_v10  ;;  %2447 = vmatprep.mubr.msk.bf16.mxu0 %vm2659_vm0, %v2658_v26 }
 0x2d0   : > { %v1395_v11 = vpop.xlane.xlu0 %1394  ;;  %v1415_v4 = vpack.c.bf16 %v1407_v9, %v1407_v9  ;;  %2457 = vmatprep.subr.bf16.mxu0 %v2658_v26 }
 0x2d1   : > { %v2569_v13 = vpop.eup %2568  ;;  %2574 = vrcp.f32 %v1395_v11 }
 0x2d2   : > { %v1408_v12 = vmul.f32 %v2569_v13, %v2899_v22  ;;  %1424 = vst.msk [vmem:[%s2956_s24 + $0xc] sm:$0xf] %vm1420_vm4, %v1415_v4  ;;  %2442 = vmatmul.mubr.msk.bf16.vlgmr.msra.gmra.mrb[20].mxu1 %vm1323_vm2, %v1415_v4 }
 0x2d3   : > { %v2571_v14 = vpop.eup %2570  ;;  %2452 = vmatpush3.bf16.msra.mxu1 %v1664_v49  ;;  %2453 = vmatprep.mubr.msk.bf16.mxu1 %vm2659_vm0, %v2658_v26 }
 0x2d4   : > { %v1409_v15 = vmul.f32 %v2571_v14, %v2904_v28  ;;  %v1416_v16 = vpack.c.bf16 %v1408_v12, %v1408_v12  ;;  %2463 = vmatprep.subr.bf16.mxu1 %v2658_v26 }
 0x2d6   : > { %1425 = vst.msk [vmem:[%s2956_s24 + $0x10] sm:$0xf] %vm1420_vm4, %v1416_v16  ;;  %2448 = vmatmul.mubr.msk.bf16.vlgmr.msra.gmra.mrb[24].mxu0 %vm1323_vm2, %v1416_v16  ;;  %v1417_v22 = vpack.c.bf16 %v1409_v15, %v1409_v15 }
 0x2d7   : > { %2458 = vmatpush3.bf16.msra.mxu0 %v2944_v50  ;;  %2459 = vmatprep.mubr.msk.bf16.mxu0 %vm2659_vm0, %v2658_v26 }
 0x2d8   : > { %1426 = vst.msk [vmem:[%s2956_s24 + $0x14] sm:$0xf] %vm1420_vm4, %v1417_v22 }
 0x2d9   : > { %v2573_v17 = vpop.eup %2572 }
 0x2da   : > { %v1410_v28 = vmul.f32 %v2573_v17, %v2913_v39  ;;  %2454 = vmatmul.mubr.msk.bf16.vlgmr.msra.gmra.mrb[24].mxu1 %vm1323_vm2, %v1417_v22 }
 0x2db   : > { %v2575_v18 = vpop.eup %2574  ;;  %2464 = vmatpush3.bf16.msra.mxu1 %v2949_v55  ;;  %2465 = vmatprep.mubr.msk.bf16.mxu1 %vm2659_vm0, %v2658_v26 }
 0x2dc   : > { %v1411_v19 = vmul.f32 %v2575_v18, %v2919_v47  ;;  %v1418_v20 = vpack.c.bf16 %v1410_v28, %v1410_v28 }
 0x2de   : > { %1427 = vst.msk [vmem:[%s2956_s24 + $0x18] sm:$0xf] %vm1420_vm4, %v1418_v20  ;;  %2460 = vmatmul.mubr.msk.bf16.vlgmr.msra.gmra.mrb[28].mxu0 %vm1323_vm2, %v1418_v20  ;;  %v1419_v21 = vpack.c.bf16 %v1411_v19, %v1411_v19 }
 0x2e0   : > { %1428 = vst.msk [vmem:[%s2956_s24 + $0x1c] sm:$0xf] %vm1420_vm4, %v1419_v21 }
 0x2e2   : > { %2466 = vmatmul.mubr.msk.bf16.vlgmr.msra.gmra.mrb[28].mxu1 %vm1323_vm2, %v1419_v21 }
 0x399   : > { %v1470_v39 = vpop.f32.mrb[16].mxu0 }
 0x39a   : > { %v2425_v23 = vpop.f32.mrb[17].mxu0 }
 0x39b   : > { %v1473_v24 = vpop.f32.mrb[18].mxu0  ;;  %v1516_v25 = vpop.f32.mrb[16].mxu1 }
 0x39c   : > { %v2426_v27 = vpop.f32.mrb[19].mxu0  ;;  %v2431_v29 = vpop.f32.mrb[17].mxu1 }
 0x39d   : > { %v1519_v30 = vpop.f32.mrb[18].mxu1 }
 0x39e   : > { %v2432_v26 = vpop.f32.mrb[19].mxu1 }
 0x3a1   : > { %v1562_v31 = vpop.f32.mrb[20].mxu0 }
 0x3a2   : > { %v1798_v47 = vcombine.low %v1470_v39, %v1562_v31  ;;  %v1799_v33 = vcombine.high %v1470_v39, %v1562_v31  ;;  %v2437_v34 = vpop.f32.mrb[21].mxu0 }
 0x3a3   : > { %v1565_v35 = vpop.f32.mrb[22].mxu0 }
 0x3a4   : > { %v2438_v36 = vpop.f32.mrb[23].mxu0  ;;  %v1806_v45 = vrot.slane %v1798_v47, %v2756_v7  ;;  %v1813_v46 = vrot.slane %v1799_v33, %v2756_v7 }
 0x3a5   : > { %v1608_v37 = vpop.f32.mrb[20].mxu1 }
 0x3a6   : > { %v1814_v38 = vcombine.low %v1516_v25, %v1608_v37  ;;  %v1815_v40 = vcombine.high %v1516_v25, %v1608_v37  ;;  %v2443_v41 = vpop.f32.mrb[21].mxu1 }
 0x3a7   : > { %v1611_v42 = vpop.f32.mrb[22].mxu1 }
 0x3a8   : > { %v1822_v43 = vrot.slane %v1814_v38, %v2756_v7  ;;  %v1829_v44 = vrot.slane %v1815_v40, %v2756_v7  ;;  %v2444_v48 = vpop.f32.mrb[23].mxu1 }
 0x3a9   : > { %v1654_v51 = vpop.f32.mrb[24].mxu0 }
 0x3aa   : > { %v1862_v49 = vcombine.low %v1806_v45, %v1822_v43  ;;  %v1863_v50 = vcombine.high %v1806_v45, %v1822_v43  ;;  %v1878_v52 = vcombine.low %v1813_v46, %v1829_v44  ;;  %v1879_v54 = vcombine.high %v1813_v46, %v1829_v44  ;;  %v2449_v55 = vpop.f32.mrb[25].mxu0 }
 0x3ab   : > { %v1657_v56 = vpop.f32.mrb[26].mxu0 }
 0x3ac   : > { %v1870_v57 = vrot.slane %v1862_v49, %v2772_v32  ;;  %v1877_v58 = vrot.slane %v1863_v50, %v2772_v32  ;;  %v1886_v60 = vrot.slane %v1878_v52, %v2772_v32  ;;  %v1893_v61 = vrot.slane %v1879_v54, %v2772_v32  ;;  %v2450_v62 = vpop.f32.mrb[27].mxu0 }
 0x3ad   : > { %v1700_v63 = vpop.f32.mrb[24].mxu1 }
 0x3ae   : > { %v2319_v0 = vcombine.low %v1870_v57, %v1877_v58  ;;  %v2321_v1 = vcombine.high %v1870_v57, %v1877_v58  ;;  %v2323_v2 = vcombine.low %v1886_v60, %v1893_v61  ;;  %v2325_v3 = vcombine.high %v1886_v60, %v1893_v61  ;;  %v2455_v53 = vpop.f32.mrb[25].mxu1 }
 0x3af   : > { %v1703_v59 = vpop.f32.mrb[26].mxu1 }
 0x3b0   : > { %v1942_v5 = vrot.slane %v2319_v0, %v2756_v7  ;;  %v1958_v6 = vrot.slane %v2321_v1, %v2756_v7  ;;  %v1974_v8 = vrot.slane %v2323_v2, %v2756_v7  ;;  %v1990_v9 = vrot.slane %v2325_v3, %v2756_v7  ;;  %v2456_v10 = vpop.f32.mrb[27].mxu1 }
 0x3b1   : > { %v1746_v11 = vpop.f32.mrb[28].mxu0 }
 0x3b2   : > { %v1830_v4 = vcombine.low %v1654_v51, %v1746_v11  ;;  %v1831_v13 = vcombine.high %v1654_v51, %v1746_v11  ;;  %v2461_v12 = vpop.f32.mrb[29].mxu0  ;;  %v1998_v14 = vcombine.low %v1942_v5, %v1958_v6  ;;  %v1999_v15 = vcombine.high %v1942_v5, %v1958_v6 }
 0x3b3   : > { %v1749_v16 = vpop.f32.mrb[30].mxu0  ;;  %v2030_v22 = vcombine.low %v1974_v8, %v1990_v9  ;;  %v2031_v17 = vcombine.high %v1974_v8, %v1990_v9 }
 0x3b4   : > { %v2462_v28 = vpop.f32.mrb[31].mxu0  ;;  %v3019_v18 = vrot.slane %v1998_v14, %v2772_v32  ;;  %v3022_v19 = vrot.slane %v1999_v15, %v2772_v32  ;;  %v1838_v47 = vrot.slane %v1830_v4, %v2756_v7  ;;  %v1845_v33 = vrot.slane %v1831_v13, %v2756_v7 }
 0x3b5   : > { %v1792_v20 = vpop.f32.mrb[28].mxu1  ;;  %v3025_v21 = vrot.slane %v2030_v22, %v2772_v32  ;;  %v3028_v39 = vrot.slane %v2031_v17, %v2772_v32 }
 0x3b6   : > { %v1846_v23 = vcombine.low %v1700_v63, %v1792_v20  ;;  %v1847_v24 = vcombine.high %v1700_v63, %v1792_v20  ;;  %v2467_v25 = vpop.f32.mrb[29].mxu1 }
 0x3b7   : > { %v1795_v27 = vpop.f32.mrb[30].mxu1  ;;  %v2063_v29 = vcombine.high %v3019_v18, %v3025_v21  ;;  %v2065_v30 = vcombine.high %v3022_v19, %v3028_v39  ;;  %v2064_v26 = vcombine.low %v3022_v19, %v3028_v39  ;;  %v2062_v31 = vcombine.low %v3019_v18, %v3025_v21 }
 0x3b8   : > { %v1854_v34 = vrot.slane %v1846_v23, %v2756_v7  ;;  %v1861_v35 = vrot.slane %v1847_v24, %v2756_v7  ;;  %v2468_v36 = vpop.f32.mrb[31].mxu1 }
 0x3b9   : > { %v2531_v37 = vpack.i.bf16 %v2065_v30, %v2063_v29 }
 0x3ba   : > { %v1894_v38 = vcombine.low %v1838_v47, %v1854_v34  ;;  %v1895_v40 = vcombine.high %v1838_v47, %v1854_v34  ;;  %v1910_v41 = vcombine.low %v1845_v33, %v1861_v35  ;;  %v1911_v42 = vcombine.high %v1845_v33, %v1861_v35 }
 0x3bb   : > { %2532 = vrot.lane.b32.xlu1 %v2531_v37, %s2657_s11 }
 0x3bc   : > { %v1902_v45 = vrot.slane %v1894_v38, %v2772_v32  ;;  %v1909_v46 = vrot.slane %v1895_v40, %v2772_v32  ;;  %v1918_v43 = vrot.slane %v1910_v41, %v2772_v32  ;;  %v1925_v44 = vrot.slane %v1911_v42, %v2772_v32 }
 0x3be   : > { %v2320_v48 = vcombine.low %v1902_v45, %v1909_v46  ;;  %v2322_v51 = vcombine.high %v1902_v45, %v1909_v46  ;;  %v2324_v49 = vcombine.low %v1918_v43, %v1925_v44  ;;  %v2326_v50 = vcombine.high %v1918_v43, %v1925_v44 }
 0x3c0   : > { %v1949_v52 = vrot.slane %v2320_v48, %v2756_v7  ;;  %v1965_v54 = vrot.slane %v2322_v51, %v2756_v7  ;;  %v1981_v55 = vrot.slane %v2324_v49, %v2756_v7  ;;  %v1997_v56 = vrot.slane %v2326_v50, %v2756_v7 }
 0x3c2   : > { %v2014_v57 = vcombine.low %v1949_v52, %v1965_v54  ;;  %v2015_v58 = vcombine.high %v1949_v52, %v1965_v54  ;;  %v2046_v60 = vcombine.low %v1981_v55, %v1997_v56  ;;  %v2047_v61 = vcombine.high %v1981_v55, %v1997_v56 }
 0x3c4   : > { %v2022_v62 = vrot.slane %v2014_v57, %v2772_v32  ;;  %v2029_v7 = vrot.slane %v2015_v58, %v2772_v32  ;;  %v2054_v63 = vrot.slane %v2046_v60, %v2772_v32  ;;  %v2061_v0 = vrot.slane %v2047_v61, %v2772_v32 }
 0x3c5   : > { %2589 = shalt.err (!%p2586_p5)
}
 0x3c6   : > { %s2590_s13 = scalar_lea.hbm %s3056_s7, 512  ;;  %s2594_s22 = scalar_lea.hbm %s3133_s4, 1024 }
 0x3c7   : > { %p2591_p6 = scmp.ne.s32.totalorder %s3056_s7, %s2590_s13  ;;  %p2595_p10 = scmp.lt.u32.totalorder %s3056_s7, %s3133_s4 }
 0x3c8   : > { %p2596_p11 = scmp.lt.u32.totalorder %s2594_s22, %s2590_s13  ;;  %p2598_p13 = scmp.lt.u32.totalorder %s2590_s13, %s3056_s7 }
 0x3c9   : > { %p2592_p7 = pnand %p2591_p6, %p2729_p4 }
 0x3ca   : > { %p2597_p12 = por %p2596_p11, %p2595_p10 }
 0x3cb   : > { %p2593_p9 = pneg %p2592_p7 }
 0x3cc   : > { %p2599_p0 = por %p2598_p13, %p2597_p12 }
 0x3ce   : > { %p2600_p1 = pnand %p2599_p0, %p2593_p9 }
 0x3d0   : > { %2603 = shalt.err (!%p2600_p1)
}
 0x3d1   : > { %s2663_s5 = smov 4   ;;  %v2067_v32 = vcombine.high %v2022_v62, %v2054_v63  ;;  %v2069_v1 = vcombine.high %v2029_v7, %v2061_v0  ;;  %v2068_v2 = vcombine.low %v2029_v7, %v2061_v0  ;;  %v2066_v3 = vcombine.low %v2022_v62, %v2054_v63  ;;  %s320_s25 = scalar_lea.vmem %s3132_s3, %s2746_s30 }
 0x3d2   : > { %2469 = dma.vmem_to_hbm [thread:$0]  (%p2729_p4), %s3058_s29, 512, %s3056_s7, %s3066_s18, %s2657_s11, %s2657_s11, %s2663_s5  }
 0x3d3   : > { %v2536_v53 = vpack.i.bf16 %v2069_v1, %v2067_v32 }
 0x3d5   : > { %2537 = vrot.lane.b32.xlu0 %v2536_v53, %s2657_s11 }
 0x42d   : > { %v2533_v59 = vpop.permute.xlu1 %2532 }
 0x42e   : > { %v2535_v5 = vunpack.i.h.bf16 %v2533_v59  ;;  %v2534_v6 = vunpack.i.l.bf16 %v2533_v59 }
 0x430   : > { %v2087_v8 = vsel %vm954_vm1, %v2064_v26, %v2535_v5  ;;  %v2086_v9 = vsel %vm954_vm1, %v2062_v31, %v2534_v6 }
 0x431   : > { %v2338_v10 = vpack.c.bf16 %v2087_v8, %v2086_v9 }
 0x433   : > { %2106 = vst [vmem:[%s320_s25] sm:$0xff] %v2338_v10 }
 0x447   : > { %v2538_v11 = vpop.permute.xlu0 %2537 }
 0x448   : > { %v2540_v4 = vunpack.i.h.bf16 %v2538_v11  ;;  %v2539_v13 = vunpack.i.l.bf16 %v2538_v11 }
 0x44a   : > { %v2089_v12 = vsel %vm954_vm1, %v2068_v2, %v2540_v4  ;;  %v2088_v14 = vsel %vm954_vm1, %v2066_v3, %v2539_v13 }
 0x44b   : > { %v2339_v15 = vpack.c.bf16 %v2089_v12, %v2088_v14 }
 0x44d   : > { %2107 = vst [vmem:[%s320_s25 + $0x8] sm:$0xff] %v2339_v15 }
 0x44e PF: > { %p2475_p4 = scmp.ge.s32.totalorder %s2654_s20, 2  ;;  %s2164_s30 = sand.u32 1, %s2634_s15  }
 0x44f   : > { %s2165_s11 = scalar_lea.sflag [#allocation3], %s2164_s30 }
 0x450   : > { %p2472_p2 = pnand %p2475_p4, %p2736_p8 }
 0x452   : > { %2629 = dma.done.wait (!%p2472_p2), %s2165_s11, 512  }
 0x453   : > { %2631 = vsyncadd (!%p2472_p2), %s2165_s11, 4294966784  ;;  %s18_s20 = sadd.s32 1, %s2654_s20   ;;  %s3136_s15 = smov %s2638_s16 }
 0x454   : > { %p15_p3 = scmp.ge.s32.totalorder %s18_s20, 4   ;;  %s3137_s16 = smov %s2642_s17 }
 0x455   : > { %s3138_s17 = smov %s2742_s28  ;;  %s3139_s18 = smov %s2650_s19 }
 0x456   : > { %s3140_s19 = smov %s3142_s23  ;;  %17 = sbr.rel (!%p15_p3) target bundleno = 4 (0x4), region = 85 }
 0x45d   :  { %2170 = vsyncpa [#allocation3], 1 }
 0x45e   :  { %2172 = vsyncpa [#allocation3 + $0x1], 1 }

// kernel: encoder_layer_forward.3
= control target key start
LH: loop header
LB: loop body
LE: loop exit
PB: predicated region body
PF: predicated region fallthrough
CT: control target
= control target key end

     0   :  { %s4547_s18 = smov 0   ;;  %s4549_s19 = smov 0   ;;  %s5832_s0 = inlined_call_operand.vmem [shape: bf16[2,8,512], index: 0, kind: input, shape index: {}]   ;;  %s5833_s1 = inlined_call_operand.vmem [shape: bf16[512,1536], index: 1, kind: input, shape index: {}]   ;;  %s5834_s2 = inlined_call_operand.vmem [shape: f32[1,1536], index: 2, kind: input, shape index: {}]   ;;  %s5835_s3 = inlined_call_operand.vmem [shape: bf16[2,8,512], index: 3, kind: output, shape index: {0}]   ;;  %s5836_s4 = inlined_call_operand.vmem [shape: bf16[2,8,512], index: 4, kind: output, shape index: {1}]   ;;  %s5837_s5 = inlined_call_operand.vmem [shape: bf16[2,8,512], index: 5, kind: output, shape index: {2}]  }
   0x1   :  { %s4551_s20 = smov 0  }
   0x2 LB: > { %s28_s21 = sadd.s32 1, %s4511_s19  ;;  %p3438_p0 = scmp.ge.s32.totalorder %s4515_s20, 1  ;;  %s4515_s20 = sphi %s4551_s20, %s16_s20   ;;  %s4511_s19 = sphi %s4549_s19, %s5839_s19   ;;  %s4507_s18 = sphi %s4547_s18, %s5838_s18  }
   0x3   : > { %p30_p1 = scmp.ge.s32.totalorder %s28_s21, 2  ;;  %p216_p2 = scmp.lt.s32.totalorder %s4515_s20, 3 }
   0x5   : > { %s5841_s21 = smov (%p30_p1, %s28_s21), 0  ;;  %p217_p3 = pnand %p3438_p0, %p216_p2 }
   0x6   : > { %v3913_v0 = vld [vmem:[%s5833_s1 + $0x4] ss:$48 sps:$4 sm:$0xff] (!%p217_p3)   ;;  %v3915_v1 = vld [vmem:[%s5833_s1 + $0xc] ss:$48 sps:$4 sm:$0xff] (!%p217_p3)   ;;  %v3917_v2 = vld [vmem:[%s5833_s1] ss:$48 sps:$4 sm:$0xff] (!%p217_p3)  }
   0x7   : > { %220 = sbr.rel (%p217_p3) target bundleno = 609 (0x261), region = 32  ;;  %2690 = vmatprep.subr.bf16.mxu0 (!%p217_p3), %v3913_v0  ;;  %v3918_v3 = vld [vmem:[%s5833_s1 + $0x8] ss:$48 sps:$4 sm:$0xff] (!%p217_p3)   ;;  %2772 = vmatprep.subr.bf16.mxu1 (!%p217_p3), %v3915_v1  ;;  %v3919_v4 = vld [vmem:[%s5833_s1 + $0x64] ss:$48 sps:$4 sm:$0xff] (!%p217_p3)   ;;  %p270_p4 = scmp.lt.s32.totalorder (!%p217_p3), %s4507_s18, 1 }
   0x8   : > { %2691 = vmatpush1.bf16.msra.mxu0 (!%p217_p3), %v3917_v2  ;;  %2773 = vmatpush1.bf16.msra.mxu1 (!%p217_p3), %v3918_v3  ;;  %v3921_v5 = vld [vmem:[%s5833_s1 + $0x6c] ss:$48 sps:$4 sm:$0xff] (!%p217_p3)   ;;  %v3923_v6 = vld [vmem:[%s5833_s1 + $0x60] ss:$48 sps:$4 sm:$0xff] (!%p217_p3)   ;;  %v3924_v7 = vld [vmem:[%s5833_s1 + $0x68] ss:$48 sps:$4 sm:$0xff] (!%p217_p3)  }
   0x9   : > { %2692 = vmatprep.subr.bf16.mxu0 (!%p217_p3), %v3919_v4  ;;  %2774 = vmatprep.subr.bf16.mxu1 (!%p217_p3), %v3921_v5  ;;  %v3925_v8 = vld [vmem:[%s5833_s1 + $0xc4] ss:$48 sps:$4 sm:$0xff] (!%p217_p3)   ;;  %v3927_v9 = vld [vmem:[%s5833_s1 + $0xcc] ss:$48 sps:$4 sm:$0xff] (!%p217_p3)   ;;  %v3929_v10 = vld [vmem:[%s5833_s1 + $0xc0] ss:$48 sps:$4 sm:$0xff] (!%p217_p3)  }
   0xa   : > { %v3930_v11 = vld [vmem:[%s5833_s1 + $0xc8] ss:$48 sps:$4 sm:$0xff] (!%p217_p3)   ;;  %v3931_v12 = vld [vmem:[%s5833_s1 + $0x124] ss:$48 sps:$4 sm:$0xff] (!%p217_p3)   ;;  %v3933_v13 = vld [vmem:[%s5833_s1 + $0x12c] ss:$48 sps:$4 sm:$0xff] (!%p217_p3)  }
   0xb   : > { %v3935_v14 = vld [vmem:[%s5833_s1 + $0x120] ss:$48 sps:$4 sm:$0xff] (!%p217_p3)   ;;  %v3936_v15 = vld [vmem:[%s5833_s1 + $0x128] ss:$48 sps:$4 sm:$0xff] (!%p217_p3)   ;;  %v3937_v16 = vld [vmem:[%s5833_s1 + $0x184] ss:$48 sps:$4 sm:$0xff] (!%p217_p3)  }
   0xc   : > { %2693 = vmatpush1.bf16.msra.mxu0 (!%p217_p3), %v3923_v6  ;;  %2775 = vmatpush1.bf16.msra.mxu1 (!%p217_p3), %v3924_v7  ;;  %v3939_v17 = vld [vmem:[%s5833_s1 + $0x18c] ss:$48 sps:$4 sm:$0xff] (!%p217_p3)   ;;  %v3941_v18 = vld [vmem:[%s5833_s1 + $0x180] ss:$48 sps:$4 sm:$0xff] (!%p217_p3)   ;;  %v3942_v19 = vld [vmem:[%s5833_s1 + $0x188] ss:$48 sps:$4 sm:$0xff] (!%p217_p3)  }
   0xd   : > { %2694 = vmatprep.subr.bf16.mxu0 (!%p217_p3), %v3925_v8  ;;  %2776 = vmatprep.subr.bf16.mxu1 (!%p217_p3), %v3927_v9  ;;  %v3943_v20 = vld [vmem:[%s5833_s1 + $0x1e4] ss:$48 sps:$4 sm:$0xff] (!%p217_p3)   ;;  %v3945_v21 = vld [vmem:[%s5833_s1 + $0x1ec] ss:$48 sps:$4 sm:$0xff] (!%p217_p3)   ;;  %v3947_v22 = vld [vmem:[%s5833_s1 + $0x1e0] ss:$48 sps:$4 sm:$0xff] (!%p217_p3)  }
   0xe   : > { %v3948_v23 = vld [vmem:[%s5833_s1 + $0x1e8] ss:$48 sps:$4 sm:$0xff]   ;;  %v3949_v24 = vld [vmem:[%s5833_s1 + $0x244] ss:$48 sps:$4 sm:$0xff]   ;;  %v3951_v25 = vld [vmem:[%s5833_s1 + $0x24c] ss:$48 sps:$4 sm:$0xff]  }
   0xf   : > { %v3953_v26 = vld [vmem:[%s5833_s1 + $0x240] ss:$48 sps:$4 sm:$0xff]   ;;  %v3954_v27 = vld [vmem:[%s5833_s1 + $0x248] ss:$48 sps:$4 sm:$0xff]   ;;  %v3955_v28 = vld [vmem:[%s5833_s1 + $0x2a4] ss:$48 sps:$4 sm:$0xff]  }
  0x10   : > { %2695 = vmatpush1.bf16.msra.mxu0 %v3929_v10  ;;  %2777 = vmatpush1.bf16.msra.mxu1 %v3930_v11  ;;  %v3957_v29 = vld [vmem:[%s5833_s1 + $0x2ac] ss:$48 sps:$4 sm:$0xff]   ;;  %v3959_v30 = vld [vmem:[%s5833_s1 + $0x2a0] ss:$48 sps:$4 sm:$0xff]   ;;  %v3960_v31 = vld [vmem:[%s5833_s1 + $0x2a8] ss:$48 sps:$4 sm:$0xff]  }
  0x11   : > { %2696 = vmatprep.subr.bf16.mxu0 %v3931_v12  ;;  %2778 = vmatprep.subr.bf16.mxu1 %v3933_v13  ;;  %v3961_v32 = vld [vmem:[%s5833_s1 + $0x304] ss:$48 sps:$4 sm:$0xff]   ;;  %v3963_v33 = vld [vmem:[%s5833_s1 + $0x30c] ss:$48 sps:$4 sm:$0xff]   ;;  %v3965_v34 = vld [vmem:[%s5833_s1 + $0x300] ss:$48 sps:$4 sm:$0xff]  }
  0x12   : > { %v3966_v35 = vld [vmem:[%s5833_s1 + $0x308] ss:$48 sps:$4 sm:$0xff]   ;;  %v3967_v36 = vld [vmem:[%s5833_s1 + $0x364] ss:$48 sps:$4 sm:$0xff]   ;;  %s5843_s18 = smov (!%p270_p4, %s4507_s18), 1 }
  0x13   : > { %v3969_v37 = vld [vmem:[%s5833_s1 + $0x36c] ss:$48 sps:$4 sm:$0xff]   ;;  %v3971_v38 = vld [vmem:[%s5833_s1 + $0x360] ss:$48 sps:$4 sm:$0xff]   ;;  %v3972_v39 = vld [vmem:[%s5833_s1 + $0x368] ss:$48 sps:$4 sm:$0xff]  }
  0x14   : > { %2697 = vmatpush1.bf16.msra.mxu0 %v3935_v14  ;;  %2779 = vmatpush1.bf16.msra.mxu1 %v3936_v15  ;;  %v3973_v40 = vld [vmem:[%s5833_s1 + $0x3c4] ss:$48 sps:$4 sm:$0xff]   ;;  %s4692_s16 = sshll.u32 %s5843_s18, 4  ;;  %v3975_v41 = vld [vmem:[%s5833_s1 + $0x3cc] ss:$48 sps:$4 sm:$0xff]  }
  0x15   : > { %2698 = vmatprep.subr.bf16.mxu0 %v3937_v16  ;;  %2780 = vmatprep.subr.bf16.mxu1 %v3939_v17  ;;  %v3977_v42 = vld [vmem:[%s5833_s1 + $0x3c0] ss:$48 sps:$4 sm:$0xff]   ;;  %v3978_v43 = vld [vmem:[%s5833_s1 + $0x3c8] ss:$48 sps:$4 sm:$0xff]   ;;  %s4707_s18 = scalar_lea.vmem %s5832_s0, %s4692_s16  ;;  %v3979_v44 = vld [vmem:[%s5833_s1 + $0x424] ss:$48 sps:$4 sm:$0xff]   ;;  %s287_s11 = scalar_lea.vmem %s5835_s3, %s4692_s16 }
  0x16   : > { %v3981_v45 = vld [vmem:[%s5833_s1 + $0x42c] ss:$48 sps:$4 sm:$0xff]   ;;  %v306_v46 = vld [vmem:[%s4707_s18] sm:$0xff]  ;;  %v3984_v49 = vld [vmem:[%s5833_s1 + $0x428] ss:$48 sps:$4 sm:$0xff]   ;;  %s296_s27 = scalar_lea.vmem %s5836_s4, %s4692_s16  ;;  %s305_s7 = scalar_lea.vmem %s5837_s5, %s4692_s16 }
  0x17   : > { %v3983_v47 = vld [vmem:[%s5833_s1 + $0x420] ss:$48 sps:$4 sm:$0xff]   ;;  %v4719_v48 = vcombine.high %v306_v46, %v306_v46  ;;  %v3985_v50 = vld [vmem:[%s5833_s1 + $0x484] ss:$48 sps:$4 sm:$0xff]   ;;  %v3987_v51 = vld [vmem:[%s5833_s1 + $0x48c] ss:$48 sps:$4 sm:$0xff]   ;;  %v4783_v5 = vcombine.low %v306_v46, %v306_v46 }
  0x18   : > { %2699 = vmatpush1.bf16.msra.mxu0 %v3941_v18  ;;  %2781 = vmatpush1.bf16.msra.mxu1 %v3942_v19  ;;  %v3989_v52 = vld [vmem:[%s5833_s1 + $0x480] ss:$48 sps:$4 sm:$0xff]   ;;  %v3990_v53 = vld [vmem:[%s5833_s1 + $0x488] ss:$48 sps:$4 sm:$0xff]   ;;  %v3991_v54 = vld [vmem:[%s5833_s1 + $0x4e4] ss:$48 sps:$4 sm:$0xff]  }
  0x19   : > { %2700 = vmatprep.subr.bf16.mxu0 %v3943_v20  ;;  %2782 = vmatprep.subr.bf16.mxu1 %v3945_v21  ;;  %v3993_v55 = vld [vmem:[%s5833_s1 + $0x4ec] ss:$48 sps:$4 sm:$0xff]   ;;  %v3995_v56 = vld [vmem:[%s5833_s1 + $0x4e0] ss:$48 sps:$4 sm:$0xff]   ;;  %v3996_v57 = vld [vmem:[%s5833_s1 + $0x4e8] ss:$48 sps:$4 sm:$0xff]  }
  0x1a   : > { %2722 = vmatprep.mubr.bf16.mxu0 %v4719_v48  ;;  %2804 = vmatprep.mubr.bf16.mxu1 %v4719_v48  ;;  %v3997_v58 = vld [vmem:[%s5833_s1 + $0x544] ss:$48 sps:$4 sm:$0xff]   ;;  %v3999_v59 = vld [vmem:[%s5833_s1 + $0x54c] ss:$48 sps:$4 sm:$0xff]   ;;  %v4001_v60 = vld [vmem:[%s5833_s1 + $0x540] ss:$48 sps:$4 sm:$0xff]  }
  0x1b   : > { %v4002_v61 = vld [vmem:[%s5833_s1 + $0x548] ss:$48 sps:$4 sm:$0xff]   ;;  %v4003_v62 = vld [vmem:[%s5833_s1 + $0x5a4] ss:$48 sps:$4 sm:$0xff]   ;;  %v4005_v63 = vld [vmem:[%s5833_s1 + $0x5ac] ss:$48 sps:$4 sm:$0xff]  }
  0x1c   : > { %2701 = vmatpush1.bf16.msra.mxu0 %v3947_v22  ;;  %2783 = vmatpush1.bf16.msra.mxu1 %v3948_v23  ;;  %v4007_v0 = vld [vmem:[%s5833_s1 + $0x5a0] ss:$48 sps:$4 sm:$0xff]   ;;  %v4008_v1 = vld [vmem:[%s5833_s1 + $0x5a8] ss:$48 sps:$4 sm:$0xff]   ;;  %v4012_v2 = vld [vmem:[%s5833_s1 + $0x604] ss:$48 sps:$4 sm:$0xff]  }
  0x1d   : > { %2702 = vmatprep.subr.bf16.mxu0 %v3949_v24  ;;  %2784 = vmatprep.subr.bf16.mxu1 %v3951_v25  ;;  %v4015_v3 = vld [vmem:[%s5833_s1 + $0x60c] ss:$48 sps:$4 sm:$0xff]   ;;  %v4010_v4 = vld [vmem:[%s5833_s1 + $0x600] ss:$48 sps:$4 sm:$0xff]   ;;  %v4013_v6 = vld [vmem:[%s5833_s1 + $0x608] ss:$48 sps:$4 sm:$0xff]  }
  0x1e   : > { %v4019_v7 = vld [vmem:[%s5833_s1 + $0x664] ss:$48 sps:$4 sm:$0xff]   ;;  %v4022_v8 = vld [vmem:[%s5833_s1 + $0x66c] ss:$48 sps:$4 sm:$0xff]   ;;  %v4017_v9 = vld [vmem:[%s5833_s1 + $0x660] ss:$48 sps:$4 sm:$0xff]  }
  0x1f   : > { %v4020_v10 = vld [vmem:[%s5833_s1 + $0x668] ss:$48 sps:$4 sm:$0xff]   ;;  %v4025_v11 = vld [vmem:[%s5833_s1 + $0x6c4] ss:$48 sps:$4 sm:$0xff]   ;;  %v4028_v12 = vld [vmem:[%s5833_s1 + $0x6cc] ss:$48 sps:$4 sm:$0xff]  }
  0x20   : > { %2703 = vmatpush1.bf16.msra.mxu0 %v3953_v26  ;;  %2785 = vmatpush1.bf16.msra.mxu1 %v3954_v27  ;;  %v4023_v13 = vld [vmem:[%s5833_s1 + $0x6c0] ss:$48 sps:$4 sm:$0xff]   ;;  %v4026_v14 = vld [vmem:[%s5833_s1 + $0x6c8] ss:$48 sps:$4 sm:$0xff]   ;;  %v4031_v15 = vld [vmem:[%s5833_s1 + $0x724] ss:$48 sps:$4 sm:$0xff]  }
  0x21   : > { %2704 = vmatprep.subr.bf16.mxu0 %v3955_v28  ;;  %2786 = vmatprep.subr.bf16.mxu1 %v3957_v29  ;;  %v4034_v16 = vld [vmem:[%s5833_s1 + $0x72c] ss:$48 sps:$4 sm:$0xff]   ;;  %v4029_v17 = vld [vmem:[%s5833_s1 + $0x720] ss:$48 sps:$4 sm:$0xff]   ;;  %v4032_v18 = vld [vmem:[%s5833_s1 + $0x728] ss:$48 sps:$4 sm:$0xff]  }
  0x22   : > { %v4037_v19 = vld [vmem:[%s5833_s1 + $0x784] ss:$48 sps:$4 sm:$0xff]   ;;  %v4040_v20 = vld [vmem:[%s5833_s1 + $0x78c] ss:$48 sps:$4 sm:$0xff]   ;;  %v4035_v21 = vld [vmem:[%s5833_s1 + $0x780] ss:$48 sps:$4 sm:$0xff]  }
  0x23   : > { %v4038_v22 = vld [vmem:[%s5833_s1 + $0x788] ss:$48 sps:$4 sm:$0xff]   ;;  %v4043_v23 = vld [vmem:[%s5833_s1 + $0x7e4] ss:$48 sps:$4 sm:$0xff]   ;;  %v4046_v24 = vld [vmem:[%s5833_s1 + $0x7ec] ss:$48 sps:$4 sm:$0xff]  }
  0x24   : > { %2705 = vmatpush1.bf16.msra.mxu0 %v3959_v30  ;;  %2787 = vmatpush1.bf16.msra.mxu1 %v3960_v31  ;;  %v4041_v25 = vld [vmem:[%s5833_s1 + $0x7e0] ss:$48 sps:$4 sm:$0xff]   ;;  %v4044_v26 = vld [vmem:[%s5833_s1 + $0x7e8] ss:$48 sps:$4 sm:$0xff]   ;;  %v4049_v27 = vld [vmem:[%s5833_s1 + $0x844] ss:$48 sps:$4 sm:$0xff]  }
  0x25   : > { %2706 = vmatprep.subr.bf16.mxu0 %v3961_v32  ;;  %2788 = vmatprep.subr.bf16.mxu1 %v3963_v33  ;;  %v4052_v28 = vld [vmem:[%s5833_s1 + $0x84c] ss:$48 sps:$4 sm:$0xff]   ;;  %v4047_v31 = vld [vmem:[%s5833_s1 + $0x840] ss:$48 sps:$4 sm:$0xff]   ;;  %v4050_v32 = vld [vmem:[%s5833_s1 + $0x848] ss:$48 sps:$4 sm:$0xff]  }
  0x26   : > { %v4857_v29 = vld [vmem:[%s4707_s18 + $0x8] sm:$0xff]  ;;  %v4055_v33 = vld [vmem:[%s5833_s1 + $0x8a4] ss:$48 sps:$4 sm:$0xff]  }
  0x27   : > { %v4861_v30 = vcombine.high %v4857_v29, %v4857_v29  ;;  %v4076_v46 = vld [vmem:[%s5833_s1 + $0x9cc] ss:$48 sps:$4 sm:$0xff]  }
  0x28   : > { %2707 = vmatpush1.bf16.msra.mxu0 %v3965_v34  ;;  %2789 = vmatpush1.bf16.msra.mxu1 %v3966_v35  ;;  %v4058_v34 = vld [vmem:[%s5833_s1 + $0x8ac] ss:$48 sps:$4 sm:$0xff]   ;;  %v4053_v35 = vld [vmem:[%s5833_s1 + $0x8a0] ss:$48 sps:$4 sm:$0xff]  }
  0x29   : > { %2708 = vmatprep.subr.bf16.mxu0 %v3967_v36  ;;  %2790 = vmatprep.subr.bf16.mxu1 %v3969_v37  ;;  %v4056_v36 = vld [vmem:[%s5833_s1 + $0x8a8] ss:$48 sps:$4 sm:$0xff]   ;;  %v4061_v37 = vld [vmem:[%s5833_s1 + $0x904] ss:$48 sps:$4 sm:$0xff]  }
  0x2c   : > { %2709 = vmatpush1.bf16.msra.mxu0 %v3971_v38  ;;  %2791 = vmatpush1.bf16.msra.mxu1 %v3972_v39  ;;  %v4064_v38 = vld [vmem:[%s5833_s1 + $0x90c] ss:$48 sps:$4 sm:$0xff]   ;;  %v4059_v39 = vld [vmem:[%s5833_s1 + $0x900] ss:$48 sps:$4 sm:$0xff]  }
  0x2d   : > { %2710 = vmatprep.subr.bf16.mxu0 %v3973_v40  ;;  %2792 = vmatprep.subr.bf16.mxu1 %v3975_v41  ;;  %v4062_v40 = vld [vmem:[%s5833_s1 + $0x908] ss:$48 sps:$4 sm:$0xff]   ;;  %v4067_v41 = vld [vmem:[%s5833_s1 + $0x964] ss:$48 sps:$4 sm:$0xff]  }
  0x30   : > { %2711 = vmatpush1.bf16.msra.mxu0 %v3977_v42  ;;  %2793 = vmatpush1.bf16.msra.mxu1 %v3978_v43  ;;  %v4070_v42 = vld [vmem:[%s5833_s1 + $0x96c] ss:$48 sps:$4 sm:$0xff]   ;;  %v4065_v43 = vld [vmem:[%s5833_s1 + $0x960] ss:$48 sps:$4 sm:$0xff]  }
  0x31   : > { %2712 = vmatprep.subr.bf16.mxu0 %v3979_v44  ;;  %2794 = vmatprep.subr.bf16.mxu1 %v3981_v45  ;;  %v4068_v44 = vld [vmem:[%s5833_s1 + $0x968] ss:$48 sps:$4 sm:$0xff]   ;;  %v4073_v45 = vld [vmem:[%s5833_s1 + $0x9c4] ss:$48 sps:$4 sm:$0xff]  }
  0x34   : > { %2713 = vmatpush1.bf16.msra.mxu0 %v3983_v47  ;;  %2795 = vmatpush1.bf16.msra.mxu1 %v3984_v49  ;;  %v4071_v47 = vld [vmem:[%s5833_s1 + $0x9c0] ss:$48 sps:$4 sm:$0xff]   ;;  %v4074_v49 = vld [vmem:[%s5833_s1 + $0x9c8] ss:$48 sps:$4 sm:$0xff]  }
  0x35   : > { %2714 = vmatprep.subr.bf16.mxu0 %v3985_v50  ;;  %2796 = vmatprep.subr.bf16.mxu1 %v3987_v51  ;;  %v4079_v50 = vld [vmem:[%s5833_s1 + $0xa24] ss:$48 sps:$4 sm:$0xff]   ;;  %v4082_v51 = vld [vmem:[%s5833_s1 + $0xa2c] ss:$48 sps:$4 sm:$0xff]  }
  0x38   : > { %2715 = vmatpush1.bf16.msra.mxu0 %v3989_v52  ;;  %2797 = vmatpush1.bf16.msra.mxu1 %v3990_v53  ;;  %v4077_v52 = vld [vmem:[%s5833_s1 + $0xa20] ss:$48 sps:$4 sm:$0xff]   ;;  %v4080_v53 = vld [vmem:[%s5833_s1 + $0xa28] ss:$48 sps:$4 sm:$0xff]  }
  0x39   : > { %2716 = vmatprep.subr.bf16.mxu0 %v3991_v54  ;;  %2798 = vmatprep.subr.bf16.mxu1 %v3993_v55  ;;  %v4085_v54 = vld [vmem:[%s5833_s1 + $0xa84] ss:$48 sps:$4 sm:$0xff]   ;;  %v4088_v55 = vld [vmem:[%s5833_s1 + $0xa8c] ss:$48 sps:$4 sm:$0xff]  }
  0x3c   : > { %2717 = vmatpush1.bf16.msra.mxu0 %v3995_v56  ;;  %2799 = vmatpush1.bf16.msra.mxu1 %v3996_v57  ;;  %v4083_v56 = vld [vmem:[%s5833_s1 + $0xa80] ss:$48 sps:$4 sm:$0xff]   ;;  %v4086_v57 = vld [vmem:[%s5833_s1 + $0xa88] ss:$48 sps:$4 sm:$0xff]  }
  0x3d   : > { %2718 = vmatprep.subr.bf16.mxu0 %v3997_v58  ;;  %2800 = vmatprep.subr.bf16.mxu1 %v3999_v59  ;;  %v4091_v58 = vld [vmem:[%s5833_s1 + $0xae4] ss:$48 sps:$4 sm:$0xff]   ;;  %v4094_v59 = vld [vmem:[%s5833_s1 + $0xaec] ss:$48 sps:$4 sm:$0xff]  }
  0x40   : > { %2719 = vmatpush1.bf16.msra.mxu0 %v4001_v60  ;;  %2801 = vmatpush1.bf16.msra.mxu1 %v4002_v61  ;;  %v4089_v60 = vld [vmem:[%s5833_s1 + $0xae0] ss:$48 sps:$4 sm:$0xff]   ;;  %v4092_v61 = vld [vmem:[%s5833_s1 + $0xae8] ss:$48 sps:$4 sm:$0xff]  }
  0x41   : > { %2720 = vmatprep.subr.bf16.mxu0 %v4003_v62  ;;  %2802 = vmatprep.subr.bf16.mxu1 %v4005_v63  ;;  %v4097_v62 = vld [vmem:[%s5833_s1 + $0xb44] ss:$48 sps:$4 sm:$0xff]   ;;  %v4100_v63 = vld [vmem:[%s5833_s1 + $0xb4c] ss:$48 sps:$4 sm:$0xff]  }
  0x44   : > { %2721 = vmatpush1.bf16.msra.mxu0 %v4007_v0  ;;  %2803 = vmatpush1.bf16.msra.mxu1 %v4008_v1  ;;  %v4095_v0 = vld [vmem:[%s5833_s1 + $0xb40] ss:$48 sps:$4 sm:$0xff]   ;;  %v4098_v1 = vld [vmem:[%s5833_s1 + $0xb48] ss:$48 sps:$4 sm:$0xff]  }
  0x45   : > { %2731 = vmatprep.subr.bf16.mxu0 %v4012_v2  ;;  %2813 = vmatprep.subr.bf16.mxu1 %v4015_v3  ;;  %v4103_v2 = vld [vmem:[%s5833_s1 + $0xba4] ss:$48 sps:$4 sm:$0xff]   ;;  %v4106_v3 = vld [vmem:[%s5833_s1 + $0xbac] ss:$48 sps:$4 sm:$0xff]  }
  0x47   : > { %2723 = vmatmul.mubr.bf16.vlgmr.msra.gmra.mrb[0].mxu0 %v4783_v5  ;;  %2805 = vmatmul.mubr.bf16.vlgmr.msra.gmra.mrb[0].mxu1 %v4783_v5 }
  0x48   : > { %2732 = vmatpush1.bf16.msra.mxu0 %v4010_v4  ;;  %2814 = vmatpush1.bf16.msra.mxu1 %v4013_v6  ;;  %v4101_v4 = vld [vmem:[%s5833_s1 + $0xba0] ss:$48 sps:$4 sm:$0xff]   ;;  %v4104_v6 = vld [vmem:[%s5833_s1 + $0xba8] ss:$48 sps:$4 sm:$0xff]  }
  0x49   : > { %2733 = vmatprep.subr.bf16.mxu0 %v4019_v7  ;;  %2815 = vmatprep.subr.bf16.mxu1 %v4022_v8  ;;  %v4111_v7 = vld [vmem:[%s5833_s1 + $0x14] ss:$48 sps:$4 sm:$0xff]   ;;  %v4114_v8 = vld [vmem:[%s5833_s1 + $0x1c] ss:$48 sps:$4 sm:$0xff]  }
  0x4a   : > { %2763 = vmatprep.mubr.bf16.mxu0 %v4861_v30  ;;  %2845 = vmatprep.mubr.bf16.mxu1 %v4861_v30 }
  0x4c   : > { %2734 = vmatpush1.bf16.msra.mxu0 %v4017_v9  ;;  %2816 = vmatpush1.bf16.msra.mxu1 %v4020_v10  ;;  %v4987_v9 = vcombine.low %v4857_v29, %v4857_v29  ;;  %v4109_v10 = vld [vmem:[%s5833_s1 + $0x10] ss:$48 sps:$4 sm:$0xff]   ;;  %v4144_v29 = vld [vmem:[%s5833_s1 + $0x1fc] ss:$48 sps:$4 sm:$0xff]  }
  0x4d   : > { %2735 = vmatprep.subr.bf16.mxu0 %v4025_v11  ;;  %2817 = vmatprep.subr.bf16.mxu1 %v4028_v12  ;;  %v4112_v11 = vld [vmem:[%s5833_s1 + $0x18] ss:$48 sps:$4 sm:$0xff]   ;;  %v4117_v12 = vld [vmem:[%s5833_s1 + $0x74] ss:$48 sps:$4 sm:$0xff]  }
  0x50   : > { %2736 = vmatpush1.bf16.msra.mxu0 %v4023_v13  ;;  %2818 = vmatpush1.bf16.msra.mxu1 %v4026_v14  ;;  %v4120_v13 = vld [vmem:[%s5833_s1 + $0x7c] ss:$48 sps:$4 sm:$0xff]   ;;  %v4115_v14 = vld [vmem:[%s5833_s1 + $0x70] ss:$48 sps:$4 sm:$0xff]  }
  0x51   : > { %2737 = vmatprep.subr.bf16.mxu0 %v4031_v15  ;;  %2819 = vmatprep.subr.bf16.mxu1 %v4034_v16  ;;  %v4118_v15 = vld [vmem:[%s5833_s1 + $0x78] ss:$48 sps:$4 sm:$0xff]   ;;  %v4123_v16 = vld [vmem:[%s5833_s1 + $0xd4] ss:$48 sps:$4 sm:$0xff]  }
  0x54   : > { %2738 = vmatpush1.bf16.msra.mxu0 %v4029_v17  ;;  %2820 = vmatpush1.bf16.msra.mxu1 %v4032_v18  ;;  %v4126_v17 = vld [vmem:[%s5833_s1 + $0xdc] ss:$48 sps:$4 sm:$0xff]   ;;  %v4121_v18 = vld [vmem:[%s5833_s1 + $0xd0] ss:$48 sps:$4 sm:$0xff]  }
  0x55   : > { %2739 = vmatprep.subr.bf16.mxu0 %v4037_v19  ;;  %2821 = vmatprep.subr.bf16.mxu1 %v4040_v20  ;;  %v4124_v19 = vld [vmem:[%s5833_s1 + $0xd8] ss:$48 sps:$4 sm:$0xff]   ;;  %v4129_v20 = vld [vmem:[%s5833_s1 + $0x134] ss:$48 sps:$4 sm:$0xff]  }
  0x58   : > { %2740 = vmatpush1.bf16.msra.mxu0 %v4035_v21  ;;  %2822 = vmatpush1.bf16.msra.mxu1 %v4038_v22  ;;  %v4132_v21 = vld [vmem:[%s5833_s1 + $0x13c] ss:$48 sps:$4 sm:$0xff]   ;;  %v4127_v22 = vld [vmem:[%s5833_s1 + $0x130] ss:$48 sps:$4 sm:$0xff]  }
  0x59   : > { %2741 = vmatprep.subr.bf16.mxu0 %v4043_v23  ;;  %2823 = vmatprep.subr.bf16.mxu1 %v4046_v24  ;;  %v4130_v23 = vld [vmem:[%s5833_s1 + $0x138] ss:$48 sps:$4 sm:$0xff]   ;;  %v4135_v24 = vld [vmem:[%s5833_s1 + $0x194] ss:$48 sps:$4 sm:$0xff]  }
  0x5c   : > { %2742 = vmatpush1.bf16.msra.mxu0 %v4041_v25  ;;  %2824 = vmatpush1.bf16.msra.mxu1 %v4044_v26  ;;  %v4138_v25 = vld [vmem:[%s5833_s1 + $0x19c] ss:$48 sps:$4 sm:$0xff]   ;;  %v4133_v26 = vld [vmem:[%s5833_s1 + $0x190] ss:$48 sps:$4 sm:$0xff]  }
  0x5d   : > { %2743 = vmatprep.subr.bf16.mxu0 %v4049_v27  ;;  %2825 = vmatprep.subr.bf16.mxu1 %v4052_v28  ;;  %v4136_v27 = vld [vmem:[%s5833_s1 + $0x198] ss:$48 sps:$4 sm:$0xff]   ;;  %v4141_v28 = vld [vmem:[%s5833_s1 + $0x1f4] ss:$48 sps:$4 sm:$0xff]  }
  0x60   : > { %2744 = vmatpush1.bf16.msra.mxu0 %v4047_v31  ;;  %2826 = vmatpush1.bf16.msra.mxu1 %v4050_v32  ;;  %v4139_v31 = vld [vmem:[%s5833_s1 + $0x1f0] ss:$48 sps:$4 sm:$0xff]   ;;  %v4142_v32 = vld [vmem:[%s5833_s1 + $0x1f8] ss:$48 sps:$4 sm:$0xff]  }
  0x61   : > { %2745 = vmatprep.subr.bf16.mxu0 %v4055_v33  ;;  %2827 = vmatprep.subr.bf16.mxu1 %v4058_v34  ;;  %v4147_v33 = vld [vmem:[%s5833_s1 + $0x254] ss:$48 sps:$4 sm:$0xff]   ;;  %v4150_v34 = vld [vmem:[%s5833_s1 + $0x25c] ss:$48 sps:$4 sm:$0xff]  }
  0x64   : > { %2746 = vmatpush1.bf16.msra.mxu0 %v4053_v35  ;;  %2828 = vmatpush1.bf16.msra.mxu1 %v4056_v36  ;;  %v4145_v35 = vld [vmem:[%s5833_s1 + $0x250] ss:$48 sps:$4 sm:$0xff]   ;;  %v4148_v36 = vld [vmem:[%s5833_s1 + $0x258] ss:$48 sps:$4 sm:$0xff]  }
  0x65   : > { %2747 = vmatprep.subr.bf16.mxu0 %v4061_v37  ;;  %2829 = vmatprep.subr.bf16.mxu1 %v4064_v38  ;;  %v4153_v37 = vld [vmem:[%s5833_s1 + $0x2b4] ss:$48 sps:$4 sm:$0xff]   ;;  %v4156_v38 = vld [vmem:[%s5833_s1 + $0x2bc] ss:$48 sps:$4 sm:$0xff]  }
  0x68   : > { %2748 = vmatpush1.bf16.msra.mxu0 %v4059_v39  ;;  %2830 = vmatpush1.bf16.msra.mxu1 %v4062_v40  ;;  %v4151_v39 = vld [vmem:[%s5833_s1 + $0x2b0] ss:$48 sps:$4 sm:$0xff]   ;;  %v4154_v40 = vld [vmem:[%s5833_s1 + $0x2b8] ss:$48 sps:$4 sm:$0xff]  }
  0x69   : > { %2749 = vmatprep.subr.bf16.mxu0 %v4067_v41  ;;  %2831 = vmatprep.subr.bf16.mxu1 %v4070_v42  ;;  %v4159_v41 = vld [vmem:[%s5833_s1 + $0x314] ss:$48 sps:$4 sm:$0xff]   ;;  %v4162_v42 = vld [vmem:[%s5833_s1 + $0x31c] ss:$48 sps:$4 sm:$0xff]  }
  0x6c   : > { %2750 = vmatpush1.bf16.msra.mxu0 %v4065_v43  ;;  %2832 = vmatpush1.bf16.msra.mxu1 %v4068_v44  ;;  %v4157_v43 = vld [vmem:[%s5833_s1 + $0x310] ss:$48 sps:$4 sm:$0xff]   ;;  %v4160_v44 = vld [vmem:[%s5833_s1 + $0x318] ss:$48 sps:$4 sm:$0xff]  }
  0x6d   : > { %2751 = vmatprep.subr.bf16.mxu0 %v4073_v45  ;;  %2833 = vmatprep.subr.bf16.mxu1 %v4076_v46  ;;  %v4165_v45 = vld [vmem:[%s5833_s1 + $0x374] ss:$48 sps:$4 sm:$0xff]   ;;  %v4168_v46 = vld [vmem:[%s5833_s1 + $0x37c] ss:$48 sps:$4 sm:$0xff]  }
  0x70   : > { %2752 = vmatpush1.bf16.msra.mxu0 %v4071_v47  ;;  %2834 = vmatpush1.bf16.msra.mxu1 %v4074_v49  ;;  %v4163_v47 = vld [vmem:[%s5833_s1 + $0x370] ss:$48 sps:$4 sm:$0xff]   ;;  %v4166_v49 = vld [vmem:[%s5833_s1 + $0x378] ss:$48 sps:$4 sm:$0xff]  }
  0x71   : > { %2753 = vmatprep.subr.bf16.mxu0 %v4079_v50  ;;  %2835 = vmatprep.subr.bf16.mxu1 %v4082_v51  ;;  %v4171_v50 = vld [vmem:[%s5833_s1 + $0x3d4] ss:$48 sps:$4 sm:$0xff]   ;;  %v4174_v51 = vld [vmem:[%s5833_s1 + $0x3dc] ss:$48 sps:$4 sm:$0xff]  }
  0x74   : > { %2754 = vmatpush1.bf16.msra.mxu0 %v4077_v52  ;;  %2836 = vmatpush1.bf16.msra.mxu1 %v4080_v53  ;;  %v4169_v52 = vld [vmem:[%s5833_s1 + $0x3d0] ss:$48 sps:$4 sm:$0xff]   ;;  %v4172_v53 = vld [vmem:[%s5833_s1 + $0x3d8] ss:$48 sps:$4 sm:$0xff]  }
  0x75   : > { %2755 = vmatprep.subr.bf16.mxu0 %v4085_v54  ;;  %2837 = vmatprep.subr.bf16.mxu1 %v4088_v55  ;;  %v4177_v54 = vld [vmem:[%s5833_s1 + $0x434] ss:$48 sps:$4 sm:$0xff]   ;;  %v4180_v55 = vld [vmem:[%s5833_s1 + $0x43c] ss:$48 sps:$4 sm:$0xff]  }
  0x78   : > { %2756 = vmatpush1.bf16.msra.mxu0 %v4083_v56  ;;  %2838 = vmatpush1.bf16.msra.mxu1 %v4086_v57  ;;  %v4175_v56 = vld [vmem:[%s5833_s1 + $0x430] ss:$48 sps:$4 sm:$0xff]   ;;  %v4178_v57 = vld [vmem:[%s5833_s1 + $0x438] ss:$48 sps:$4 sm:$0xff]  }
  0x79   : > { %2757 = vmatprep.subr.bf16.mxu0 %v4091_v58  ;;  %2839 = vmatprep.subr.bf16.mxu1 %v4094_v59  ;;  %v4183_v58 = vld [vmem:[%s5833_s1 + $0x494] ss:$48 sps:$4 sm:$0xff]   ;;  %v4186_v59 = vld [vmem:[%s5833_s1 + $0x49c] ss:$48 sps:$4 sm:$0xff]  }
  0x7c   : > { %2758 = vmatpush1.bf16.msra.mxu0 %v4089_v60  ;;  %2840 = vmatpush1.bf16.msra.mxu1 %v4092_v61  ;;  %v4181_v60 = vld [vmem:[%s5833_s1 + $0x490] ss:$48 sps:$4 sm:$0xff]   ;;  %v4184_v61 = vld [vmem:[%s5833_s1 + $0x498] ss:$48 sps:$4 sm:$0xff]  }
  0x7d   : > { %2759 = vmatprep.subr.bf16.mxu0 %v4097_v62  ;;  %2841 = vmatprep.subr.bf16.mxu1 %v4100_v63  ;;  %v4189_v62 = vld [vmem:[%s5833_s1 + $0x4f4] ss:$48 sps:$4 sm:$0xff]   ;;  %v4192_v63 = vld [vmem:[%s5833_s1 + $0x4fc] ss:$48 sps:$4 sm:$0xff]  }
  0x80   : > { %2760 = vmatpush1.bf16.msra.mxu0 %v4095_v0  ;;  %2842 = vmatpush1.bf16.msra.mxu1 %v4098_v1  ;;  %v4187_v0 = vld [vmem:[%s5833_s1 + $0x4f0] ss:$48 sps:$4 sm:$0xff]   ;;  %v4190_v1 = vld [vmem:[%s5833_s1 + $0x4f8] ss:$48 sps:$4 sm:$0xff]  }
  0x81   : > { %2761 = vmatprep.subr.bf16.mxu0 %v4103_v2  ;;  %2843 = vmatprep.subr.bf16.mxu1 %v4106_v3  ;;  %v4195_v2 = vld [vmem:[%s5833_s1 + $0x554] ss:$48 sps:$4 sm:$0xff]   ;;  %v4198_v3 = vld [vmem:[%s5833_s1 + $0x55c] ss:$48 sps:$4 sm:$0xff]  }
  0x84   : > { %2762 = vmatpush1.bf16.msra.mxu0 %v4101_v4  ;;  %2844 = vmatpush1.bf16.msra.mxu1 %v4104_v6  ;;  %v4193_v4 = vld [vmem:[%s5833_s1 + $0x550] ss:$48 sps:$4 sm:$0xff]   ;;  %v4196_v6 = vld [vmem:[%s5833_s1 + $0x558] ss:$48 sps:$4 sm:$0xff]  }
  0x85   : > { %2854 = vmatprep.subr.bf16.mxu0 %v4111_v7  ;;  %2936 = vmatprep.subr.bf16.mxu1 %v4114_v8  ;;  %v4201_v7 = vld [vmem:[%s5833_s1 + $0x5b4] ss:$48 sps:$4 sm:$0xff]   ;;  %v4204_v8 = vld [vmem:[%s5833_s1 + $0x5bc] ss:$48 sps:$4 sm:$0xff]  }
  0x87   : > { %2764 = vmatmul.mubr.bf16.vlgmr.msra.gmra.mrb[0].mxu0 %v4987_v9  ;;  %2846 = vmatmul.mubr.bf16.vlgmr.msra.gmra.mrb[0].mxu1 %v4987_v9 }
  0x88   : > { %2855 = vmatpush1.bf16.msra.mxu0 %v4109_v10  ;;  %2937 = vmatpush1.bf16.msra.mxu1 %v4112_v11  ;;  %v4199_v10 = vld [vmem:[%s5833_s1 + $0x5b0] ss:$48 sps:$4 sm:$0xff]   ;;  %v4202_v11 = vld [vmem:[%s5833_s1 + $0x5b8] ss:$48 sps:$4 sm:$0xff]  }
  0x89   : > { %2856 = vmatprep.subr.bf16.mxu0 %v4117_v12  ;;  %2938 = vmatprep.subr.bf16.mxu1 %v4120_v13  ;;  %v4207_v12 = vld [vmem:[%s5833_s1 + $0x614] ss:$48 sps:$4 sm:$0xff]   ;;  %v4210_v13 = vld [vmem:[%s5833_s1 + $0x61c] ss:$48 sps:$4 sm:$0xff]  }
  0x8a   : > { %2886 = vmatprep.mubr.bf16.mxu0 %v4719_v48  ;;  %2968 = vmatprep.mubr.bf16.mxu1 %v4719_v48 }
  0x8c   : > { %2857 = vmatpush1.bf16.msra.mxu0 %v4115_v14  ;;  %2939 = vmatpush1.bf16.msra.mxu1 %v4118_v15  ;;  %v4205_v14 = vld [vmem:[%s5833_s1 + $0x610] ss:$48 sps:$4 sm:$0xff]   ;;  %v4208_v15 = vld [vmem:[%s5833_s1 + $0x618] ss:$48 sps:$4 sm:$0xff]  }
  0x8d   : > { %2858 = vmatprep.subr.bf16.mxu0 %v4123_v16  ;;  %2940 = vmatprep.subr.bf16.mxu1 %v4126_v17  ;;  %v4213_v16 = vld [vmem:[%s5833_s1 + $0x674] ss:$48 sps:$4 sm:$0xff]   ;;  %v4216_v17 = vld [vmem:[%s5833_s1 + $0x67c] ss:$48 sps:$4 sm:$0xff]  }
  0x90   : > { %2859 = vmatpush1.bf16.msra.mxu0 %v4121_v18  ;;  %2941 = vmatpush1.bf16.msra.mxu1 %v4124_v19  ;;  %v4211_v18 = vld [vmem:[%s5833_s1 + $0x670] ss:$48 sps:$4 sm:$0xff]   ;;  %v4214_v19 = vld [vmem:[%s5833_s1 + $0x678] ss:$48 sps:$4 sm:$0xff]  }
  0x91   : > { %2860 = vmatprep.subr.bf16.mxu0 %v4129_v20  ;;  %2942 = vmatprep.subr.bf16.mxu1 %v4132_v21  ;;  %v4219_v20 = vld [vmem:[%s5833_s1 + $0x6d4] ss:$48 sps:$4 sm:$0xff]   ;;  %v4222_v21 = vld [vmem:[%s5833_s1 + $0x6dc] ss:$48 sps:$4 sm:$0xff]  }
  0x94   : > { %2861 = vmatpush1.bf16.msra.mxu0 %v4127_v22  ;;  %2943 = vmatpush1.bf16.msra.mxu1 %v4130_v23  ;;  %v4217_v22 = vld [vmem:[%s5833_s1 + $0x6d0] ss:$48 sps:$4 sm:$0xff]   ;;  %v4220_v23 = vld [vmem:[%s5833_s1 + $0x6d8] ss:$48 sps:$4 sm:$0xff]  }
  0x95   : > { %2862 = vmatprep.subr.bf16.mxu0 %v4135_v24  ;;  %2944 = vmatprep.subr.bf16.mxu1 %v4138_v25  ;;  %v4225_v24 = vld [vmem:[%s5833_s1 + $0x734] ss:$48 sps:$4 sm:$0xff]   ;;  %v4228_v25 = vld [vmem:[%s5833_s1 + $0x73c] ss:$48 sps:$4 sm:$0xff]  }
  0x98   : > { %2863 = vmatpush1.bf16.msra.mxu0 %v4133_v26  ;;  %2945 = vmatpush1.bf16.msra.mxu1 %v4136_v27  ;;  %v4223_v26 = vld [vmem:[%s5833_s1 + $0x730] ss:$48 sps:$4 sm:$0xff]   ;;  %v4226_v27 = vld [vmem:[%s5833_s1 + $0x738] ss:$48 sps:$4 sm:$0xff]  }
  0x99   : > { %2864 = vmatprep.subr.bf16.mxu0 %v4141_v28  ;;  %2946 = vmatprep.subr.bf16.mxu1 %v4144_v29  ;;  %v4231_v28 = vld [vmem:[%s5833_s1 + $0x794] ss:$48 sps:$4 sm:$0xff]   ;;  %v4234_v29 = vld [vmem:[%s5833_s1 + $0x79c] ss:$48 sps:$4 sm:$0xff]  }
  0x9c   : > { %2865 = vmatpush1.bf16.msra.mxu0 %v4139_v31  ;;  %2947 = vmatpush1.bf16.msra.mxu1 %v4142_v32  ;;  %v4229_v31 = vld [vmem:[%s5833_s1 + $0x790] ss:$48 sps:$4 sm:$0xff]   ;;  %v4232_v32 = vld [vmem:[%s5833_s1 + $0x798] ss:$48 sps:$4 sm:$0xff]  }
  0x9d   : > { %2866 = vmatprep.subr.bf16.mxu0 %v4147_v33  ;;  %2948 = vmatprep.subr.bf16.mxu1 %v4150_v34  ;;  %v4237_v33 = vld [vmem:[%s5833_s1 + $0x7f4] ss:$48 sps:$4 sm:$0xff]   ;;  %v4240_v34 = vld [vmem:[%s5833_s1 + $0x7fc] ss:$48 sps:$4 sm:$0xff]  }
  0xa0   : > { %2867 = vmatpush1.bf16.msra.mxu0 %v4145_v35  ;;  %2949 = vmatpush1.bf16.msra.mxu1 %v4148_v36  ;;  %v4235_v35 = vld [vmem:[%s5833_s1 + $0x7f0] ss:$48 sps:$4 sm:$0xff]   ;;  %v4238_v36 = vld [vmem:[%s5833_s1 + $0x7f8] ss:$48 sps:$4 sm:$0xff]  }
  0xa1   : > { %2868 = vmatprep.subr.bf16.mxu0 %v4153_v37  ;;  %2950 = vmatprep.subr.bf16.mxu1 %v4156_v38  ;;  %v4243_v37 = vld [vmem:[%s5833_s1 + $0x854] ss:$48 sps:$4 sm:$0xff]   ;;  %v4246_v38 = vld [vmem:[%s5833_s1 + $0x85c] ss:$48 sps:$4 sm:$0xff]  }
  0xa4   : > { %2869 = vmatpush1.bf16.msra.mxu0 %v4151_v39  ;;  %2951 = vmatpush1.bf16.msra.mxu1 %v4154_v40  ;;  %v4241_v39 = vld [vmem:[%s5833_s1 + $0x850] ss:$48 sps:$4 sm:$0xff]   ;;  %v4244_v40 = vld [vmem:[%s5833_s1 + $0x858] ss:$48 sps:$4 sm:$0xff]  }
  0xa5   : > { %2870 = vmatprep.subr.bf16.mxu0 %v4159_v41  ;;  %2952 = vmatprep.subr.bf16.mxu1 %v4162_v42  ;;  %v4249_v41 = vld [vmem:[%s5833_s1 + $0x8b4] ss:$48 sps:$4 sm:$0xff]   ;;  %v4252_v42 = vld [vmem:[%s5833_s1 + $0x8bc] ss:$48 sps:$4 sm:$0xff]  }
  0xa8   : > { %2871 = vmatpush1.bf16.msra.mxu0 %v4157_v43  ;;  %2953 = vmatpush1.bf16.msra.mxu1 %v4160_v44  ;;  %v4247_v43 = vld [vmem:[%s5833_s1 + $0x8b0] ss:$48 sps:$4 sm:$0xff]   ;;  %v4250_v44 = vld [vmem:[%s5833_s1 + $0x8b8] ss:$48 sps:$4 sm:$0xff]  }
  0xa9   : > { %2872 = vmatprep.subr.bf16.mxu0 %v4165_v45  ;;  %2954 = vmatprep.subr.bf16.mxu1 %v4168_v46  ;;  %v4255_v45 = vld [vmem:[%s5833_s1 + $0x914] ss:$48 sps:$4 sm:$0xff]   ;;  %v4258_v46 = vld [vmem:[%s5833_s1 + $0x91c] ss:$48 sps:$4 sm:$0xff]  }
  0xac   : > { %2873 = vmatpush1.bf16.msra.mxu0 %v4163_v47  ;;  %2955 = vmatpush1.bf16.msra.mxu1 %v4166_v49  ;;  %v4253_v47 = vld [vmem:[%s5833_s1 + $0x910] ss:$48 sps:$4 sm:$0xff]   ;;  %v4256_v49 = vld [vmem:[%s5833_s1 + $0x918] ss:$48 sps:$4 sm:$0xff]  }
  0xad   : > { %2874 = vmatprep.subr.bf16.mxu0 %v4171_v50  ;;  %2956 = vmatprep.subr.bf16.mxu1 %v4174_v51  ;;  %v4261_v50 = vld [vmem:[%s5833_s1 + $0x974] ss:$48 sps:$4 sm:$0xff]   ;;  %v4264_v51 = vld [vmem:[%s5833_s1 + $0x97c] ss:$48 sps:$4 sm:$0xff]  }
  0xb0   : > { %2875 = vmatpush1.bf16.msra.mxu0 %v4169_v52  ;;  %2957 = vmatpush1.bf16.msra.mxu1 %v4172_v53  ;;  %v4259_v52 = vld [vmem:[%s5833_s1 + $0x970] ss:$48 sps:$4 sm:$0xff]   ;;  %v4262_v53 = vld [vmem:[%s5833_s1 + $0x978] ss:$48 sps:$4 sm:$0xff]  }
  0xb1   : > { %2876 = vmatprep.subr.bf16.mxu0 %v4177_v54  ;;  %2958 = vmatprep.subr.bf16.mxu1 %v4180_v55  ;;  %v4267_v54 = vld [vmem:[%s5833_s1 + $0x9d4] ss:$48 sps:$4 sm:$0xff]   ;;  %v4270_v55 = vld [vmem:[%s5833_s1 + $0x9dc] ss:$48 sps:$4 sm:$0xff]  }
  0xb4   : > { %2877 = vmatpush1.bf16.msra.mxu0 %v4175_v56  ;;  %2959 = vmatpush1.bf16.msra.mxu1 %v4178_v57  ;;  %v4265_v56 = vld [vmem:[%s5833_s1 + $0x9d0] ss:$48 sps:$4 sm:$0xff]   ;;  %v4268_v57 = vld [vmem:[%s5833_s1 + $0x9d8] ss:$48 sps:$4 sm:$0xff]  }
  0xb5   : > { %2878 = vmatprep.subr.bf16.mxu0 %v4183_v58  ;;  %2960 = vmatprep.subr.bf16.mxu1 %v4186_v59  ;;  %v4273_v58 = vld [vmem:[%s5833_s1 + $0xa34] ss:$48 sps:$4 sm:$0xff]   ;;  %v4276_v59 = vld [vmem:[%s5833_s1 + $0xa3c] ss:$48 sps:$4 sm:$0xff]  }
  0xb8   : > { %2879 = vmatpush1.bf16.msra.mxu0 %v4181_v60  ;;  %2961 = vmatpush1.bf16.msra.mxu1 %v4184_v61  ;;  %v4271_v60 = vld [vmem:[%s5833_s1 + $0xa30] ss:$48 sps:$4 sm:$0xff]   ;;  %v4274_v61 = vld [vmem:[%s5833_s1 + $0xa38] ss:$48 sps:$4 sm:$0xff]  }
  0xb9   : > { %2880 = vmatprep.subr.bf16.mxu0 %v4189_v62  ;;  %2962 = vmatprep.subr.bf16.mxu1 %v4192_v63  ;;  %v4279_v62 = vld [vmem:[%s5833_s1 + $0xa94] ss:$48 sps:$4 sm:$0xff]   ;;  %v4282_v63 = vld [vmem:[%s5833_s1 + $0xa9c] ss:$48 sps:$4 sm:$0xff]  }
  0xbc   : > { %2881 = vmatpush1.bf16.msra.mxu0 %v4187_v0  ;;  %2963 = vmatpush1.bf16.msra.mxu1 %v4190_v1  ;;  %v4277_v0 = vld [vmem:[%s5833_s1 + $0xa90] ss:$48 sps:$4 sm:$0xff]   ;;  %v4280_v1 = vld [vmem:[%s5833_s1 + $0xa98] ss:$48 sps:$4 sm:$0xff]  }
  0xbd   : > { %2882 = vmatprep.subr.bf16.mxu0 %v4195_v2  ;;  %2964 = vmatprep.subr.bf16.mxu1 %v4198_v3  ;;  %v4285_v2 = vld [vmem:[%s5833_s1 + $0xaf4] ss:$48 sps:$4 sm:$0xff]   ;;  %v4288_v3 = vld [vmem:[%s5833_s1 + $0xafc] ss:$48 sps:$4 sm:$0xff]  }
  0xc0   : > { %2883 = vmatpush1.bf16.msra.mxu0 %v4193_v4  ;;  %2965 = vmatpush1.bf16.msra.mxu1 %v4196_v6  ;;  %v4283_v4 = vld [vmem:[%s5833_s1 + $0xaf0] ss:$48 sps:$4 sm:$0xff]   ;;  %v4286_v6 = vld [vmem:[%s5833_s1 + $0xaf8] ss:$48 sps:$4 sm:$0xff]  }
  0xc1   : > { %2884 = vmatprep.subr.bf16.mxu0 %v4201_v7  ;;  %2966 = vmatprep.subr.bf16.mxu1 %v4204_v8  ;;  %v4291_v7 = vld [vmem:[%s5833_s1 + $0xb54] ss:$48 sps:$4 sm:$0xff]   ;;  %v4294_v8 = vld [vmem:[%s5833_s1 + $0xb5c] ss:$48 sps:$4 sm:$0xff]  }
  0xc4   : > { %2885 = vmatpush1.bf16.msra.mxu0 %v4199_v10  ;;  %2967 = vmatpush1.bf16.msra.mxu1 %v4202_v11  ;;  %v4289_v10 = vld [vmem:[%s5833_s1 + $0xb50] ss:$48 sps:$4 sm:$0xff]   ;;  %v4292_v11 = vld [vmem:[%s5833_s1 + $0xb58] ss:$48 sps:$4 sm:$0xff]  }
  0xc5   : > { %2895 = vmatprep.subr.bf16.mxu0 %v4207_v12  ;;  %2977 = vmatprep.subr.bf16.mxu1 %v4210_v13  ;;  %v4297_v12 = vld [vmem:[%s5833_s1 + $0xbb4] ss:$48 sps:$4 sm:$0xff]   ;;  %v4300_v13 = vld [vmem:[%s5833_s1 + $0xbbc] ss:$48 sps:$4 sm:$0xff]  }
  0xc7   : > { %2887 = vmatmul.mubr.bf16.vlgmr.msra.gmra.mrb[4].mxu0 %v4783_v5  ;;  %2969 = vmatmul.mubr.bf16.vlgmr.msra.gmra.mrb[4].mxu1 %v4783_v5 }
  0xc8   : > { %2896 = vmatpush1.bf16.msra.mxu0 %v4205_v14  ;;  %2978 = vmatpush1.bf16.msra.mxu1 %v4208_v15  ;;  %v4295_v14 = vld [vmem:[%s5833_s1 + $0xbb0] ss:$48 sps:$4 sm:$0xff]   ;;  %v4298_v15 = vld [vmem:[%s5833_s1 + $0xbb8] ss:$48 sps:$4 sm:$0xff]  }
  0xc9   : > { %2897 = vmatprep.subr.bf16.mxu0 %v4213_v16  ;;  %2979 = vmatprep.subr.bf16.mxu1 %v4216_v17  ;;  %v4303_v16 = vld [vmem:[%s5833_s1 + $0x24] ss:$48 sps:$4 sm:$0xff]   ;;  %v4306_v17 = vld [vmem:[%s5833_s1 + $0x2c] ss:$48 sps:$4 sm:$0xff]  }
  0xca   : > { %2927 = vmatprep.mubr.bf16.mxu0 %v4861_v30  ;;  %3009 = vmatprep.mubr.bf16.mxu1 %v4861_v30 }
  0xcc   : > { %2898 = vmatpush1.bf16.msra.mxu0 %v4211_v18  ;;  %2980 = vmatpush1.bf16.msra.mxu1 %v4214_v19  ;;  %v4301_v18 = vld [vmem:[%s5833_s1 + $0x20] ss:$48 sps:$4 sm:$0xff]   ;;  %v4304_v19 = vld [vmem:[%s5833_s1 + $0x28] ss:$48 sps:$4 sm:$0xff]  }
  0xcd   : > { %2899 = vmatprep.subr.bf16.mxu0 %v4219_v20  ;;  %2981 = vmatprep.subr.bf16.mxu1 %v4222_v21  ;;  %v4309_v20 = vld [vmem:[%s5833_s1 + $0x84] ss:$48 sps:$4 sm:$0xff]   ;;  %v4312_v21 = vld [vmem:[%s5833_s1 + $0x8c] ss:$48 sps:$4 sm:$0xff]  }
  0xd0   : > { %2900 = vmatpush1.bf16.msra.mxu0 %v4217_v22  ;;  %2982 = vmatpush1.bf16.msra.mxu1 %v4220_v23  ;;  %v4307_v22 = vld [vmem:[%s5833_s1 + $0x80] ss:$48 sps:$4 sm:$0xff]   ;;  %v4310_v23 = vld [vmem:[%s5833_s1 + $0x88] ss:$48 sps:$4 sm:$0xff]  }
  0xd1   : > { %2901 = vmatprep.subr.bf16.mxu0 %v4225_v24  ;;  %2983 = vmatprep.subr.bf16.mxu1 %v4228_v25  ;;  %v4315_v24 = vld [vmem:[%s5833_s1 + $0xe4] ss:$48 sps:$4 sm:$0xff]   ;;  %v4318_v25 = vld [vmem:[%s5833_s1 + $0xec] ss:$48 sps:$4 sm:$0xff]  }
  0xd4   : > { %2902 = vmatpush1.bf16.msra.mxu0 %v4223_v26  ;;  %2984 = vmatpush1.bf16.msra.mxu1 %v4226_v27  ;;  %v4313_v26 = vld [vmem:[%s5833_s1 + $0xe0] ss:$48 sps:$4 sm:$0xff]   ;;  %v4316_v27 = vld [vmem:[%s5833_s1 + $0xe8] ss:$48 sps:$4 sm:$0xff]  }
  0xd5   : > { %2903 = vmatprep.subr.bf16.mxu0 %v4231_v28  ;;  %2985 = vmatprep.subr.bf16.mxu1 %v4234_v29  ;;  %v4321_v28 = vld [vmem:[%s5833_s1 + $0x144] ss:$48 sps:$4 sm:$0xff]   ;;  %v4319_v29 = vld [vmem:[%s5833_s1 + $0x140] ss:$48 sps:$4 sm:$0xff]  }
  0xd8   : > { %2904 = vmatpush1.bf16.msra.mxu0 %v4229_v31  ;;  %2986 = vmatpush1.bf16.msra.mxu1 %v4232_v32  ;;  %v4322_v31 = vld [vmem:[%s5833_s1 + $0x148] ss:$48 sps:$4 sm:$0xff]   ;;  %v4327_v32 = vld [vmem:[%s5833_s1 + $0x1a4] ss:$48 sps:$4 sm:$0xff]  }
  0xd9   : > { %2905 = vmatprep.subr.bf16.mxu0 %v4237_v33  ;;  %2987 = vmatprep.subr.bf16.mxu1 %v4240_v34  ;;  %v4330_v33 = vld [vmem:[%s5833_s1 + $0x1ac] ss:$48 sps:$4 sm:$0xff]   ;;  %v4325_v34 = vld [vmem:[%s5833_s1 + $0x1a0] ss:$48 sps:$4 sm:$0xff]  }
  0xdc   : > { %2906 = vmatpush1.bf16.msra.mxu0 %v4235_v35  ;;  %2988 = vmatpush1.bf16.msra.mxu1 %v4238_v36  ;;  %v4328_v35 = vld [vmem:[%s5833_s1 + $0x1a8] ss:$48 sps:$4 sm:$0xff]   ;;  %v4333_v36 = vld [vmem:[%s5833_s1 + $0x204] ss:$48 sps:$4 sm:$0xff]  }
  0xdd   : > { %2907 = vmatprep.subr.bf16.mxu0 %v4243_v37  ;;  %2989 = vmatprep.subr.bf16.mxu1 %v4246_v38  ;;  %v4336_v37 = vld [vmem:[%s5833_s1 + $0x20c] ss:$48 sps:$4 sm:$0xff]   ;;  %v4331_v38 = vld [vmem:[%s5833_s1 + $0x200] ss:$48 sps:$4 sm:$0xff]  }
  0xe0   : > { %2908 = vmatpush1.bf16.msra.mxu0 %v4241_v39  ;;  %2990 = vmatpush1.bf16.msra.mxu1 %v4244_v40  ;;  %v4334_v39 = vld [vmem:[%s5833_s1 + $0x208] ss:$48 sps:$4 sm:$0xff]   ;;  %v4339_v40 = vld [vmem:[%s5833_s1 + $0x264] ss:$48 sps:$4 sm:$0xff]  }
  0xe1   : > { %2909 = vmatprep.subr.bf16.mxu0 %v4249_v41  ;;  %2991 = vmatprep.subr.bf16.mxu1 %v4252_v42  ;;  %v4342_v41 = vld [vmem:[%s5833_s1 + $0x26c] ss:$48 sps:$4 sm:$0xff]   ;;  %v4337_v42 = vld [vmem:[%s5833_s1 + $0x260] ss:$48 sps:$4 sm:$0xff]  }
  0xe4   : > { %2910 = vmatpush1.bf16.msra.mxu0 %v4247_v43  ;;  %2992 = vmatpush1.bf16.msra.mxu1 %v4250_v44  ;;  %v4340_v43 = vld [vmem:[%s5833_s1 + $0x268] ss:$48 sps:$4 sm:$0xff]   ;;  %v4345_v44 = vld [vmem:[%s5833_s1 + $0x2c4] ss:$48 sps:$4 sm:$0xff]  }
  0xe5   : > { %2911 = vmatprep.subr.bf16.mxu0 %v4255_v45  ;;  %2993 = vmatprep.subr.bf16.mxu1 %v4258_v46  ;;  %v4348_v45 = vld [vmem:[%s5833_s1 + $0x2cc] ss:$48 sps:$4 sm:$0xff]   ;;  %v4343_v46 = vld [vmem:[%s5833_s1 + $0x2c0] ss:$48 sps:$4 sm:$0xff]  }
  0xe8   : > { %2912 = vmatpush1.bf16.msra.mxu0 %v4253_v47  ;;  %2994 = vmatpush1.bf16.msra.mxu1 %v4256_v49  ;;  %v4346_v47 = vld [vmem:[%s5833_s1 + $0x2c8] ss:$48 sps:$4 sm:$0xff]   ;;  %v4351_v49 = vld [vmem:[%s5833_s1 + $0x324] ss:$48 sps:$4 sm:$0xff]  }
  0xe9   : > { %2913 = vmatprep.subr.bf16.mxu0 %v4261_v50  ;;  %2995 = vmatprep.subr.bf16.mxu1 %v4264_v51  ;;  %v4354_v50 = vld [vmem:[%s5833_s1 + $0x32c] ss:$48 sps:$4 sm:$0xff]   ;;  %v4349_v51 = vld [vmem:[%s5833_s1 + $0x320] ss:$48 sps:$4 sm:$0xff]  }
  0xec   : > { %2914 = vmatpush1.bf16.msra.mxu0 %v4259_v52  ;;  %2996 = vmatpush1.bf16.msra.mxu1 %v4262_v53  ;;  %v4352_v52 = vld [vmem:[%s5833_s1 + $0x328] ss:$48 sps:$4 sm:$0xff]   ;;  %v4357_v53 = vld [vmem:[%s5833_s1 + $0x384] ss:$48 sps:$4 sm:$0xff]  }
  0xed   : > { %2915 = vmatprep.subr.bf16.mxu0 %v4267_v54  ;;  %2997 = vmatprep.subr.bf16.mxu1 %v4270_v55  ;;  %v4360_v54 = vld [vmem:[%s5833_s1 + $0x38c] ss:$48 sps:$4 sm:$0xff]   ;;  %v4355_v55 = vld [vmem:[%s5833_s1 + $0x380] ss:$48 sps:$4 sm:$0xff]  }
  0xf0   : > { %2916 = vmatpush1.bf16.msra.mxu0 %v4265_v56  ;;  %2998 = vmatpush1.bf16.msra.mxu1 %v4268_v57  ;;  %v4358_v56 = vld [vmem:[%s5833_s1 + $0x388] ss:$48 sps:$4 sm:$0xff]   ;;  %v4363_v57 = vld [vmem:[%s5833_s1 + $0x3e4] ss:$48 sps:$4 sm:$0xff]  }
  0xf1   : > { %2917 = vmatprep.subr.bf16.mxu0 %v4273_v58  ;;  %2999 = vmatprep.subr.bf16.mxu1 %v4276_v59  ;;  %v4366_v58 = vld [vmem:[%s5833_s1 + $0x3ec] ss:$48 sps:$4 sm:$0xff]   ;;  %v4361_v59 = vld [vmem:[%s5833_s1 + $0x3e0] ss:$48 sps:$4 sm:$0xff]  }
  0xf4   : > { %2918 = vmatpush1.bf16.msra.mxu0 %v4271_v60  ;;  %3000 = vmatpush1.bf16.msra.mxu1 %v4274_v61  ;;  %v4364_v60 = vld [vmem:[%s5833_s1 + $0x3e8] ss:$48 sps:$4 sm:$0xff]   ;;  %v4369_v61 = vld [vmem:[%s5833_s1 + $0x444] ss:$48 sps:$4 sm:$0xff]  }
  0xf5   : > { %2919 = vmatprep.subr.bf16.mxu0 %v4279_v62  ;;  %3001 = vmatprep.subr.bf16.mxu1 %v4282_v63  ;;  %v4372_v62 = vld [vmem:[%s5833_s1 + $0x44c] ss:$48 sps:$4 sm:$0xff]   ;;  %v4367_v63 = vld [vmem:[%s5833_s1 + $0x440] ss:$48 sps:$4 sm:$0xff]  }
  0xf8   : > { %2920 = vmatpush1.bf16.msra.mxu0 %v4277_v0  ;;  %3002 = vmatpush1.bf16.msra.mxu1 %v4280_v1  ;;  %v4370_v0 = vld [vmem:[%s5833_s1 + $0x448] ss:$48 sps:$4 sm:$0xff]   ;;  %v4375_v1 = vld [vmem:[%s5833_s1 + $0x4a4] ss:$48 sps:$4 sm:$0xff]  }
  0xf9   : > { %2921 = vmatprep.subr.bf16.mxu0 %v4285_v2  ;;  %3003 = vmatprep.subr.bf16.mxu1 %v4288_v3  ;;  %v4378_v2 = vld [vmem:[%s5833_s1 + $0x4ac] ss:$48 sps:$4 sm:$0xff]   ;;  %v4373_v3 = vld [vmem:[%s5833_s1 + $0x4a0] ss:$48 sps:$4 sm:$0xff]  }
  0xfc   : > { %2922 = vmatpush1.bf16.msra.mxu0 %v4283_v4  ;;  %3004 = vmatpush1.bf16.msra.mxu1 %v4286_v6  ;;  %v4376_v4 = vld [vmem:[%s5833_s1 + $0x4a8] ss:$48 sps:$4 sm:$0xff]   ;;  %v4381_v6 = vld [vmem:[%s5833_s1 + $0x504] ss:$48 sps:$4 sm:$0xff]  }
  0xfd   : > { %2923 = vmatprep.subr.bf16.mxu0 %v4291_v7  ;;  %3005 = vmatprep.subr.bf16.mxu1 %v4294_v8  ;;  %v4384_v7 = vld [vmem:[%s5833_s1 + $0x50c] ss:$48 sps:$4 sm:$0xff]   ;;  %v4379_v8 = vld [vmem:[%s5833_s1 + $0x500] ss:$48 sps:$4 sm:$0xff]  }
 0x100   : > { %2924 = vmatpush1.bf16.msra.mxu0 %v4289_v10  ;;  %3006 = vmatpush1.bf16.msra.mxu1 %v4292_v11  ;;  %v4382_v10 = vld [vmem:[%s5833_s1 + $0x508] ss:$48 sps:$4 sm:$0xff]   ;;  %v4387_v11 = vld [vmem:[%s5833_s1 + $0x564] ss:$48 sps:$4 sm:$0xff]  }
 0x101   : > { %2925 = vmatprep.subr.bf16.mxu0 %v4297_v12  ;;  %3007 = vmatprep.subr.bf16.mxu1 %v4300_v13  ;;  %v4390_v12 = vld [vmem:[%s5833_s1 + $0x56c] ss:$48 sps:$4 sm:$0xff]   ;;  %v4385_v13 = vld [vmem:[%s5833_s1 + $0x560] ss:$48 sps:$4 sm:$0xff]  }
 0x104   : > { %2926 = vmatpush1.bf16.msra.mxu0 %v4295_v14  ;;  %3008 = vmatpush1.bf16.msra.mxu1 %v4298_v15  ;;  %v4388_v14 = vld [vmem:[%s5833_s1 + $0x568] ss:$48 sps:$4 sm:$0xff]   ;;  %v4393_v15 = vld [vmem:[%s5833_s1 + $0x5c4] ss:$48 sps:$4 sm:$0xff]  }
 0x105   : > { %3018 = vmatprep.subr.bf16.mxu0 %v4303_v16  ;;  %3100 = vmatprep.subr.bf16.mxu1 %v4306_v17  ;;  %v4396_v16 = vld [vmem:[%s5833_s1 + $0x5cc] ss:$48 sps:$4 sm:$0xff]   ;;  %v4391_v17 = vld [vmem:[%s5833_s1 + $0x5c0] ss:$48 sps:$4 sm:$0xff]  }
 0x107   : > { %2928 = vmatmul.mubr.bf16.vlgmr.msra.gmra.mrb[4].mxu0 %v4987_v9  ;;  %3010 = vmatmul.mubr.bf16.vlgmr.msra.gmra.mrb[4].mxu1 %v4987_v9 }
 0x108   : > { %3019 = vmatpush1.bf16.msra.mxu0 %v4301_v18  ;;  %3101 = vmatpush1.bf16.msra.mxu1 %v4304_v19  ;;  %v4394_v18 = vld [vmem:[%s5833_s1 + $0x5c8] ss:$48 sps:$4 sm:$0xff]   ;;  %v4399_v19 = vld [vmem:[%s5833_s1 + $0x624] ss:$48 sps:$4 sm:$0xff]  }
 0x109   : > { %3020 = vmatprep.subr.bf16.mxu0 %v4309_v20  ;;  %3102 = vmatprep.subr.bf16.mxu1 %v4312_v21  ;;  %v4402_v20 = vld [vmem:[%s5833_s1 + $0x62c] ss:$48 sps:$4 sm:$0xff]   ;;  %v4397_v21 = vld [vmem:[%s5833_s1 + $0x620] ss:$48 sps:$4 sm:$0xff]  }
 0x10a   : > { %3050 = vmatprep.mubr.bf16.mxu0 %v4719_v48  ;;  %3132 = vmatprep.mubr.bf16.mxu1 %v4719_v48  ;;  %v4324_v48 = vld [vmem:[%s5833_s1 + $0x14c] ss:$48 sps:$4 sm:$0xff]  }
 0x10c   : > { %3021 = vmatpush1.bf16.msra.mxu0 %v4307_v22  ;;  %3103 = vmatpush1.bf16.msra.mxu1 %v4310_v23  ;;  %v4400_v22 = vld [vmem:[%s5833_s1 + $0x628] ss:$48 sps:$4 sm:$0xff]   ;;  %v4405_v23 = vld [vmem:[%s5833_s1 + $0x684] ss:$48 sps:$4 sm:$0xff]  }
 0x10d   : > { %3022 = vmatprep.subr.bf16.mxu0 %v4315_v24  ;;  %3104 = vmatprep.subr.bf16.mxu1 %v4318_v25  ;;  %v4408_v24 = vld [vmem:[%s5833_s1 + $0x68c] ss:$48 sps:$4 sm:$0xff]   ;;  %v4403_v25 = vld [vmem:[%s5833_s1 + $0x680] ss:$48 sps:$4 sm:$0xff]  }
 0x110   : > { %3023 = vmatpush1.bf16.msra.mxu0 %v4313_v26  ;;  %3105 = vmatpush1.bf16.msra.mxu1 %v4316_v27  ;;  %v4406_v26 = vld [vmem:[%s5833_s1 + $0x688] ss:$48 sps:$4 sm:$0xff]   ;;  %v4411_v27 = vld [vmem:[%s5833_s1 + $0x6e4] ss:$48 sps:$4 sm:$0xff]  }
 0x111   : > { %3024 = vmatprep.subr.bf16.mxu0 %v4321_v28  ;;  %3106 = vmatprep.subr.bf16.mxu1 %v4324_v48  ;;  %v696_v28 = vlaneseq  ;;  %v4409_v48 = vld [vmem:[%s5833_s1 + $0x6e0] ss:$48 sps:$4 sm:$0xff]  }
 0x114   : > { %3025 = vmatpush1.bf16.msra.mxu0 %v4319_v29  ;;  %3107 = vmatpush1.bf16.msra.mxu1 %v4322_v31  ;;  %v4412_v29 = vld [vmem:[%s5833_s1 + $0x6e8] ss:$48 sps:$4 sm:$0xff]   ;;  %v4417_v31 = vld [vmem:[%s5833_s1 + $0x744] ss:$48 sps:$4 sm:$0xff]  }
 0x115   : > { %3026 = vmatprep.subr.bf16.mxu0 %v4327_v32  ;;  %3108 = vmatprep.subr.bf16.mxu1 %v4330_v33  ;;  %v5617_v32 = vshrl.u32 %v696_v28, 7  ;;  %v4415_v33 = vld [vmem:[%s5833_s1 + $0x740] ss:$48 sps:$4 sm:$0xff]   ;;  %v4471_v28 = vld [vmem:[%s5833_s1 + $0xaa4] ss:$48 sps:$4 sm:$0xff]  }
 0x118   : > { %3027 = vmatpush1.bf16.msra.mxu0 %v4325_v34  ;;  %3109 = vmatpush1.bf16.msra.mxu1 %v4328_v35  ;;  %v4418_v34 = vld [vmem:[%s5833_s1 + $0x748] ss:$48 sps:$4 sm:$0xff]   ;;  %v4423_v35 = vld [vmem:[%s5833_s1 + $0x7a4] ss:$48 sps:$4 sm:$0xff]  }
 0x119   : > { %3028 = vmatprep.subr.bf16.mxu0 %v4333_v36  ;;  %3110 = vmatprep.subr.bf16.mxu1 %v4336_v37  ;;  %v4426_v36 = vld [vmem:[%s5833_s1 + $0x7ac] ss:$48 sps:$4 sm:$0xff]   ;;  %v698_v37 = vsub.s32 0, %v5617_v32 }
 0x11c   : > { %3029 = vmatpush1.bf16.msra.mxu0 %v4331_v38  ;;  %3111 = vmatpush1.bf16.msra.mxu1 %v4334_v39  ;;  %v706_v38 = vsub.s32 2, %v5617_v32  ;;  %v702_v39 = vsub.s32 1, %v5617_v32 }
 0x11d   : > { %3030 = vmatprep.subr.bf16.mxu0 %v4339_v40  ;;  %3112 = vmatprep.subr.bf16.mxu1 %v4342_v41  ;;  %v4421_v40 = vld [vmem:[%s5833_s1 + $0x7a0] ss:$48 sps:$4 sm:$0xff]   ;;  %v4424_v41 = vld [vmem:[%s5833_s1 + $0x7a8] ss:$48 sps:$4 sm:$0xff]  }
 0x120   : > { %3031 = vmatpush1.bf16.msra.mxu0 %v4337_v42  ;;  %3113 = vmatpush1.bf16.msra.mxu1 %v4340_v43  ;;  %v5643_v42 = vld [vmem:[%s5834_s2] sm:$0xff]  ;;  %v710_v43 = vsub.s32 3, %v5617_v32 }
 0x121   : > { %3032 = vmatprep.subr.bf16.mxu0 %v4345_v44  ;;  %3114 = vmatprep.subr.bf16.mxu1 %v4348_v45  ;;  %v4429_v44 = vld [vmem:[%s5833_s1 + $0x804] ss:$48 sps:$4 sm:$0xff]   ;;  %v4432_v45 = vld [vmem:[%s5833_s1 + $0x80c] ss:$48 sps:$4 sm:$0xff]  }
 0x124   : > { %3033 = vmatpush1.bf16.msra.mxu0 %v4343_v46  ;;  %3115 = vmatpush1.bf16.msra.mxu1 %v4346_v47  ;;  %v699_v46 = vrot.slane %v5643_v42, %v698_v37  ;;  %v707_v47 = vrot.slane %v5643_v42, %v706_v38 }
 0x125   : > { %3034 = vmatprep.subr.bf16.mxu0 %v4351_v49  ;;  %3116 = vmatprep.subr.bf16.mxu1 %v4354_v50  ;;  %v703_v49 = vrot.slane %v5643_v42, %v702_v39  ;;  %v711_v50 = vrot.slane %v5643_v42, %v710_v43 }
 0x128   : > { %3035 = vmatpush1.bf16.msra.mxu0 %v4349_v51  ;;  %3117 = vmatpush1.bf16.msra.mxu1 %v4352_v52  ;;  %v4427_v51 = vld [vmem:[%s5833_s1 + $0x800] ss:$48 sps:$4 sm:$0xff]   ;;  %v4430_v52 = vld [vmem:[%s5833_s1 + $0x808] ss:$48 sps:$4 sm:$0xff]  }
 0x129   : > { %3036 = vmatprep.subr.bf16.mxu0 %v4357_v53  ;;  %3118 = vmatprep.subr.bf16.mxu1 %v4360_v54  ;;  %v4435_v53 = vld [vmem:[%s5833_s1 + $0x864] ss:$48 sps:$4 sm:$0xff]   ;;  %v4438_v54 = vld [vmem:[%s5833_s1 + $0x86c] ss:$48 sps:$4 sm:$0xff]  }
 0x12c   : > { %3037 = vmatpush1.bf16.msra.mxu0 %v4355_v55  ;;  %3119 = vmatpush1.bf16.msra.mxu1 %v4358_v56 }
 0x12d   : > { %3038 = vmatprep.subr.bf16.mxu0 %v4363_v57  ;;  %3120 = vmatprep.subr.bf16.mxu1 %v4366_v58 }
 0x130   : > { %3039 = vmatpush1.bf16.msra.mxu0 %v4361_v59  ;;  %3121 = vmatpush1.bf16.msra.mxu1 %v4364_v60 }
 0x131   : > { %3040 = vmatprep.subr.bf16.mxu0 %v4369_v61  ;;  %3122 = vmatprep.subr.bf16.mxu1 %v4372_v62 }
 0x134   : > { %3041 = vmatpush1.bf16.msra.mxu0 %v4367_v63  ;;  %3123 = vmatpush1.bf16.msra.mxu1 %v4370_v0 }
 0x135   : > { %3042 = vmatprep.subr.bf16.mxu0 %v4375_v1  ;;  %3124 = vmatprep.subr.bf16.mxu1 %v4378_v2  ;;  %v4433_v1 = vld [vmem:[%s5833_s1 + $0x860] ss:$48 sps:$4 sm:$0xff]   ;;  %v4436_v2 = vld [vmem:[%s5833_s1 + $0x868] ss:$48 sps:$4 sm:$0xff]  }
 0x138   : > { %3043 = vmatpush1.bf16.msra.mxu0 %v4373_v3  ;;  %3125 = vmatpush1.bf16.msra.mxu1 %v4376_v4 }
 0x139   : > { %3044 = vmatprep.subr.bf16.mxu0 %v4381_v6  ;;  %3126 = vmatprep.subr.bf16.mxu1 %v4384_v7  ;;  %v4441_v6 = vld [vmem:[%s5833_s1 + $0x8c4] ss:$48 sps:$4 sm:$0xff]   ;;  %v4444_v7 = vld [vmem:[%s5833_s1 + $0x8cc] ss:$48 sps:$4 sm:$0xff]  }
 0x13c   : > { %3045 = vmatpush1.bf16.msra.mxu0 %v4379_v8  ;;  %3127 = vmatpush1.bf16.msra.mxu1 %v4382_v10 }
 0x13d   : > { %3046 = vmatprep.subr.bf16.mxu0 %v4387_v11  ;;  %3128 = vmatprep.subr.bf16.mxu1 %v4390_v12  ;;  %v4439_v11 = vld [vmem:[%s5833_s1 + $0x8c0] ss:$48 sps:$4 sm:$0xff]   ;;  %v4442_v12 = vld [vmem:[%s5833_s1 + $0x8c8] ss:$48 sps:$4 sm:$0xff]  }
 0x140   : > { %3047 = vmatpush1.bf16.msra.mxu0 %v4385_v13  ;;  %3129 = vmatpush1.bf16.msra.mxu1 %v4388_v14  ;;  %v4447_v13 = vld [vmem:[%s5833_s1 + $0x924] ss:$48 sps:$4 sm:$0xff]   ;;  %v4450_v14 = vld [vmem:[%s5833_s1 + $0x92c] ss:$48 sps:$4 sm:$0xff]  }
 0x141   : > { %3048 = vmatprep.subr.bf16.mxu0 %v4393_v15  ;;  %3130 = vmatprep.subr.bf16.mxu1 %v4396_v16  ;;  %v4445_v15 = vld [vmem:[%s5833_s1 + $0x920] ss:$48 sps:$4 sm:$0xff]   ;;  %v4448_v16 = vld [vmem:[%s5833_s1 + $0x928] ss:$48 sps:$4 sm:$0xff]  }
 0x144   : > { %3049 = vmatpush1.bf16.msra.mxu0 %v4391_v17  ;;  %3131 = vmatpush1.bf16.msra.mxu1 %v4394_v18  ;;  %v4453_v17 = vld [vmem:[%s5833_s1 + $0x984] ss:$48 sps:$4 sm:$0xff]   ;;  %v4456_v18 = vld [vmem:[%s5833_s1 + $0x98c] ss:$48 sps:$4 sm:$0xff]  }
 0x145   : > { %3059 = vmatprep.subr.bf16.mxu0 %v4399_v19  ;;  %3141 = vmatprep.subr.bf16.mxu1 %v4402_v20  ;;  %v4451_v19 = vld [vmem:[%s5833_s1 + $0x980] ss:$48 sps:$4 sm:$0xff]   ;;  %v4454_v20 = vld [vmem:[%s5833_s1 + $0x988] ss:$48 sps:$4 sm:$0xff]  }
 0x147   : > { %3051 = vmatmul.mubr.bf16.vlgmr.msra.gmra.mrb[8].mxu0 %v4783_v5  ;;  %3133 = vmatmul.mubr.bf16.vlgmr.msra.gmra.mrb[8].mxu1 %v4783_v5  ;;  %v4414_v5 = vld [vmem:[%s5833_s1 + $0x6ec] ss:$48 sps:$4 sm:$0xff]  }
 0x148   : > { %3060 = vmatpush1.bf16.msra.mxu0 %v4397_v21  ;;  %3142 = vmatpush1.bf16.msra.mxu1 %v4400_v22  ;;  %v4459_v21 = vld [vmem:[%s5833_s1 + $0x9e4] ss:$48 sps:$4 sm:$0xff]   ;;  %v4462_v22 = vld [vmem:[%s5833_s1 + $0x9ec] ss:$48 sps:$4 sm:$0xff]  }
 0x149   : > { %3061 = vmatprep.subr.bf16.mxu0 %v4405_v23  ;;  %3143 = vmatprep.subr.bf16.mxu1 %v4408_v24  ;;  %v4457_v23 = vld [vmem:[%s5833_s1 + $0x9e0] ss:$48 sps:$4 sm:$0xff]   ;;  %v4460_v24 = vld [vmem:[%s5833_s1 + $0x9e8] ss:$48 sps:$4 sm:$0xff]  }
 0x14a   : > { %3091 = vmatprep.mubr.bf16.mxu0 %v4861_v30  ;;  %3173 = vmatprep.mubr.bf16.mxu1 %v4861_v30  ;;  %v4420_v30 = vld [vmem:[%s5833_s1 + $0x74c] ss:$48 sps:$4 sm:$0xff]  }
 0x14c   : > { %3062 = vmatpush1.bf16.msra.mxu0 %v4403_v25  ;;  %3144 = vmatpush1.bf16.msra.mxu1 %v4406_v26  ;;  %v4465_v25 = vld [vmem:[%s5833_s1 + $0xa44] ss:$48 sps:$4 sm:$0xff]   ;;  %v4468_v26 = vld [vmem:[%s5833_s1 + $0xa4c] ss:$48 sps:$4 sm:$0xff]  }
 0x14d   : > { %3063 = vmatprep.subr.bf16.mxu0 %v4411_v27  ;;  %3145 = vmatprep.subr.bf16.mxu1 %v4414_v5  ;;  %v4463_v27 = vld [vmem:[%s5833_s1 + $0xa40] ss:$48 sps:$4 sm:$0xff]   ;;  %v4466_v5 = vld [vmem:[%s5833_s1 + $0xa48] ss:$48 sps:$4 sm:$0xff]  }
 0x150   : > { %3064 = vmatpush1.bf16.msra.mxu0 %v4409_v48  ;;  %3146 = vmatpush1.bf16.msra.mxu1 %v4412_v29  ;;  %v4474_v48 = vld [vmem:[%s5833_s1 + $0xaac] ss:$48 sps:$4 sm:$0xff]   ;;  %v4469_v29 = vld [vmem:[%s5833_s1 + $0xaa0] ss:$48 sps:$4 sm:$0xff]  }
 0x151   : > { %3065 = vmatprep.subr.bf16.mxu0 %v4417_v31  ;;  %3147 = vmatprep.subr.bf16.mxu1 %v4420_v30  ;;  %v4472_v31 = vld [vmem:[%s5833_s1 + $0xaa8] ss:$48 sps:$4 sm:$0xff]   ;;  %v4477_v30 = vld [vmem:[%s5833_s1 + $0xb04] ss:$48 sps:$4 sm:$0xff]  }
 0x154   : > { %3066 = vmatpush1.bf16.msra.mxu0 %v4415_v33  ;;  %3148 = vmatpush1.bf16.msra.mxu1 %v4418_v34  ;;  %v4480_v33 = vld [vmem:[%s5833_s1 + $0xb0c] ss:$48 sps:$4 sm:$0xff]   ;;  %v4475_v34 = vld [vmem:[%s5833_s1 + $0xb00] ss:$48 sps:$4 sm:$0xff]  }
 0x155   : > { %3067 = vmatprep.subr.bf16.mxu0 %v4423_v35  ;;  %3149 = vmatprep.subr.bf16.mxu1 %v4426_v36  ;;  %v4478_v35 = vld [vmem:[%s5833_s1 + $0xb08] ss:$48 sps:$4 sm:$0xff]   ;;  %v4483_v36 = vld [vmem:[%s5833_s1 + $0xb64] ss:$48 sps:$4 sm:$0xff]  }
 0x158   : > { %3068 = vmatpush1.bf16.msra.mxu0 %v4421_v40  ;;  %3150 = vmatpush1.bf16.msra.mxu1 %v4424_v41  ;;  %v4486_v40 = vld [vmem:[%s5833_s1 + $0xb6c] ss:$48 sps:$4 sm:$0xff]   ;;  %v4481_v41 = vld [vmem:[%s5833_s1 + $0xb60] ss:$48 sps:$4 sm:$0xff]  }
 0x159   : > { %3069 = vmatprep.subr.bf16.mxu0 %v4429_v44  ;;  %3151 = vmatprep.subr.bf16.mxu1 %v4432_v45  ;;  %v4484_v44 = vld [vmem:[%s5833_s1 + $0xb68] ss:$48 sps:$4 sm:$0xff]   ;;  %v4489_v45 = vld [vmem:[%s5833_s1 + $0xbc4] ss:$48 sps:$4 sm:$0xff]  }
 0x15a   : > { %v2765_v55 = vpop.f32.mrb[0].mxu0  ;;  %v2847_v56 = vpop.f32.mrb[0].mxu1 }
 0x15b   : > { %v3853_v57 = vadd.f32 %v2765_v55, %v699_v46  ;;  %v3855_v58 = vadd.f32 %v2847_v56, %v707_v47  ;;  %v2767_v59 = vpop.f32.mrb[1].mxu0  ;;  %v2849_v60 = vpop.f32.mrb[1].mxu1  ;;  %v4492_v46 = vld [vmem:[%s5833_s1 + $0xbcc] ss:$48 sps:$4 sm:$0xff]   ;;  %v4487_v47 = vld [vmem:[%s5833_s1 + $0xbc0] ss:$48 sps:$4 sm:$0xff]  }
 0x15c   : > { %v3854_v61 = vadd.f32 %v2767_v59, %v703_v49  ;;  %v3856_v62 = vadd.f32 %v2849_v60, %v711_v50  ;;  %v2769_v63 = vpop.f32.mrb[2].mxu0  ;;  %v2851_v0 = vpop.f32.mrb[2].mxu1  ;;  %3070 = vmatpush1.bf16.msra.mxu0 %v4427_v51  ;;  %3152 = vmatpush1.bf16.msra.mxu1 %v4430_v52  ;;  %v4490_v49 = vld [vmem:[%s5833_s1 + $0xbc8] ss:$48 sps:$4 sm:$0xff]   ;;  %v714_v50 = vsub.s32 4, %v5617_v32  ;;  %v722_v51 = vsub.s32 6, %v5617_v32 }
 0x15d   : > { %v2770_v3 = vpop.f32.mrb[3].mxu0  ;;  %v2852_v4 = vpop.f32.mrb[3].mxu1  ;;  %3071 = vmatprep.subr.bf16.mxu0 %v4435_v53  ;;  %3153 = vmatprep.subr.bf16.mxu1 %v4438_v54  ;;  %v718_v52 = vsub.s32 5, %v5617_v32  ;;  %v726_v53 = vsub.s32 7, %v5617_v32 }
 0x15e   : > { %v3847_v8 = vpack.c.bf16 %v3854_v61, %v3853_v57  ;;  %v3848_v10 = vpack.c.bf16 %v3856_v62, %v3855_v58  ;;  %v715_v54 = vrot.slane %v5643_v42, %v714_v50  ;;  %v723_v55 = vrot.slane %v5643_v42, %v722_v51 }
 0x15f   : > { %v719_v56 = vrot.slane %v5643_v42, %v718_v52  ;;  %v727_v57 = vrot.slane %v5643_v42, %v726_v53  ;;  %v693_v42 = vld [vmem:[%s5834_s2 + $0x8] sm:$0xf] }
 0x160   : > { %3206 = vst [vmem:[%s287_s11] sm:$0xff] %v3847_v8  ;;  %3207 = vst [vmem:[%s287_s11 + $0x8] sm:$0xff] %v3848_v10  ;;  %3072 = vmatpush1.bf16.msra.mxu0 %v4433_v1  ;;  %3154 = vmatpush1.bf16.msra.mxu1 %v4436_v2  ;;  %v731_v8 = vrot.slane %v693_v42, %v698_v37  ;;  %v739_v10 = vrot.slane %v693_v42, %v706_v38 }
 0x161   : > { %3073 = vmatprep.subr.bf16.mxu0 %v4441_v6  ;;  %3155 = vmatprep.subr.bf16.mxu1 %v4444_v7 }
 0x164   : > { %3074 = vmatpush1.bf16.msra.mxu0 %v4439_v11  ;;  %3156 = vmatpush1.bf16.msra.mxu1 %v4442_v12  ;;  %v735_v11 = vrot.slane %v693_v42, %v702_v39  ;;  %v743_v12 = vrot.slane %v693_v42, %v710_v43 }
 0x165   : > { %3075 = vmatprep.subr.bf16.mxu0 %v4447_v13  ;;  %3157 = vmatprep.subr.bf16.mxu1 %v4450_v14 }
 0x168   : > { %3076 = vmatpush1.bf16.msra.mxu0 %v4445_v15  ;;  %3158 = vmatpush1.bf16.msra.mxu1 %v4448_v16 }
 0x169   : > { %3077 = vmatprep.subr.bf16.mxu0 %v4453_v17  ;;  %3159 = vmatprep.subr.bf16.mxu1 %v4456_v18 }
 0x16c   : > { %3078 = vmatpush1.bf16.msra.mxu0 %v4451_v19  ;;  %3160 = vmatpush1.bf16.msra.mxu1 %v4454_v20 }
 0x16d   : > { %3079 = vmatprep.subr.bf16.mxu0 %v4459_v21  ;;  %3161 = vmatprep.subr.bf16.mxu1 %v4462_v22 }
 0x170   : > { %3080 = vmatpush1.bf16.msra.mxu0 %v4457_v23  ;;  %3162 = vmatpush1.bf16.msra.mxu1 %v4460_v24 }
 0x171   : > { %3081 = vmatprep.subr.bf16.mxu0 %v4465_v25  ;;  %3163 = vmatprep.subr.bf16.mxu1 %v4468_v26 }
 0x174   : > { %3082 = vmatpush1.bf16.msra.mxu0 %v4463_v27  ;;  %3164 = vmatpush1.bf16.msra.mxu1 %v4466_v5 }
 0x175   : > { %3083 = vmatprep.subr.bf16.mxu0 %v4471_v28  ;;  %3165 = vmatprep.subr.bf16.mxu1 %v4474_v48 }
 0x178   : > { %3084 = vmatpush1.bf16.msra.mxu0 %v4469_v29  ;;  %3166 = vmatpush1.bf16.msra.mxu1 %v4472_v31 }
 0x179   : > { %3085 = vmatprep.subr.bf16.mxu0 %v4477_v30  ;;  %3167 = vmatprep.subr.bf16.mxu1 %v4480_v33 }
 0x17c   : > { %3086 = vmatpush1.bf16.msra.mxu0 %v4475_v34  ;;  %3168 = vmatpush1.bf16.msra.mxu1 %v4478_v35 }
 0x17d   : > { %3087 = vmatprep.subr.bf16.mxu0 %v4483_v36  ;;  %3169 = vmatprep.subr.bf16.mxu1 %v4486_v40 }
 0x180   : > { %3088 = vmatpush1.bf16.msra.mxu0 %v4481_v41  ;;  %3170 = vmatpush1.bf16.msra.mxu1 %v4484_v44 }
 0x181   : > { %3089 = vmatprep.subr.bf16.mxu0 %v4489_v45  ;;  %3171 = vmatprep.subr.bf16.mxu1 %v4492_v46 }
 0x184   : > { %3090 = vmatpush1.bf16.msra.mxu0 %v4487_v47  ;;  %3172 = vmatpush1.bf16.msra.mxu1 %v4490_v49 }
 0x187   : > { %3092 = vmatmul.mubr.bf16.vlgmr.msra.gmra.mrb[8].mxu0 %v4987_v9  ;;  %3174 = vmatmul.mubr.bf16.vlgmr.msra.gmra.mrb[8].mxu1 %v4987_v9 }
 0x1da   : > { %v2929_v58 = vpop.f32.mrb[4].mxu0  ;;  %v3011_v59 = vpop.f32.mrb[4].mxu1 }
 0x1db   : > { %v3857_v9 = vadd.f32 %v2929_v58, %v715_v54  ;;  %v3859_v60 = vadd.f32 %v3011_v59, %v723_v55  ;;  %v2931_v61 = vpop.f32.mrb[5].mxu0  ;;  %v3013_v62 = vpop.f32.mrb[5].mxu1 }
 0x1dc   : > { %v3858_v63 = vadd.f32 %v2931_v61, %v719_v56  ;;  %v3860_v0 = vadd.f32 %v3013_v62, %v727_v57  ;;  %v2933_v1 = vpop.f32.mrb[6].mxu0  ;;  %v3015_v2 = vpop.f32.mrb[6].mxu1 }
 0x1dd   : > { %v2934_v3 = vpop.f32.mrb[7].mxu0  ;;  %v3016_v4 = vpop.f32.mrb[7].mxu1 }
 0x1de   : > { %v3849_v6 = vpack.c.bf16 %v3858_v63, %v3857_v9  ;;  %v3850_v7 = vpack.c.bf16 %v3860_v0, %v3859_v60 }
 0x1e0   : > { %3220 = vst [vmem:[%s296_s27] sm:$0xff] %v3849_v6  ;;  %3221 = vst [vmem:[%s296_s27 + $0x8] sm:$0xff] %v3850_v7 }
 0x25a   : > { %v3093_v13 = vpop.f32.mrb[8].mxu0  ;;  %v3175_v14 = vpop.f32.mrb[8].mxu1 }
 0x25b   : > { %v3861_v15 = vadd.f32 %v3093_v13, %v731_v8  ;;  %v3863_v16 = vadd.f32 %v3175_v14, %v739_v10  ;;  %v3095_v17 = vpop.f32.mrb[9].mxu0  ;;  %v3177_v18 = vpop.f32.mrb[9].mxu1 }
 0x25c   : > { %v3862_v19 = vadd.f32 %v3095_v17, %v735_v11  ;;  %v3864_v20 = vadd.f32 %v3177_v18, %v743_v12  ;;  %v3097_v21 = vpop.f32.mrb[10].mxu0  ;;  %v3179_v22 = vpop.f32.mrb[10].mxu1 }
 0x25d   : > { %v3098_v37 = vpop.f32.mrb[11].mxu0  ;;  %v3180_v38 = vpop.f32.mrb[11].mxu1 }
 0x25e   : > { %v3851_v39 = vpack.c.bf16 %v3862_v19, %v3861_v15  ;;  %v3852_v23 = vpack.c.bf16 %v3864_v20, %v3863_v16 }
 0x260   : > { %3234 = vst [vmem:[%s305_s7] sm:$0xff] %v3851_v39  ;;  %3235 = vst [vmem:[%s305_s7 + $0x8] sm:$0xff] %v3852_v23 }
 0x261 PF: > { %s16_s20 = sadd.s32 1, %s4515_s20   ;;  %s5838_s18 = smov %s4511_s19 }
 0x262   : > { %p13_p5 = scmp.ge.s32.totalorder %s16_s20, 4   ;;  %s5839_s19 = smov %s5841_s21 }
 0x264   :  { %15 = sbr.rel (!%p13_p5) target bundleno = 2 (0x2), region = 86 }

</bundles_post_ra>
